<compile_context>
chip_gen: v6e
topology: v6e:2x2x1
jax: 0.10.0
libtpu: 0.0.40
codegen_flags: <defaults>
</compile_context>

<pallas_src>
import functools

import jax
import jax.numpy as jnp
from jax import lax
from jax.experimental import pallas as pl
from jax.experimental.pallas import tpu as pltpu

BN_EPS = 1e-5
LANES = 128
SUBLANES = 8


def _round_up(x, m):
    return ((x + m - 1) // m) * m


def _vmem_budget_bytes():
    cap = 64 << 20                                    # v7x-safe fallback
    try:
        info = pltpu.get_tpu_info()
        cap = int(getattr(info, "vmem_capacity_bytes", cap)) or cap
    except Exception:
        pass
    # ~44.8 MiB on v7x (64 MiB parts), ~89.6 MiB on v5e/v6e (128 MiB parts).
    return min(int(cap * 0.7), 100 << 20)


def _conv_relu_stats_kernel(x_ref, w_ref, b_ref, y_ref, stats_ref, *,
                            kh, kw, wpp, ow, ows, stride,
                            rows_valid, needs_row_mask):
    """One (row-tile, cout-tile) step.

    x_ref:     (RT, KH*WPP, Cin_p)  row-tap-expanded activations (compute dtype)
    w_ref:     (KH*KW*Cin_p, TCN)   im2col-ordered weights (compute dtype)
    b_ref:     (1, TCN)             bias (f32)
    y_ref:     (RT, OW, TCN)        conv+bias+ReLU output
    stats_ref: (1, 2, TCN)          per-tile BN partials: [sum, sum_sq]
    """
    rt = x_ref.shape[0]
    tcn = w_ref.shape[1]

    # In-kernel im2col: concatenate the KH*KW taps along the contraction axis
    # so the MXU sees a single matmul with K = KH*KW*Cin_p.
    chunks = []
    for i in range(kh):
        base = i * wpp
        for j in range(kw):
            chunks.append(x_ref[:, base + j: base + j + ows, :])
    lhs = jnp.concatenate(chunks, axis=-1)            # (RT, OWs, KH*KW*Cin_p)
    lhs = lhs.reshape(rt * ows, lhs.shape[-1])

    acc = jnp.dot(lhs, w_ref[...], preferred_element_type=jnp.float32)
    y = jnp.maximum(acc + b_ref[...], 0.0)            # bias + ReLU (f32)
    y = y.reshape(rt, ows, tcn)
    if stride > 1:
        # Drop the extra stride-1 column positions before the store so the
        # y writeback and the BN stats only cover true output columns.
        y = y.reshape(rt, ow, stride, tcn)[:, :, 0, :]

    y_ref[...] = y.astype(y_ref.dtype)

    ym = y
    if needs_row_mask:
        # Only the zero-padded tail rows (beyond N*OH) are invalid; mask them
        # out of the statistics with an in-kernel iota (no HBM mask array).
        row = (pl.program_id(0) * rt
               + lax.broadcasted_iota(jnp.int32, (rt, 1, 1), 0))
        ym = jnp.where(row < rows_valid, y, 0.0)
    ym2 = ym.reshape(rt * ow, tcn)
    stats_ref[0, 0:1, :] = jnp.sum(ym2, axis=0, keepdims=True)
    stats_ref[0, 1:2, :] = jnp.sum(ym2 * ym2, axis=0, keepdims=True)


def _bn_nchw_kernel(y_ref, scale_ref, shift_ref, o_ref, *, cout):
    """Normalize and fuse the NHWC->NCHW transpose into the output write."""
    rt2, ow, cpad = y_ref.shape
    y = y_ref[...].astype(jnp.float32).reshape(rt2 * ow, cpad)
    z = y * scale_ref[...] + shift_ref[...]
    o_ref[0] = z.T[:cout, :]                          # (Cout, rows*OW) block


@functools.partial(jax.jit, static_argnames=("padding", "stride", "compute_dtype"))
def conv_block_forward(x_nchw, conv_w, conv_b, bn_gamma, bn_beta,
                       padding=0, stride=1, compute_dtype=jnp.bfloat16):
    """x_nchw: (N, Cin, H, W); conv_w: (Cout, Cin, KH, KW) (PyTorch layout)."""
    n, cin, h, w = x_nchw.shape
    cout, _, kh, kw = conv_w.shape
    s = stride

    hp, wp = h + 2 * padding, w + 2 * padding
    oh, ow = (hp - kh) // s + 1, (wp - kw) // s + 1
    ows = ow * s                                  # stride-1 column positions computed
    wpp = max(wp, ows + kw - 1)                   # zero-pad width so all taps are in-bounds
    cin_p = _round_up(cin, SUBLANES)
    cpad = _round_up(cout, LANES)                 # lane-dense output channels
    kk = kh * kw * cin_p                          # fused contraction depth
    csize = jnp.dtype(compute_dtype).itemsize
    y_dtype = compute_dtype                       # bf16 y_full halves HBM traffic
    y_size = jnp.dtype(y_dtype).itemsize
    budget = _vmem_budget_bytes()

    # Cout tile (multiple of 128) so large channel counts still fit VMEM.
    if cpad <= 512:
        tcn = cpad
    elif cpad % 512 == 0:
        tcn = 512
    elif cpad % 256 == 0:
        tcn = 256
    else:
        tcn = 128
    num_ct = cpad // tcn

    # ---- pass-1 row tile: biggest multiple of 8 that fits the VMEM budget ---
    def p1_bytes(r):
        return (2 * r * kh * wpp * cin_p * csize          # x block (double-buffered)
                + 2 * kk * tcn * csize + 2 * tcn * 4      # weights + bias
                + 2 * r * ow * tcn * y_size               # y block
                + 2 * 2 * tcn * 4                         # stats block
                + r * ows * (kk * csize + 2 * tcn * 4))   # lhs + acc temporaries

    rt = _round_up(max(8, -(-2048 // ows)), 8)            # target ~2K matmul rows
    rt = min(rt, _round_up(n * oh, 8))
    while rt > 8 and p1_bytes(rt) > 0.8 * budget:
        rt -= 8
    nr_pad = _round_up(n * oh, rt)
    num_rt = nr_pad // rt
    needs_row_mask = nr_pad != n * oh

    # ---- layout prep (one activation pass in XLA) ---------------------------
    # NCHW -> NHWC, spatial zero-pad, channel pad to a sublane multiple.
    # TODO(synk): keep NHWC end-to-end in a real network; this input transpose
    # only exists to match the PyTorch NCHW API.
    x = jnp.transpose(x_nchw.astype(jnp.float32), (0, 2, 3, 1))
    x = jnp.pad(x, ((0, 0), (padding, padding),
                    (padding, padding + (wpp - wp)), (0, cin_p - cin)))
    # Row-tap expansion: x_rows[n*OH + oy, i*WPP + col, c] = x_pad[n, oy*s+i, col, c].
    # Exact row-stride handling and halo-free pass-1 row tiles.
    # TODO(synk): a manual-DMA halo pipeline (pl.ANY + pltpu.make_async_copy)
    # would avoid this ~KH/s x expansion of the input stream in HBM, and a
    # W*Cin lane packing would fix the cin_p=8 lane-sparse x block for tiny Cin.
    taps = [x[:, i: i + (oh - 1) * s + 1: s, :, :] for i in range(kh)]
    x_rows = jnp.stack(taps, axis=2).reshape(n * oh, kh * wpp, cin_p)
    x_rows = x_rows.astype(compute_dtype)
    if nr_pad > n * oh:
        x_rows = jnp.pad(x_rows, ((0, nr_pad - n * oh), (0, 0), (0, 0)))

    # (Cout, Cin, KH, KW) -> (KH*KW*Cin_p, Cpad) matching the in-kernel im2col
    # ordering K = (i*KW + j)*Cin_p + c.  Bias lane-padded, kept in f32.
    w_r = jnp.transpose(conv_w.astype(jnp.float32), (2, 3, 1, 0))
    w_r = jnp.pad(w_r, ((0, 0), (0, 0), (0, cin_p - cin), (0, cpad - cout)))
    w_r = w_r.reshape(kk, cpad).astype(compute_dtype)
    b_r = jnp.pad(conv_b.astype(jnp.float32), (0, cpad - cout)).reshape(1, cpad)

    # ---- Pass 1: fused-K conv matmul + bias + ReLU + BN moment partials -----
    # TODO(synk): w_r/b_r have constant index maps but are still double-buffered
    # by the auto-pipeliner; pipeline_mode=pl.Buffered(1) would halve that
    # footprint on v7x for large Cin*Cout weight stacks.
    y_full, stats = pl.pallas_call(
        functools.partial(_conv_relu_stats_kernel, kh=kh, kw=kw, wpp=wpp,
                          ow=ow, ows=ows, stride=s, rows_valid=n * oh,
                          needs_row_mask=needs_row_mask),
        grid=(num_rt, num_ct),
        in_specs=[
            pl.BlockSpec((rt, kh * wpp, cin_p), lambda t, c: (t, 0, 0)),
            pl.BlockSpec((kk, tcn), lambda t, c: (0, c)),
            pl.BlockSpec((1, tcn), lambda t, c: (0, c)),
        ],
        out_specs=[
            pl.BlockSpec((rt, ow, tcn), lambda t, c: (t, 0, c)),
            pl.BlockSpec((1, 2, tcn), lambda t, c: (t, 0, c)),
        ],
        out_shape=[
            jax.ShapeDtypeStruct((nr_pad, ow, cpad), y_dtype),
            jax.ShapeDtypeStruct((num_rt, 2, cpad), jnp.float32),
        ],
        compiler_params=pltpu.CompilerParams(
            dimension_semantics=("parallel", "parallel"),
            vmem_limit_bytes=budget,
        ),
    )(x_rows, w_r, b_r)

    # ---- Tiny cross-tile stats reduce + BN scale/shift fold (XLA, ~KB) ------
    m_true = n * oh * ow
    total = jnp.sum(stats[:, 0, :], axis=0)
    total_sq = jnp.sum(stats[:, 1, :], axis=0)
    mean = total / m_true
    # TODO(synk): E[x^2]-mean^2 can cancel for large-magnitude activations; a
    # centered/Welford reduction would be safer if this feeds training stats.
    var = jnp.maximum(total_sq / m_true - mean * mean, 0.0)  # biased (PyTorch train)
    gamma_p = jnp.pad(bn_gamma.astype(jnp.float32), (0, cpad - cout))
    beta_p = jnp.pad(bn_beta.astype(jnp.float32), (0, cpad - cout))
    scale_v = gamma_p * lax.rsqrt(var + BN_EPS)
    scale = scale_v.reshape(1, cpad)
    shift = (beta_p - mean * scale_v).reshape(1, cpad)

    # ---- Pass 2: normalize + fused NHWC->NCHW writeback ----------------------
    # Output blocks are (1, Cout, rows*OW): lane-dense along the flattened
    # spatial axis, so the final reshape below is free (no extra activation pass).
    def p2_bytes(r):
        return (2 * r * ow * cpad * y_size + 2 * cout * r * ow * 4
                + 3 * r * ow * cpad * 4 + 4 * cpad * 4)

    rt2 = oh
    for d in range(oh, 0, -1):
        if oh % d:
            continue
        if d != oh and (d * ow) % LANES:
            continue
        rt2 = d
        if p2_bytes(d) <= 0.8 * budget:
            break
    num_t2 = oh // rt2

    out_flat = pl.pallas_call(
        functools.partial(_bn_nchw_kernel, cout=cout),
        grid=(n, num_t2),
        in_specs=[
            pl.BlockSpec((rt2, ow, cpad), lambda b, t: (b * num_t2 + t, 0, 0)),
            pl.BlockSpec((1, cpad), lambda b, t: (0, 0)),
            pl.BlockSpec((1, cpad), lambda b, t: (0, 0)),
        ],
        out_specs=pl.BlockSpec((1, cout, rt2 * ow), lambda b, t: (b, 0, t)),
        out_shape=jax.ShapeDtypeStruct((n, cout, oh * ow), jnp.float32),
        compiler_params=pltpu.CompilerParams(
            dimension_semantics=("parallel", "parallel"),
            vmem_limit_bytes=budget,
        ),
    )(y_full, scale, shift)

    return out_flat.reshape(n, cout, oh, ow)


def _reference(x_nchw, conv_w, conv_b, bn_gamma, bn_beta, padding=0, stride=1):
    """Plain-JAX reference (conv + relu + train-mode batchnorm)."""
    x = x_nchw.astype(jnp.float32)
    y = lax.conv_general_dilated(
        x, conv_w.astype(jnp.float32),
        window_strides=(stride, stride),
        padding=[(padding, padding), (padding, padding)],
        dimension_numbers=("NCHW", "OIHW", "NCHW"))
    y = y + conv_b.reshape(1, -1, 1, 1)
    y = jnp.maximum(y, 0.0)
    mean = jnp.mean(y, axis=(0, 2, 3), keepdims=True)
    var = jnp.mean((y - mean) ** 2, axis=(0, 2, 3), keepdims=True)
    return ((y - mean) * lax.rsqrt(var + BN_EPS) * bn_gamma.reshape(1, -1, 1, 1)
            + bn_beta.reshape(1, -1, 1, 1))


def _make_params(key, cin, cout, kh, kw):
    kw_, kb = jax.random.split(key)
    fan_in = cin * kh * kw
    bound = 1.0 / (fan_in ** 0.5)
    conv_w = jax.random.uniform(kw_, (cout, cin, kh, kw), minval=-bound,
                                maxval=bound, dtype=jnp.float32)
    conv_b = jax.random.uniform(kb, (cout,), minval=-bound, maxval=bound,
                                dtype=jnp.float32)
    return conv_w, conv_b


if __name__ == "__main__":
    key = jax.random.PRNGKey(0)
    k1, k2, k3 = jax.random.split(key, 3)

    # Case 1: ConvBlock(4, 8, 3, padding=1), stride 1, f32 compute path.
    N, CIN, H, W, COUT, KH, KW = 2, 4, 16, 16, 8, 3, 3
    x = jax.random.normal(k1, (N, CIN, H, W), dtype=jnp.float32)
    conv_w, conv_b = _make_params(k2, CIN, COUT, KH, KW)
    gamma = jnp.ones((COUT,), jnp.float32)
    beta = jnp.zeros((COUT,), jnp.float32)

    out = jax.block_until_ready(
        conv_block_forward(x, conv_w, conv_b, gamma, beta, padding=1, stride=1,
                           compute_dtype=jnp.float32))
    ref = _reference(x, conv_w, conv_b, gamma, beta, padding=1, stride=1)
    assert out.shape == (N, COUT, H, W), out.shape
    assert jnp.allclose(out, ref, atol=5e-4, rtol=5e-4), \
        float(jnp.max(jnp.abs(out - ref)))

    # Case 2: padding=0, stride=2, non-aligned channels/spatial (f32 path).
    N2, CIN2, H2, W2, COUT2 = 2, 3, 11, 11, 5
    x2 = jax.random.normal(k3, (N2, CIN2, H2, W2), dtype=jnp.float32)
    conv_w2, conv_b2 = _make_params(k2, CIN2, COUT2, 3, 3)
    g2 = 0.5 + jax.random.uniform(k1, (COUT2,), dtype=jnp.float32)
    b2 = 0.1 * jax.random.normal(k3, (COUT2,), dtype=jnp.float32)
    out2 = jax.block_until_ready(
        conv_block_forward(x2, conv_w2, conv_b2, g2, b2, padding=0, stride=2,
                           compute_dtype=jnp.float32))
    ref2 = _reference(x2, conv_w2, conv_b2, g2, b2, padding=0, stride=2)
    assert out2.shape == ref2.shape, (out2.shape, ref2.shape)
    assert jnp.allclose(out2, ref2, atol=5e-4, rtol=5e-4), \
        float(jnp.max(jnp.abs(out2 - ref2)))

    # Case 3: default bf16 MXU inputs + bf16 y_full (v5e/v6e/v7x fast path);
    # f32 accumulation, stats and BN math.  Note: input/weights are quantized
    # to bf16 before the conv, hence the relaxed tolerance.
    out3 = jax.block_until_ready(
        conv_block_forward(x, conv_w, conv_b, gamma, beta, padding=1, stride=1))
    assert jnp.allclose(out3, ref, atol=1e-1, rtol=1e-1), \
        float(jnp.max(jnp.abs(out3 - ref)))

    print("KERNEL_OK")
</pallas_src>

<mosaic_0001>
module attributes {stable_mosaic.version = 11 : i64} {
  func.func @_conv_relu_stats_kernel(%arg0: i32, %arg1: i32, %arg2: memref<32x54x8xf32, #tpu.memory_space<vmem>>, %arg3: memref<72x128xf32, #tpu.memory_space<vmem>>, %arg4: memref<1x128xf32, #tpu.memory_space<vmem>>, %arg5: memref<32x16x128xf32, #tpu.memory_space<vmem>>, %arg6: memref<1x2x128xf32, #tpu.memory_space<vmem>>) attributes {dimension_semantics = [#tpu.dimension_semantics<parallel>, #tpu.dimension_semantics<parallel>], iteration_bounds = array<i64: 1, 1>, scalar_prefetch = 0 : i64, scratch_operands = 0 : i64, tpu.core_type = #tpu.core_type<tc>, window_params = [{transform_indices = @transform_0, window_bounds = array<i64: 32, 54, 8>}, {transform_indices = @transform_1, window_bounds = array<i64: 72, 128>}, {transform_indices = @transform_2, window_bounds = array<i64: 1, 128>}, {transform_indices = @transform_3, window_bounds = array<i64: 32, 16, 128>}, {transform_indices = @transform_4, window_bounds = array<i64: 1, 2, 128>}]} {
    %c0 = arith.constant 0 : index
    %c0_0 = arith.constant 0 : index
    %c0_1 = arith.constant 0 : index
    %0 = vector.load %arg2[%c0, %c0_0, %c0_1] : memref<32x54x8xf32, #tpu.memory_space<vmem>>, vector<32x16x8xf32>
    %c0_2 = arith.constant 0 : index
    %c1 = arith.constant 1 : index
    %c0_3 = arith.constant 0 : index
    %1 = vector.load %arg2[%c0_2, %c1, %c0_3] : memref<32x54x8xf32, #tpu.memory_space<vmem>>, vector<32x16x8xf32>
    %c0_4 = arith.constant 0 : index
    %c2 = arith.constant 2 : index
    %c0_5 = arith.constant 0 : index
    %2 = vector.load %arg2[%c0_4, %c2, %c0_5] : memref<32x54x8xf32, #tpu.memory_space<vmem>>, vector<32x16x8xf32>
    %c0_6 = arith.constant 0 : index
    %c18 = arith.constant 18 : index
    %c0_7 = arith.constant 0 : index
    %3 = vector.load %arg2[%c0_6, %c18, %c0_7] : memref<32x54x8xf32, #tpu.memory_space<vmem>>, vector<32x16x8xf32>
    %c0_8 = arith.constant 0 : index
    %c19 = arith.constant 19 : index
    %c0_9 = arith.constant 0 : index
    %4 = vector.load %arg2[%c0_8, %c19, %c0_9] : memref<32x54x8xf32, #tpu.memory_space<vmem>>, vector<32x16x8xf32>
    %c0_10 = arith.constant 0 : index
    %c20 = arith.constant 20 : index
    %c0_11 = arith.constant 0 : index
    %5 = vector.load %arg2[%c0_10, %c20, %c0_11] : memref<32x54x8xf32, #tpu.memory_space<vmem>>, vector<32x16x8xf32>
    %c0_12 = arith.constant 0 : index
    %c36 = arith.constant 36 : index
    %c0_13 = arith.constant 0 : index
    %6 = vector.load %arg2[%c0_12, %c36, %c0_13] : memref<32x54x8xf32, #tpu.memory_space<vmem>>, vector<32x16x8xf32>
    %c0_14 = arith.constant 0 : index
    %c37 = arith.constant 37 : index
    %c0_15 = arith.constant 0 : index
    %7 = vector.load %arg2[%c0_14, %c37, %c0_15] : memref<32x54x8xf32, #tpu.memory_space<vmem>>, vector<32x16x8xf32>
    %c0_16 = arith.constant 0 : index
    %c38 = arith.constant 38 : index
    %c0_17 = arith.constant 0 : index
    %8 = vector.load %arg2[%c0_16, %c38, %c0_17] : memref<32x54x8xf32, #tpu.memory_space<vmem>>, vector<32x16x8xf32>
    %9 = tpu.concatenate %0, %1, %2, %3, %4, %5, %6, %7, %8 in 2 : vector<32x16x8xf32>, vector<32x16x8xf32>, vector<32x16x8xf32>, vector<32x16x8xf32>, vector<32x16x8xf32>, vector<32x16x8xf32>, vector<32x16x8xf32>, vector<32x16x8xf32>, vector<32x16x8xf32> -> vector<32x16x72xf32>
    %10 = vector.shape_cast %9 : vector<32x16x72xf32> to vector<512x72xf32>
    %c0_18 = arith.constant 0 : index
    %c0_19 = arith.constant 0 : index
    %11 = vector.load %arg3[%c0_18, %c0_19] : memref<72x128xf32, #tpu.memory_space<vmem>>, vector<72x128xf32>
    %cst = arith.constant dense<0.000000e+00> : vector<512x128xf32>
    %12 = tpu.matmul %10, %11, %cst {dimension_numbers = #tpu.dot_dimension_numbers<[1], [0], [0], [1], [0, 0, 1, 1], [], []>} : vector<512x72xf32>, vector<72x128xf32>, vector<512x128xf32> -> vector<512x128xf32>
    %c0_20 = arith.constant 0 : index
    %c0_21 = arith.constant 0 : index
    %13 = vector.load %arg4[%c0_20, %c0_21] : memref<1x128xf32, #tpu.memory_space<vmem>>, vector<1x128xf32>
    %14 = vector.broadcast %13 : vector<1x128xf32> to vector<512x128xf32>
    %15 = arith.addf %12, %14 : vector<512x128xf32>
    %cst_22 = arith.constant 0.000000e+00 : f32
    %16 = vector.broadcast %cst_22 : f32 to vector<512x128xf32>
    %17 = arith.maximumf %15, %16 : vector<512x128xf32>
    %18 = vector.shape_cast %17 : vector<512x128xf32> to vector<32x16x128xf32>
    %c0_23 = arith.constant 0 : index
    %c0_24 = arith.constant 0 : index
    %c0_25 = arith.constant 0 : index
    %19 = vector.load %arg5[%c0_23, %c0_24, %c0_25] : memref<32x16x128xf32, #tpu.memory_space<vmem>>, vector<32x16x128xf32>
    tpu.vector_store %arg5[%c0_23, %c0_24, %c0_25], %18 {strides = array<i32>} : memref<32x16x128xf32, #tpu.memory_space<vmem>>, vector<32x16x128xf32>,
    %20 = vector.shape_cast %18 : vector<32x16x128xf32> to vector<512x128xf32>
    %cst_26 = arith.constant dense<0.000000e+00> : vector<128xf32>
    %21 = vector.multi_reduction <add>, %20, %cst_26 [0] : vector<512x128xf32> to vector<128xf32>
    %22 = vector.shape_cast %21 : vector<128xf32> to vector<1x128xf32>
    %c0_27 = arith.constant 0 : index
    %c0_28 = arith.constant 0 : index
    %c0_29 = arith.constant 0 : index
    %23 = vector.load %arg6[%c0_27, %c0_28, %c0_29] : memref<1x2x128xf32, #tpu.memory_space<vmem>>, vector<1x1x128xf32>
    %24 = vector.shape_cast %23 : vector<1x1x128xf32> to vector<1x128xf32>
    %25 = vector.shape_cast %22 : vector<1x128xf32> to vector<1x1x128xf32>
    tpu.vector_store %arg6[%c0_27, %c0_28, %c0_29], %25 {strides = array<i32>} : memref<1x2x128xf32, #tpu.memory_space<vmem>>, vector<1x1x128xf32>,
    %26 = arith.mulf %20, %20 : vector<512x128xf32>
    %cst_30 = arith.constant dense<0.000000e+00> : vector<128xf32>
    %27 = vector.multi_reduction <add>, %26, %cst_30 [0] : vector<512x128xf32> to vector<128xf32>
    %28 = vector.shape_cast %27 : vector<128xf32> to vector<1x128xf32>
    %c0_31 = arith.constant 0 : index
    %c1_32 = arith.constant 1 : index
    %c0_33 = arith.constant 0 : index
    %29 = vector.load %arg6[%c0_31, %c1_32, %c0_33] : memref<1x2x128xf32, #tpu.memory_space<vmem>>, vector<1x1x128xf32>
    %30 = vector.shape_cast %29 : vector<1x1x128xf32> to vector<1x128xf32>
    %31 = vector.shape_cast %28 : vector<1x128xf32> to vector<1x1x128xf32>
    tpu.vector_store %arg6[%c0_31, %c1_32, %c0_33], %31 {strides = array<i32>} : memref<1x2x128xf32, #tpu.memory_space<vmem>>, vector<1x1x128xf32>,
    return
  }
  func.func @transform_0(%arg0: i32, %arg1: i32) -> (i32, i32, i32) {
    %c0_i32 = arith.constant 0 : i32
    %c0_i32_0 = arith.constant 0 : i32
    %c0_i32_1 = arith.constant 0 : i32
    return %arg0, %c0_i32, %c0_i32_0 : i32, i32, i32
  }
  func.func @transform_1(%arg0: i32, %arg1: i32) -> (i32, i32) {
    %c0_i32 = arith.constant 0 : i32
    %c0_i32_0 = arith.constant 0 : i32
    return %c0_i32, %arg1 : i32, i32
  }
  func.func @transform_2(%arg0: i32, %arg1: i32) -> (i32, i32) {
    %c0_i32 = arith.constant 0 : i32
    %c0_i32_0 = arith.constant 0 : i32
    return %c0_i32, %arg1 : i32, i32
  }
  func.func @transform_3(%arg0: i32, %arg1: i32) -> (i32, i32, i32) {
    %c0_i32 = arith.constant 0 : i32
    %c0_i32_0 = arith.constant 0 : i32
    return %arg0, %c0_i32, %arg1 : i32, i32, i32
  }
  func.func @transform_4(%arg0: i32, %arg1: i32) -> (i32, i32, i32) {
    %c0_i32 = arith.constant 0 : i32
    %c0_i32_0 = arith.constant 0 : i32
    return %arg0, %c0_i32, %arg1 : i32, i32, i32
  }
}

module attributes {stable_mosaic.version = 11 : i64} {
  func.func @_bn_nchw_kernel(%arg0: i32, %arg1: i32, %arg2: memref<16x16x128xf32, #tpu.memory_space<vmem>>, %arg3: memref<1x128xf32, #tpu.memory_space<vmem>>, %arg4: memref<1x128xf32, #tpu.memory_space<vmem>>, %arg5: memref<1x8x256xf32, #tpu.memory_space<vmem>>) attributes {dimension_semantics = [#tpu.dimension_semantics<parallel>, #tpu.dimension_semantics<parallel>], iteration_bounds = array<i64: 2, 1>, scalar_prefetch = 0 : i64, scratch_operands = 0 : i64, tpu.core_type = #tpu.core_type<tc>, window_params = [{transform_indices = @transform_0, window_bounds = array<i64: 16, 16, 128>}, {pipeline_mode = #tpu.pipeline_mode<synchronous>, transform_indices = @transform_1, window_bounds = array<i64: 1, 128>}, {pipeline_mode = #tpu.pipeline_mode<synchronous>, transform_indices = @transform_2, window_bounds = array<i64: 1, 128>}, {transform_indices = @transform_3, window_bounds = array<i64: 1, 8, 256>}]} {
    %c0 = arith.constant 0 : index
    %c0_0 = arith.constant 0 : index
    %c0_1 = arith.constant 0 : index
    %0 = vector.load %arg2[%c0, %c0_0, %c0_1] : memref<16x16x128xf32, #tpu.memory_space<vmem>>, vector<16x16x128xf32>
    %1 = vector.shape_cast %0 : vector<16x16x128xf32> to vector<256x128xf32>
    %c0_2 = arith.constant 0 : index
    %c0_3 = arith.constant 0 : index
    %2 = vector.load %arg3[%c0_2, %c0_3] : memref<1x128xf32, #tpu.memory_space<vmem>>, vector<1x128xf32>
    %3 = vector.broadcast %2 : vector<1x128xf32> to vector<256x128xf32>
    %4 = arith.mulf %1, %3 : vector<256x128xf32>
    %c0_4 = arith.constant 0 : index
    %c0_5 = arith.constant 0 : index
    %5 = vector.load %arg4[%c0_4, %c0_5] : memref<1x128xf32, #tpu.memory_space<vmem>>, vector<1x128xf32>
    %6 = vector.broadcast %5 : vector<1x128xf32> to vector<256x128xf32>
    %7 = arith.addf %4, %6 : vector<256x128xf32>
    %8 = tpu.transpose %7, [1, 0] : vector<256x128xf32> -> vector<128x256xf32>
    %9 = vector.extract_strided_slice %8 {offsets = [0, 0], sizes = [8, 256], strides = [1, 1]} : vector<128x256xf32> to vector<8x256xf32>
    %c0_6 = arith.constant 0 : index
    %c0_7 = arith.constant 0 : index
    %c0_8 = arith.constant 0 : index
    %10 = vector.load %arg5[%c0_6, %c0_7, %c0_8] : memref<1x8x256xf32, #tpu.memory_space<vmem>>, vector<1x8x256xf32>
    %11 = vector.shape_cast %10 : vector<1x8x256xf32> to vector<8x256xf32>
    %12 = vector.shape_cast %9 : vector<8x256xf32> to vector<1x8x256xf32>
    tpu.vector_store %arg5[%c0_6, %c0_7, %c0_8], %12 {strides = array<i32>} : memref<1x8x256xf32, #tpu.memory_space<vmem>>, vector<1x8x256xf32>,
    return
  }
  func.func @transform_0(%arg0: i32, %arg1: i32) -> (i32, i32, i32) {
    %c1_i32 = arith.constant 1 : i32
    %0 = arith.muli %arg0, %c1_i32 : i32
    %1 = arith.addi %0, %arg1 : i32
    %c0_i32 = arith.constant 0 : i32
    %c0_i32_0 = arith.constant 0 : i32
    %c0_i32_1 = arith.constant 0 : i32
    return %1, %c0_i32, %c0_i32_0 : i32, i32, i32
  }
  func.func @transform_1(%arg0: i32, %arg1: i32) -> (i32, i32) {
    %c0_i32 = arith.constant 0 : i32
    %c0_i32_0 = arith.constant 0 : i32
    %c0_i32_1 = arith.constant 0 : i32
    return %c0_i32, %c0_i32_0 : i32, i32
  }
  func.func @transform_2(%arg0: i32, %arg1: i32) -> (i32, i32) {
    %c0_i32 = arith.constant 0 : i32
    %c0_i32_0 = arith.constant 0 : i32
    %c0_i32_1 = arith.constant 0 : i32
    return %c0_i32, %c0_i32_0 : i32, i32
  }
  func.func @transform_3(%arg0: i32, %arg1: i32) -> (i32, i32, i32) {
    %c0_i32 = arith.constant 0 : i32
    %c0_i32_0 = arith.constant 0 : i32
    return %arg0, %c0_i32, %arg1 : i32, i32, i32
  }
}

</mosaic_0001>

<bundles_post_ra>
// kernel: conv_block_forward.3
= control target key start
LH: loop header
LB: loop body
LE: loop exit
PB: predicated region body
PF: predicated region fallthrough
CT: control target
= control target key end

     0   :  { %s547_s12 = smov 0   ;;  %s549_s13 = smov 0   ;;  %s693_s0 = inlined_call_operand.vmem [shape: f32[32,16,128], index: 0, kind: input, shape index: {}]   ;;  %s694_s1 = inlined_call_operand.vmem [shape: f32[1,128], index: 1, kind: input, shape index: {}]   ;;  %s695_s2 = inlined_call_operand.vmem [shape: f32[1,128], index: 2, kind: input, shape index: {}]   ;;  %s696_s3 = inlined_call_operand.vmem [shape: f32[2,8,256], index: 3, kind: output, shape index: {}]  }
   0x1   :  { %s551_s14 = smov 0  }
   0x2 LB: > { %s25_s15 = sadd.s32 1, %s521_s13  ;;  %p467_p0 = scmp.ge.s32.totalorder %s525_s14, 1  ;;  %s525_s14 = sphi %s551_s14, %s13_s14   ;;  %s521_s13 = sphi %s549_s13, %s698_s13   ;;  %s517_s12 = sphi %s547_s12, %s697_s12  }
   0x3   : > { %p27_p1 = scmp.ge.s32.totalorder %s25_s15, 2  ;;  %p157_p2 = scmp.lt.s32.totalorder %s525_s14, 3 }
   0x5   : > { %s700_s15 = smov (%p27_p1, %s25_s15), 0  ;;  %p158_p3 = pnand %p467_p0, %p157_p2 }
   0x6   : > { %s468_s16 = sshll.u32 (!%p158_p3), %s517_s12, 4  ;;  %p197_p5 = scmp.lt.s32.totalorder (!%p158_p3), %s517_s12, 1 }
   0x7   : > { %161 = sbr.rel (%p158_p3) target bundleno = 147 (0x93), region = 32  ;;  %p189_p4 = scmp.lt.s32.totalorder (!%p158_p3), %s468_s16, 31 }
   0xc   : > { %s702_s16 = smov (!%p189_p4, %s468_s16), 31  ;;  %v571_v0 = vld [vmem:[%s694_s1] ss:$0 sm:$0xff]  ;;  %s704_s12 = smov (!%p197_p5, %s517_s12), 1 }
   0xd   : > { %s477_s17 = sshll.u32 %s702_s16, 4  ;;  %v581_v1 = vld [vmem:[%s695_s2] ss:$0 sm:$0xff]  ;;  %s478_s25 = sshll.u32 %s704_s12, 4 }
   0xe   : > { %s576_s22 = scalar_lea.vmem %s693_s0, %s477_s17  ;;  %s204_s28 = scalar_lea.vmem %s696_s3, %s478_s25 }
   0xf   : > { %v222_v2 = vld [vmem:[%s576_s22 + $0x80] sm:$0xff]  ;;  %v223_v4 = vld [vmem:[%s576_s22 + $0x88] sm:$0xff]  ;;  %v224_v9 = vld [vmem:[%s576_s22 + $0x90] sm:$0xff] }
  0x10   : > { %v206_v3 = vld [vmem:[%s576_s22] sm:$0xff]  ;;  %v261_v5 = vmul.f32 %v571_v0, %v222_v2  ;;  %v262_v7 = vmul.f32 %v571_v0, %v223_v4  ;;  %v207_v8 = vld [vmem:[%s576_s22 + $0x8] sm:$0xff]  ;;  %v208_v11 = vld [vmem:[%s576_s22 + $0x10] sm:$0xff]  ;;  %v263_v14 = vmul.f32 %v571_v0, %v224_v9 }
  0x11   : > { %v245_v6 = vmul.f32 %v571_v0, %v206_v3  ;;  %v246_v10 = vmul.f32 %v571_v0, %v207_v8  ;;  %v247_v17 = vmul.f32 %v571_v0, %v208_v11  ;;  %v225_v18 = vld [vmem:[%s576_s22 + $0x98] sm:$0xff]  ;;  %v226_v24 = vld [vmem:[%s576_s22 + $0xa0] sm:$0xff]  ;;  %v227_v30 = vld [vmem:[%s576_s22 + $0xa8] sm:$0xff] }
  0x12   : > { %v300_v12 = vadd.f32 %v581_v1, %v261_v5  ;;  %v301_v15 = vadd.f32 %v581_v1, %v262_v7  ;;  %v209_v19 = vld [vmem:[%s576_s22 + $0x18] sm:$0xff]  ;;  %v264_v20 = vmul.f32 %v571_v0, %v225_v18  ;;  %v302_v21 = vadd.f32 %v581_v1, %v263_v14  ;;  %v210_v25 = vld [vmem:[%s576_s22 + $0x20] sm:$0xff]  ;;  %v211_v31 = vld [vmem:[%s576_s22 + $0x28] sm:$0xff] }
  0x13   : > { %v284_v13 = vadd.f32 %v581_v1, %v245_v6  ;;  %v285_v16 = vadd.f32 %v581_v1, %v246_v10  ;;  %v286_v22 = vadd.f32 %v581_v1, %v247_v17  ;;  %v248_v23 = vmul.f32 %v571_v0, %v209_v19  ;;  %v228_v36 = vld [vmem:[%s576_s22 + $0xb0] sm:$0xff]  ;;  %v229_v42 = vld [vmem:[%s576_s22 + $0xb8] sm:$0xff]  ;;  %v230_v48 = vld [vmem:[%s576_s22 + $0xc0] sm:$0xff] }
  0x14   : > { %348 = vxpose.xlu1.b32.start [1/16] (narrow) %v300_v12, 8  ;;  %v303_v26 = vadd.f32 %v581_v1, %v264_v20  ;;  %v265_v28 = vmul.f32 %v571_v0, %v226_v24  ;;  %v249_v29 = vmul.f32 %v571_v0, %v210_v25  ;;  %v266_v32 = vmul.f32 %v571_v0, %v227_v30  ;;  %v212_v37 = vld [vmem:[%s576_s22 + $0x30] sm:$0xff]  ;;  %v213_v43 = vld [vmem:[%s576_s22 + $0x38] sm:$0xff]  ;;  %v214_v49 = vld [vmem:[%s576_s22 + $0x40] sm:$0xff] }
  0x15   : > { %316 = vxpose.xlu0.b32.start [1/16] (narrow) %v284_v13, 8  ;;  %v287_v27 = vadd.f32 %v581_v1, %v248_v23  ;;  %v250_v35 = vmul.f32 %v571_v0, %v211_v31  ;;  %v267_v38 = vmul.f32 %v571_v0, %v228_v36  ;;  %v251_v41 = vmul.f32 %v571_v0, %v212_v37  ;;  %v231_v54 = vld [vmem:[%s576_s22 + $0xc8] sm:$0xff]  ;;  %v232_v60 = vld [vmem:[%s576_s22 + $0xd0] sm:$0xff]  ;;  %v233_v4 = vld [vmem:[%s576_s22 + $0xd8] sm:$0xff] }
  0x16   : > { %v304_v33 = vadd.f32 %v581_v1, %v265_v28  ;;  %v288_v34 = vadd.f32 %v581_v1, %v249_v29  ;;  %v305_v39 = vadd.f32 %v581_v1, %v266_v32  ;;  %v268_v44 = vmul.f32 %v571_v0, %v229_v42  ;;  %v215_v55 = vld [vmem:[%s576_s22 + $0x48] sm:$0xff]  ;;  %v216_v61 = vld [vmem:[%s576_s22 + $0x50] sm:$0xff]  ;;  %v217_v5 = vld [vmem:[%s576_s22 + $0x58] sm:$0xff] }
  0x17   : > { %v289_v40 = vadd.f32 %v581_v1, %v250_v35  ;;  %v306_v45 = vadd.f32 %v581_v1, %v267_v38  ;;  %v290_v46 = vadd.f32 %v581_v1, %v251_v41  ;;  %v252_v47 = vmul.f32 %v571_v0, %v213_v43  ;;  %v234_v10 = vld [vmem:[%s576_s22 + $0xe0] sm:$0xff]  ;;  %v219_v17 = vld [vmem:[%s576_s22 + $0x68] sm:$0xff]  ;;  %v220_v23 = vld [vmem:[%s576_s22 + $0x70] sm:$0xff] }
  0x18   : > { %349 = vxpose.xlu1.b32.cont [2/16] (narrow) %v301_v15, 8  ;;  %v307_v50 = vadd.f32 %v581_v1, %v268_v44  ;;  %v269_v52 = vmul.f32 %v571_v0, %v230_v48  ;;  %v253_v53 = vmul.f32 %v571_v0, %v214_v49  ;;  %v270_v56 = vmul.f32 %v571_v0, %v231_v54  ;;  %v218_v11 = vld [vmem:[%s576_s22 + $0x60] sm:$0xff]  ;;  %v237_v28 = vld [vmem:[%s576_s22 + $0xf8] sm:$0xff] }
  0x19   : > { %317 = vxpose.xlu0.b32.cont [2/16] (narrow) %v285_v16, 8  ;;  %v291_v51 = vadd.f32 %v581_v1, %v252_v47  ;;  %v254_v59 = vmul.f32 %v571_v0, %v215_v55  ;;  %v271_v62 = vmul.f32 %v571_v0, %v232_v60  ;;  %v255_v3 = vmul.f32 %v571_v0, %v216_v61  ;;  %v235_v16 = vld [vmem:[%s576_s22 + $0xe8] sm:$0xff]  ;;  %v221_v29 = vld [vmem:[%s576_s22 + $0x78] sm:$0xff] }
  0x1a   : > { %v308_v57 = vadd.f32 %v581_v1, %v269_v52  ;;  %v292_v58 = vadd.f32 %v581_v1, %v253_v53  ;;  %v309_v63 = vadd.f32 %v581_v1, %v270_v56  ;;  %v272_v6 = vmul.f32 %v571_v0, %v233_v4 }
  0x1b   : > { %v293_v2 = vadd.f32 %v581_v1, %v254_v59  ;;  %v310_v7 = vadd.f32 %v581_v1, %v271_v62  ;;  %v294_v8 = vadd.f32 %v581_v1, %v255_v3  ;;  %v256_v9 = vmul.f32 %v571_v0, %v217_v5 }
  0x1c   : > { %350 = vxpose.xlu1.b32.cont [3/16] (narrow) %v302_v21, 8  ;;  %v311_v12 = vadd.f32 %v581_v1, %v272_v6  ;;  %v273_v14 = vmul.f32 %v571_v0, %v234_v10  ;;  %v257_v15 = vmul.f32 %v571_v0, %v218_v11  ;;  %v274_v18 = vmul.f32 %v571_v0, %v235_v16 }
  0x1d   : > { %318 = vxpose.xlu0.b32.cont [3/16] (narrow) %v286_v22, 8  ;;  %v295_v13 = vadd.f32 %v581_v1, %v256_v9  ;;  %v258_v21 = vmul.f32 %v571_v0, %v219_v17  ;;  %v236_v22 = vld [vmem:[%s576_s22 + $0xf0] sm:$0xff]  ;;  %v276_v30 = vmul.f32 %v571_v0, %v237_v28 }
  0x1e   : > { %v312_v19 = vadd.f32 %v581_v1, %v273_v14  ;;  %v296_v20 = vadd.f32 %v581_v1, %v257_v15  ;;  %v275_v24 = vmul.f32 %v571_v0, %v236_v22  ;;  %v313_v25 = vadd.f32 %v581_v1, %v274_v18 }
  0x20   : > { %351 = vxpose.xlu1.b32.cont [4/16] (narrow) %v303_v26, 8  ;;  %v297_v26 = vadd.f32 %v581_v1, %v258_v21  ;;  %v314_v31 = vadd.f32 %v581_v1, %v275_v24 }
  0x21   : > { %319 = vxpose.xlu0.b32.cont [4/16] (narrow) %v287_v27, 8  ;;  %v259_v27 = vmul.f32 %v571_v0, %v220_v23 }
  0x23   : > { %v298_v32 = vadd.f32 %v581_v1, %v259_v27 }
  0x24   : > { %352 = vxpose.xlu1.b32.cont [5/16] (narrow) %v304_v33, 8  ;;  %v260_v33 = vmul.f32 %v571_v0, %v221_v29 }
  0x25   : > { %320 = vxpose.xlu0.b32.cont [5/16] (narrow) %v288_v34, 8  ;;  %v315_v34 = vadd.f32 %v581_v1, %v276_v30 }
  0x26   : > { %v299_v35 = vadd.f32 %v581_v1, %v260_v33 }
  0x28   : > { %353 = vxpose.xlu1.b32.cont [6/16] (narrow) %v305_v39, 8 }
  0x29   : > { %321 = vxpose.xlu0.b32.cont [6/16] (narrow) %v289_v40, 8 }
  0x2c   : > { %354 = vxpose.xlu1.b32.cont [7/16] (narrow) %v306_v45, 8 }
  0x2d   : > { %322 = vxpose.xlu0.b32.cont [7/16] (narrow) %v290_v46, 8 }
  0x30   : > { %355 = vxpose.xlu1.b32.cont [8/16] (narrow) %v307_v50, 8 }
  0x31   : > { %323 = vxpose.xlu0.b32.cont [8/16] (narrow) %v291_v51, 8 }
  0x34   : > { %356 = vxpose.xlu1.b32.cont [9/16] (narrow) %v308_v57, 8 }
  0x35   : > { %324 = vxpose.xlu0.b32.cont [9/16] (narrow) %v292_v58, 8 }
  0x38   : > { %357 = vxpose.xlu1.b32.cont [10/16] (narrow) %v309_v63, 8 }
  0x39   : > { %325 = vxpose.xlu0.b32.cont [10/16] (narrow) %v293_v2, 8 }
  0x3c   : > { %358 = vxpose.xlu1.b32.cont [11/16] (narrow) %v310_v7, 8 }
  0x3d   : > { %326 = vxpose.xlu0.b32.cont [11/16] (narrow) %v294_v8, 8 }
  0x40   : > { %359 = vxpose.xlu1.b32.cont [12/16] (narrow) %v311_v12, 8 }
  0x41   : > { %327 = vxpose.xlu0.b32.cont [12/16] (narrow) %v295_v13, 8 }
  0x44   : > { %360 = vxpose.xlu1.b32.cont [13/16] (narrow) %v312_v19, 8 }
  0x45   : > { %328 = vxpose.xlu0.b32.cont [13/16] (narrow) %v296_v20, 8 }
  0x48   : > { %361 = vxpose.xlu1.b32.cont [14/16] (narrow) %v313_v25, 8 }
  0x49   : > { %329 = vxpose.xlu0.b32.cont [14/16] (narrow) %v297_v26, 8 }
  0x4c   : > { %362 = vxpose.xlu1.b32.cont [15/16] (narrow) %v314_v31, 8 }
  0x4d   : > { %330 = vxpose.xlu0.b32.cont [15/16] (narrow) %v298_v32, 8 }
  0x50   : > { %363 = vxpose.xlu1.b32.end [16/16] (narrow) %v315_v34, 8 }
  0x51   : > { %331 = vxpose.xlu0.b32.end [16/16] (narrow) %v299_v35, 8 }
  0x90   : > { %v364_v36 = vpop.trf.xlu1 }
  0x91   : > { %v332_v37 = vpop.trf.xlu0  ;;  %381 = vst [vmem:[%s204_s28 + $0x8] sm:$0xff] %v364_v36 }
  0x92   : > { %380 = vst [vmem:[%s204_s28] sm:$0xff] %v332_v37 }
  0x93 PF: > { %s13_s14 = sadd.s32 1, %s525_s14   ;;  %s697_s12 = smov %s521_s13 }
  0x94   : > { %p10_p6 = scmp.ge.s32.totalorder %s13_s14, 4   ;;  %s698_s13 = smov %s700_s15 }
  0x96   :  { %12 = sbr.rel (!%p10_p6) target bundleno = 2 (0x2), region = 62 }

// kernel: conv_block_forward.2
= control target key start
LH: loop header
LB: loop body
LE: loop exit
PB: predicated region body
PF: predicated region fallthrough
CT: control target
= control target key end

     0   :  { %s4373_s19 = smov 8   ;;  %s4374_s23 = smov 16   ;;  %vm2640_vm0 = vcmask 64512   ;;  %vm2705_vm1 = vcmask 130048   ;;  %vm2770_vm2 = vcmask 195584   ;;  %vm2835_vm3 = vcmask 261120   ;;  %s8454_s0 = inlined_call_operand.vmem [shape: f32[32,54,8], index: 0, kind: input, shape index: {}]   ;;  %s8455_s1 = inlined_call_operand.vmem [shape: f32[72,128], index: 1, kind: input, shape index: {}]   ;;  %s8456_s2 = inlined_call_operand.vmem [shape: f32[1,128], index: 2, kind: input, shape index: {}]   ;;  %s8457_s3 = inlined_call_operand.vmem [shape: f32[32,16,128], index: 3, kind: output, shape index: {0}]   ;;  %s8458_s4 = inlined_call_operand.vmem [shape: f32[1,2,128], index: 4, kind: output, shape index: {1}]  }
   0x1   :  { %v82_v0 = vld [vmem:[%s8454_s0 + $0x39] sm:$0xff]  ;;  %v80_v1 = vld [vmem:[%s8454_s0 + $0x1] sm:$0xff]  ;;  %v81_v3 = vld [vmem:[%s8454_s0 + $0x9] sm:$0xff]  ;;  %s4375_s26 = smov 24   ;;  %s4376_s29 = smov 32   ;;  %vm2900_vm4 = vcmask 326656  }
   0x2   :  { %660 = vrot.lane.b32.xlu1 %v82_v0, %s4373_s19  ;;  %656 = vrot.lane.b32.xlu0 %v80_v1, %s4373_s19  ;;  %v83_v2 = vld [vmem:[%s8454_s0 + $0x41] sm:$0xff]  ;;  %v85_v4 = vld [vmem:[%s8454_s0 + $0x79] sm:$0xff]  ;;  %s4377_s6 = smov 40   ;;  %s4379_s12 = smov 56   ;;  %vm2965_vm5 = vcmask 392192   ;;  %vm3030_vm6 = vcmask 457728  }
   0x3   :  { %v84_v5 = vld [vmem:[%s8454_s0 + $0x71] sm:$0xff]  ;;  %v86_v7 = vld [vmem:[%s8454_s0 + $0xa9] sm:$0xff]  ;;  %v88_v9 = vld [vmem:[%s8454_s0 + $0xe1] sm:$0xff]  ;;  %s4380_s16 = smov 64   ;;  %vm3095_vm7 = vcmask 523264   ;;  %vm3176_vm8 = vcmask 588800  }
   0x4   :  { %v87_v6 = vld [vmem:[%s8454_s0 + $0xb1] sm:$0xff]  ;;  %v89_v8 = vld [vmem:[%s8454_s0 + $0xe9] sm:$0xff]  ;;  %v91_v10 = vld [vmem:[%s8454_s0 + $0x121] sm:$0xff] }
   0x5   :  { %v90_v11 = vld [vmem:[%s8454_s0 + $0x119] sm:$0xff]  ;;  %v92_v13 = vld [vmem:[%s8454_s0 + $0x151] sm:$0xff]  ;;  %v94_v15 = vld [vmem:[%s8454_s0 + $0x189] sm:$0xff] }
   0x6   :  { %662 = vrot.lane.b32.xlu1 %v83_v2, %s4373_s19  ;;  %658 = vrot.lane.b32.xlu0 %v81_v3, %s4373_s19  ;;  %v93_v12 = vld [vmem:[%s8454_s0 + $0x159] sm:$0xff]  ;;  %v95_v14 = vld [vmem:[%s8454_s0 + $0x191] sm:$0xff] }
   0x7   :  { %v97_v16 = vld [vmem:[%s8454_s0 + $0x1c9] sm:$0xff]  ;;  %v96_v17 = vld [vmem:[%s8454_s0 + $0x1c1] sm:$0xff]  ;;  %v98_v19 = vld [vmem:[%s8454_s0 + $0x1f9] sm:$0xff] }
   0x8   :  { %v99_v18 = vld [vmem:[%s8454_s0 + $0x201] sm:$0xff]  ;;  %v101_v20 = vld [vmem:[%s8454_s0 + $0x239] sm:$0xff]  ;;  %v100_v21 = vld [vmem:[%s8454_s0 + $0x231] sm:$0xff] }
   0x9   :  { %v103_v22 = vld [vmem:[%s8454_s0 + $0x271] sm:$0xff]  ;;  %v102_v23 = vld [vmem:[%s8454_s0 + $0x269] sm:$0xff]  ;;  %v104_v25 = vld [vmem:[%s8454_s0 + $0x2a1] sm:$0xff] }
   0xa   :  { %666 = vrot.lane.b32.xlu1 %v85_v4, %s4373_s19  ;;  %664 = vrot.lane.b32.xlu0 %v84_v5, %s4373_s19  ;;  %v105_v24 = vld [vmem:[%s8454_s0 + $0x2a9] sm:$0xff]  ;;  %v107_v26 = vld [vmem:[%s8454_s0 + $0x2e1] sm:$0xff] }
   0xb   :  { %v106_v27 = vld [vmem:[%s8454_s0 + $0x2d9] sm:$0xff]  ;;  %v108_v29 = vld [vmem:[%s8454_s0 + $0x311] sm:$0xff]  ;;  %v110_v31 = vld [vmem:[%s8454_s0 + $0x349] sm:$0xff] }
   0xc   :  { %v109_v28 = vld [vmem:[%s8454_s0 + $0x319] sm:$0xff]  ;;  %v111_v30 = vld [vmem:[%s8454_s0 + $0x351] sm:$0xff]  ;;  %v113_v32 = vld [vmem:[%s8454_s0 + $0x389] sm:$0xff] }
   0xd   :  { %v112_v33 = vld [vmem:[%s8454_s0 + $0x381] sm:$0xff]  ;;  %v114_v35 = vld [vmem:[%s8454_s0 + $0x3b9] sm:$0xff]  ;;  %v116_v37 = vld [vmem:[%s8454_s0 + $0x3f1] sm:$0xff] }
   0xe   :  { %670 = vrot.lane.b32.xlu1 %v87_v6, %s4373_s19  ;;  %668 = vrot.lane.b32.xlu0 %v86_v7, %s4373_s19  ;;  %v115_v34 = vld [vmem:[%s8454_s0 + $0x3c1] sm:$0xff]  ;;  %v117_v36 = vld [vmem:[%s8454_s0 + $0x3f9] sm:$0xff] }
   0xf   :  { %v119_v38 = vld [vmem:[%s8454_s0 + $0x431] sm:$0xff]  ;;  %v118_v39 = vld [vmem:[%s8454_s0 + $0x429] sm:$0xff]  ;;  %v120_v41 = vld [vmem:[%s8454_s0 + $0x461] sm:$0xff] }
  0x10   :  { %v121_v40 = vld [vmem:[%s8454_s0 + $0x469] sm:$0xff]  ;;  %v123_v42 = vld [vmem:[%s8454_s0 + $0x4a1] sm:$0xff]  ;;  %v122_v43 = vld [vmem:[%s8454_s0 + $0x499] sm:$0xff] }
  0x11   :  { %v125_v44 = vld [vmem:[%s8454_s0 + $0x4d9] sm:$0xff]  ;;  %v124_v45 = vld [vmem:[%s8454_s0 + $0x4d1] sm:$0xff]  ;;  %v126_v47 = vld [vmem:[%s8454_s0 + $0x509] sm:$0xff] }
  0x12   :  { %674 = vrot.lane.b32.xlu1 %v89_v8, %s4373_s19  ;;  %672 = vrot.lane.b32.xlu0 %v88_v9, %s4373_s19  ;;  %v127_v46 = vld [vmem:[%s8454_s0 + $0x511] sm:$0xff]  ;;  %v129_v48 = vld [vmem:[%s8454_s0 + $0x549] sm:$0xff] }
  0x13   :  { %v128_v49 = vld [vmem:[%s8454_s0 + $0x541] sm:$0xff]  ;;  %v130_v51 = vld [vmem:[%s8454_s0 + $0x579] sm:$0xff]  ;;  %v132_v53 = vld [vmem:[%s8454_s0 + $0x5b1] sm:$0xff] }
  0x14   :  { %v131_v50 = vld [vmem:[%s8454_s0 + $0x581] sm:$0xff]  ;;  %v133_v52 = vld [vmem:[%s8454_s0 + $0x5b9] sm:$0xff]  ;;  %v135_v54 = vld [vmem:[%s8454_s0 + $0x5f1] sm:$0xff] }
  0x15   :  { %v134_v55 = vld [vmem:[%s8454_s0 + $0x5e9] sm:$0xff]  ;;  %v136_v57 = vld [vmem:[%s8454_s0 + $0x621] sm:$0xff]  ;;  %v138_v59 = vld [vmem:[%s8454_s0 + $0x659] sm:$0xff] }
  0x16   :  { %678 = vrot.lane.b32.xlu1 %v91_v10, %s4373_s19  ;;  %676 = vrot.lane.b32.xlu0 %v90_v11, %s4373_s19  ;;  %v137_v56 = vld [vmem:[%s8454_s0 + $0x629] sm:$0xff]  ;;  %v139_v58 = vld [vmem:[%s8454_s0 + $0x661] sm:$0xff] }
  0x17   :  { %v141_v62 = vld [vmem:[%s8454_s0 + $0x699] sm:$0xff]  ;;  %v140_v63 = vld [vmem:[%s8454_s0 + $0x691] sm:$0xff]  ;;  %v142_v3 = vld [vmem:[%s8454_s0 + $0x6c9] sm:$0xff] }
  0x18   :  { %v143_v2 = vld [vmem:[%s8454_s0 + $0x6d1] sm:$0xff]  ;;  %v144_v7 = vld [vmem:[%s8454_s0 + $0x2] sm:$0xff]  ;;  %v146_v11 = vld [vmem:[%s8454_s0 + $0x3a] sm:$0xff] }
  0x19   :  { %v145_v6 = vld [vmem:[%s8454_s0 + $0xa] sm:$0xff]  ;;  %v147_v10 = vld [vmem:[%s8454_s0 + $0x42] sm:$0xff] }
  0x1a   :  { %682 = vrot.lane.b32.xlu1 %v93_v12, %s4373_s19  ;;  %680 = vrot.lane.b32.xlu0 %v92_v13, %s4373_s19 }
  0x1e   :  { %686 = vrot.lane.b32.xlu1 %v95_v14, %s4373_s19  ;;  %684 = vrot.lane.b32.xlu0 %v94_v15, %s4373_s19  ;;  %v149_v14 = vld [vmem:[%s8454_s0 + $0x7a] sm:$0xff]  ;;  %v148_v15 = vld [vmem:[%s8454_s0 + $0x72] sm:$0xff] }
  0x22   :  { %690 = vrot.lane.b32.xlu1 %v97_v16, %s4373_s19  ;;  %688 = vrot.lane.b32.xlu0 %v96_v17, %s4373_s19 }
  0x26   :  { %694 = vrot.lane.b32.xlu1 %v99_v18, %s4373_s19  ;;  %692 = vrot.lane.b32.xlu0 %v98_v19, %s4373_s19  ;;  %v151_v18 = vld [vmem:[%s8454_s0 + $0xb2] sm:$0xff]  ;;  %v150_v19 = vld [vmem:[%s8454_s0 + $0xaa] sm:$0xff] }
  0x2a   :  { %698 = vrot.lane.b32.xlu1 %v101_v20, %s4373_s19  ;;  %696 = vrot.lane.b32.xlu0 %v100_v21, %s4373_s19 }
  0x2e   :  { %702 = vrot.lane.b32.xlu1 %v103_v22, %s4373_s19  ;;  %700 = vrot.lane.b32.xlu0 %v102_v23, %s4373_s19  ;;  %v153_v22 = vld [vmem:[%s8454_s0 + $0xea] sm:$0xff]  ;;  %v152_v23 = vld [vmem:[%s8454_s0 + $0xe2] sm:$0xff] }
  0x32   :  { %706 = vrot.lane.b32.xlu1 %v105_v24, %s4373_s19  ;;  %704 = vrot.lane.b32.xlu0 %v104_v25, %s4373_s19 }
  0x36   :  { %710 = vrot.lane.b32.xlu1 %v107_v26, %s4373_s19  ;;  %708 = vrot.lane.b32.xlu0 %v106_v27, %s4373_s19  ;;  %v155_v26 = vld [vmem:[%s8454_s0 + $0x122] sm:$0xff]  ;;  %v154_v27 = vld [vmem:[%s8454_s0 + $0x11a] sm:$0xff] }
  0x3a   :  { %714 = vrot.lane.b32.xlu1 %v109_v28, %s4373_s19  ;;  %712 = vrot.lane.b32.xlu0 %v108_v29, %s4373_s19 }
  0x3e   :  { %718 = vrot.lane.b32.xlu1 %v111_v30, %s4373_s19  ;;  %716 = vrot.lane.b32.xlu0 %v110_v31, %s4373_s19  ;;  %v157_v30 = vld [vmem:[%s8454_s0 + $0x15a] sm:$0xff]  ;;  %v156_v31 = vld [vmem:[%s8454_s0 + $0x152] sm:$0xff] }
  0x42   :  { %722 = vrot.lane.b32.xlu1 %v113_v32, %s4373_s19  ;;  %720 = vrot.lane.b32.xlu0 %v112_v33, %s4373_s19 }
  0x46   :  { %726 = vrot.lane.b32.xlu1 %v115_v34, %s4373_s19  ;;  %724 = vrot.lane.b32.xlu0 %v114_v35, %s4373_s19  ;;  %v159_v34 = vld [vmem:[%s8454_s0 + $0x192] sm:$0xff]  ;;  %v158_v35 = vld [vmem:[%s8454_s0 + $0x18a] sm:$0xff] }
  0x4a   :  { %730 = vrot.lane.b32.xlu1 %v117_v36, %s4373_s19  ;;  %728 = vrot.lane.b32.xlu0 %v116_v37, %s4373_s19 }
  0x4e   :  { %734 = vrot.lane.b32.xlu1 %v119_v38, %s4373_s19  ;;  %732 = vrot.lane.b32.xlu0 %v118_v39, %s4373_s19  ;;  %v161_v38 = vld [vmem:[%s8454_s0 + $0x1ca] sm:$0xff]  ;;  %v160_v39 = vld [vmem:[%s8454_s0 + $0x1c2] sm:$0xff] }
  0x52   :  { %738 = vrot.lane.b32.xlu1 %v121_v40, %s4373_s19  ;;  %736 = vrot.lane.b32.xlu0 %v120_v41, %s4373_s19 }
  0x56   :  { %742 = vrot.lane.b32.xlu1 %v123_v42, %s4373_s19  ;;  %740 = vrot.lane.b32.xlu0 %v122_v43, %s4373_s19  ;;  %v163_v42 = vld [vmem:[%s8454_s0 + $0x202] sm:$0xff]  ;;  %v162_v43 = vld [vmem:[%s8454_s0 + $0x1fa] sm:$0xff] }
  0x5a   :  { %746 = vrot.lane.b32.xlu1 %v125_v44, %s4373_s19  ;;  %744 = vrot.lane.b32.xlu0 %v124_v45, %s4373_s19 }
  0x5e   :  { %750 = vrot.lane.b32.xlu1 %v127_v46, %s4373_s19  ;;  %748 = vrot.lane.b32.xlu0 %v126_v47, %s4373_s19  ;;  %v165_v46 = vld [vmem:[%s8454_s0 + $0x23a] sm:$0xff]  ;;  %v164_v47 = vld [vmem:[%s8454_s0 + $0x232] sm:$0xff] }
  0x62   :  { %754 = vrot.lane.b32.xlu1 %v129_v48, %s4373_s19  ;;  %752 = vrot.lane.b32.xlu0 %v128_v49, %s4373_s19 }
  0x66   :  { %758 = vrot.lane.b32.xlu1 %v131_v50, %s4373_s19  ;;  %756 = vrot.lane.b32.xlu0 %v130_v51, %s4373_s19  ;;  %v167_v50 = vld [vmem:[%s8454_s0 + $0x272] sm:$0xff]  ;;  %v166_v51 = vld [vmem:[%s8454_s0 + $0x26a] sm:$0xff] }
  0x6a   :  { %762 = vrot.lane.b32.xlu1 %v133_v52, %s4373_s19  ;;  %760 = vrot.lane.b32.xlu0 %v132_v53, %s4373_s19 }
  0x6e   :  { %766 = vrot.lane.b32.xlu1 %v135_v54, %s4373_s19  ;;  %764 = vrot.lane.b32.xlu0 %v134_v55, %s4373_s19  ;;  %v169_v54 = vld [vmem:[%s8454_s0 + $0x2aa] sm:$0xff]  ;;  %v168_v55 = vld [vmem:[%s8454_s0 + $0x2a2] sm:$0xff] }
  0x72   :  { %770 = vrot.lane.b32.xlu1 %v137_v56, %s4373_s19  ;;  %768 = vrot.lane.b32.xlu0 %v136_v57, %s4373_s19 }
  0x74   :  { %v4644_v60 = vpop.permute.xlu1 %660  ;;  %v4646_v61 = vpop.permute.xlu0 %656 }
  0x76   :  { %774 = vrot.lane.b32.xlu1 %v139_v58, %s4373_s19  ;;  %772 = vrot.lane.b32.xlu0 %v138_v59, %s4373_s19  ;;  %v171_v58 = vld [vmem:[%s8454_s0 + $0x2e2] sm:$0xff]  ;;  %v170_v59 = vld [vmem:[%s8454_s0 + $0x2da] sm:$0xff] }
  0x78   :  { %v4656_v0 = vpop.permute.xlu1 %662  ;;  %v4658_v1 = vpop.permute.xlu0 %658 }
  0x7a   :  { %778 = vrot.lane.b32.xlu1 %v141_v62, %s4373_s19  ;;  %776 = vrot.lane.b32.xlu0 %v140_v63, %s4373_s19 }
  0x7c   :  { %v4668_v4 = vpop.permute.xlu1 %666  ;;  %v4670_v5 = vpop.permute.xlu0 %664 }
  0x7e   :  { %782 = vrot.lane.b32.xlu1 %v143_v2, %s4373_s19  ;;  %780 = vrot.lane.b32.xlu0 %v142_v3, %s4373_s19  ;;  %v173_v2 = vld [vmem:[%s8454_s0 + $0x31a] sm:$0xff]  ;;  %v172_v3 = vld [vmem:[%s8454_s0 + $0x312] sm:$0xff] }
  0x80   :  { %v4680_v8 = vpop.permute.xlu1 %670  ;;  %v4682_v9 = vpop.permute.xlu0 %668 }
  0x82   :  { %914 = vrot.lane.b32.xlu1 %v145_v6, %s4374_s23  ;;  %912 = vrot.lane.b32.xlu0 %v144_v7, %s4374_s23 }
  0x84   :  { %v4692_v12 = vpop.permute.xlu1 %674  ;;  %v4694_v13 = vpop.permute.xlu0 %672 }
  0x86   :  { %918 = vrot.lane.b32.xlu1 %v147_v10, %s4374_s23  ;;  %916 = vrot.lane.b32.xlu0 %v146_v11, %s4374_s23  ;;  %v175_v10 = vld [vmem:[%s8454_s0 + $0x352] sm:$0xff]  ;;  %v174_v11 = vld [vmem:[%s8454_s0 + $0x34a] sm:$0xff] }
  0x88   :  { %v4704_v16 = vpop.permute.xlu1 %678  ;;  %v4706_v17 = vpop.permute.xlu0 %676 }
  0x8a   :  { %922 = vrot.lane.b32.xlu1 %v149_v14, %s4374_s23  ;;  %920 = vrot.lane.b32.xlu0 %v148_v15, %s4374_s23 }
  0x8c   :  { %v4716_v20 = vpop.permute.xlu1 %682  ;;  %v4718_v21 = vpop.permute.xlu0 %680 }
  0x8d   :  { %8459 = vst [vmem:[#allocation2_spill] sm:$0xff] %v4716_v20  ;;  %8460 = vst [vmem:[#allocation3_spill] sm:$0xff] %v4718_v21 }
  0x8e   :  { %926 = vrot.lane.b32.xlu1 %v151_v18, %s4374_s23  ;;  %924 = vrot.lane.b32.xlu0 %v150_v19, %s4374_s23  ;;  %v177_v18 = vld [vmem:[%s8454_s0 + $0x38a] sm:$0xff]  ;;  %v176_v19 = vld [vmem:[%s8454_s0 + $0x382] sm:$0xff] }
  0x90   :  { %v4728_v24 = vpop.permute.xlu1 %686  ;;  %v4730_v25 = vpop.permute.xlu0 %684 }
  0x91   :  { %8461 = vst [vmem:[#allocation4_spill] sm:$0xff] %v4728_v24  ;;  %8462 = vst [vmem:[#allocation5_spill] sm:$0xff] %v4730_v25 }
  0x92   :  { %930 = vrot.lane.b32.xlu1 %v153_v22, %s4374_s23  ;;  %928 = vrot.lane.b32.xlu0 %v152_v23, %s4374_s23 }
  0x94   :  { %v4740_v28 = vpop.permute.xlu1 %690  ;;  %v4742_v29 = vpop.permute.xlu0 %688 }
  0x95   :  { %8463 = vst [vmem:[#allocation6_spill] sm:$0xff] %v4740_v28  ;;  %8464 = vst [vmem:[#allocation7_spill] sm:$0xff] %v4742_v29 }
  0x96   :  { %934 = vrot.lane.b32.xlu1 %v155_v26, %s4374_s23  ;;  %932 = vrot.lane.b32.xlu0 %v154_v27, %s4374_s23  ;;  %v179_v26 = vld [vmem:[%s8454_s0 + $0x3c2] sm:$0xff]  ;;  %v178_v27 = vld [vmem:[%s8454_s0 + $0x3ba] sm:$0xff] }
  0x98   :  { %v4752_v32 = vpop.permute.xlu1 %694  ;;  %v4754_v33 = vpop.permute.xlu0 %692 }
  0x99   :  { %8465 = vst [vmem:[#allocation8_spill] sm:$0xff] %v4752_v32  ;;  %8466 = vst [vmem:[#allocation9_spill] sm:$0xff] %v4754_v33 }
  0x9a   :  { %938 = vrot.lane.b32.xlu1 %v157_v30, %s4374_s23  ;;  %936 = vrot.lane.b32.xlu0 %v156_v31, %s4374_s23 }
  0x9c   :  { %v4764_v36 = vpop.permute.xlu1 %698  ;;  %v4766_v37 = vpop.permute.xlu0 %696 }
  0x9d   :  { %8467 = vst [vmem:[#allocation10_spill] sm:$0xff] %v4764_v36  ;;  %8468 = vst [vmem:[#allocation11_spill] sm:$0xff] %v4766_v37 }
  0x9e   :  { %942 = vrot.lane.b32.xlu1 %v159_v34, %s4374_s23  ;;  %940 = vrot.lane.b32.xlu0 %v158_v35, %s4374_s23  ;;  %v181_v34 = vld [vmem:[%s8454_s0 + $0x3fa] sm:$0xff]  ;;  %v180_v35 = vld [vmem:[%s8454_s0 + $0x3f2] sm:$0xff] }
  0xa0   :  { %v4776_v40 = vpop.permute.xlu1 %702  ;;  %v4778_v41 = vpop.permute.xlu0 %700 }
  0xa1   :  { %8469 = vst [vmem:[#allocation12_spill] sm:$0xff] %v4776_v40  ;;  %8470 = vst [vmem:[#allocation13_spill] sm:$0xff] %v4778_v41 }
  0xa2   :  { %946 = vrot.lane.b32.xlu1 %v161_v38, %s4374_s23  ;;  %944 = vrot.lane.b32.xlu0 %v160_v39, %s4374_s23 }
  0xa4   :  { %v4788_v44 = vpop.permute.xlu1 %706  ;;  %v4790_v45 = vpop.permute.xlu0 %704 }
  0xa5   :  { %8471 = vst [vmem:[#allocation14_spill] sm:$0xff] %v4788_v44  ;;  %8472 = vst [vmem:[#allocation15_spill] sm:$0xff] %v4790_v45 }
  0xa6   :  { %950 = vrot.lane.b32.xlu1 %v163_v42, %s4374_s23  ;;  %948 = vrot.lane.b32.xlu0 %v162_v43, %s4374_s23  ;;  %v183_v42 = vld [vmem:[%s8454_s0 + $0x432] sm:$0xff]  ;;  %v182_v43 = vld [vmem:[%s8454_s0 + $0x42a] sm:$0xff] }
  0xa8   :  { %v4800_v48 = vpop.permute.xlu1 %710  ;;  %v4802_v49 = vpop.permute.xlu0 %708 }
  0xa9   :  { %8473 = vst [vmem:[#allocation16_spill] sm:$0xff] %v4800_v48  ;;  %8474 = vst [vmem:[#allocation17_spill] sm:$0xff] %v4802_v49 }
  0xaa   :  { %954 = vrot.lane.b32.xlu1 %v165_v46, %s4374_s23  ;;  %952 = vrot.lane.b32.xlu0 %v164_v47, %s4374_s23 }
  0xac   :  { %v4812_v52 = vpop.permute.xlu1 %714  ;;  %v4814_v53 = vpop.permute.xlu0 %712 }
  0xad   :  { %8475 = vst [vmem:[#allocation18_spill] sm:$0xff] %v4812_v52  ;;  %8476 = vst [vmem:[#allocation19_spill] sm:$0xff] %v4814_v53 }
  0xae   :  { %958 = vrot.lane.b32.xlu1 %v167_v50, %s4374_s23  ;;  %956 = vrot.lane.b32.xlu0 %v166_v51, %s4374_s23  ;;  %v185_v50 = vld [vmem:[%s8454_s0 + $0x46a] sm:$0xff]  ;;  %v184_v51 = vld [vmem:[%s8454_s0 + $0x462] sm:$0xff] }
  0xb0   :  { %v4824_v56 = vpop.permute.xlu1 %718  ;;  %v4826_v57 = vpop.permute.xlu0 %716 }
  0xb1   :  { %8477 = vst [vmem:[#allocation20_spill] sm:$0xff] %v4824_v56  ;;  %8478 = vst [vmem:[#allocation21_spill] sm:$0xff] %v4826_v57 }
  0xb2   :  { %962 = vrot.lane.b32.xlu1 %v169_v54, %s4374_s23  ;;  %960 = vrot.lane.b32.xlu0 %v168_v55, %s4374_s23 }
  0xb4   :  { %v4836_v62 = vpop.permute.xlu1 %722  ;;  %v4838_v63 = vpop.permute.xlu0 %720 }
  0xb5   :  { %8479 = vst [vmem:[#allocation22_spill] sm:$0xff] %v4836_v62  ;;  %8480 = vst [vmem:[#allocation23_spill] sm:$0xff] %v4838_v63 }
  0xb6   :  { %966 = vrot.lane.b32.xlu1 %v171_v58, %s4374_s23  ;;  %964 = vrot.lane.b32.xlu0 %v170_v59, %s4374_s23  ;;  %v187_v58 = vld [vmem:[%s8454_s0 + $0x4a2] sm:$0xff]  ;;  %v186_v59 = vld [vmem:[%s8454_s0 + $0x49a] sm:$0xff] }
  0xb8   :  { %v4848_v6 = vpop.permute.xlu1 %726  ;;  %v4850_v7 = vpop.permute.xlu0 %724 }
  0xb9   :  { %8481 = vst [vmem:[#allocation24_spill] sm:$0xff] %v4848_v6  ;;  %8482 = vst [vmem:[#allocation25_spill] sm:$0xff] %v4850_v7 }
  0xba   :  { %970 = vrot.lane.b32.xlu1 %v173_v2, %s4374_s23  ;;  %968 = vrot.lane.b32.xlu0 %v172_v3, %s4374_s23 }
  0xbc   :  { %v4860_v14 = vpop.permute.xlu1 %730  ;;  %v4862_v15 = vpop.permute.xlu0 %728 }
  0xbd   :  { %8483 = vst [vmem:[#allocation26_spill] sm:$0xff] %v4860_v14  ;;  %8484 = vst [vmem:[#allocation27_spill] sm:$0xff] %v4862_v15 }
  0xbe   :  { %974 = vrot.lane.b32.xlu1 %v175_v10, %s4374_s23  ;;  %972 = vrot.lane.b32.xlu0 %v174_v11, %s4374_s23  ;;  %v189_v10 = vld [vmem:[%s8454_s0 + $0x4da] sm:$0xff]  ;;  %v188_v11 = vld [vmem:[%s8454_s0 + $0x4d2] sm:$0xff] }
  0xc0   :  { %v4872_v22 = vpop.permute.xlu1 %734  ;;  %v4874_v23 = vpop.permute.xlu0 %732 }
  0xc1   :  { %8485 = vst [vmem:[#allocation28_spill] sm:$0xff] %v4872_v22  ;;  %8486 = vst [vmem:[#allocation29_spill] sm:$0xff] %v4874_v23 }
  0xc2   :  { %978 = vrot.lane.b32.xlu1 %v177_v18, %s4374_s23  ;;  %976 = vrot.lane.b32.xlu0 %v176_v19, %s4374_s23 }
  0xc4   :  { %v4884_v30 = vpop.permute.xlu1 %738  ;;  %v4886_v31 = vpop.permute.xlu0 %736 }
  0xc5   :  { %8487 = vst [vmem:[#allocation30_spill] sm:$0xff] %v4884_v30  ;;  %8488 = vst [vmem:[#allocation31_spill] sm:$0xff] %v4886_v31 }
  0xc6   :  { %982 = vrot.lane.b32.xlu1 %v179_v26, %s4374_s23  ;;  %980 = vrot.lane.b32.xlu0 %v178_v27, %s4374_s23  ;;  %v191_v26 = vld [vmem:[%s8454_s0 + $0x512] sm:$0xff]  ;;  %v190_v27 = vld [vmem:[%s8454_s0 + $0x50a] sm:$0xff] }
  0xc8   :  { %v4896_v38 = vpop.permute.xlu1 %742  ;;  %v4898_v39 = vpop.permute.xlu0 %740 }
  0xc9   :  { %8489 = vst [vmem:[#allocation32_spill] sm:$0xff] %v4896_v38  ;;  %8490 = vst [vmem:[#allocation33_spill] sm:$0xff] %v4898_v39 }
  0xca   :  { %986 = vrot.lane.b32.xlu1 %v181_v34, %s4374_s23  ;;  %984 = vrot.lane.b32.xlu0 %v180_v35, %s4374_s23 }
  0xcc   :  { %v4908_v46 = vpop.permute.xlu1 %746  ;;  %v4910_v47 = vpop.permute.xlu0 %744 }
  0xcd   :  { %8491 = vst [vmem:[#allocation34_spill] sm:$0xff] %v4908_v46  ;;  %8492 = vst [vmem:[#allocation35_spill] sm:$0xff] %v4910_v47 }
  0xce   :  { %990 = vrot.lane.b32.xlu1 %v183_v42, %s4374_s23  ;;  %988 = vrot.lane.b32.xlu0 %v182_v43, %s4374_s23  ;;  %v193_v42 = vld [vmem:[%s8454_s0 + $0x54a] sm:$0xff]  ;;  %v192_v43 = vld [vmem:[%s8454_s0 + $0x542] sm:$0xff] }
  0xd0   :  { %v4920_v54 = vpop.permute.xlu1 %750  ;;  %v4922_v55 = vpop.permute.xlu0 %748 }
  0xd1   :  { %8493 = vst [vmem:[#allocation36_spill] sm:$0xff] %v4920_v54  ;;  %8494 = vst [vmem:[#allocation37_spill] sm:$0xff] %v4922_v55 }
  0xd2   :  { %994 = vrot.lane.b32.xlu1 %v185_v50, %s4374_s23  ;;  %992 = vrot.lane.b32.xlu0 %v184_v51, %s4374_s23 }
  0xd4   :  { %v4932_v2 = vpop.permute.xlu1 %754  ;;  %v4934_v3 = vpop.permute.xlu0 %752 }
  0xd5   :  { %8495 = vst [vmem:[#allocation38_spill] sm:$0xff] %v4932_v2  ;;  %8496 = vst [vmem:[#allocation39_spill] sm:$0xff] %v4934_v3 }
  0xd6   :  { %998 = vrot.lane.b32.xlu1 %v187_v58, %s4374_s23  ;;  %996 = vrot.lane.b32.xlu0 %v186_v59, %s4374_s23  ;;  %v195_v58 = vld [vmem:[%s8454_s0 + $0x582] sm:$0xff]  ;;  %v194_v59 = vld [vmem:[%s8454_s0 + $0x57a] sm:$0xff] }
  0xd8   :  { %v4944_v18 = vpop.permute.xlu1 %758  ;;  %v4946_v19 = vpop.permute.xlu0 %756 }
  0xd9   :  { %8497 = vst [vmem:[#allocation40_spill] sm:$0xff] %v4944_v18  ;;  %8498 = vst [vmem:[#allocation41_spill] sm:$0xff] %v4946_v19 }
  0xda   :  { %1002 = vrot.lane.b32.xlu1 %v189_v10, %s4374_s23  ;;  %1000 = vrot.lane.b32.xlu0 %v188_v11, %s4374_s23 }
  0xdc   :  { %v4956_v34 = vpop.permute.xlu1 %762  ;;  %v4958_v35 = vpop.permute.xlu0 %760 }
  0xdd   :  { %8499 = vst [vmem:[#allocation42_spill] sm:$0xff] %v4956_v34  ;;  %8500 = vst [vmem:[#allocation43_spill] sm:$0xff] %v4958_v35 }
  0xde   :  { %1006 = vrot.lane.b32.xlu1 %v191_v26, %s4374_s23  ;;  %1004 = vrot.lane.b32.xlu0 %v190_v27, %s4374_s23  ;;  %v197_v26 = vld [vmem:[%s8454_s0 + $0x5ba] sm:$0xff]  ;;  %v196_v27 = vld [vmem:[%s8454_s0 + $0x5b2] sm:$0xff] }
  0xe0   :  { %v4968_v50 = vpop.permute.xlu1 %766  ;;  %v4970_v51 = vpop.permute.xlu0 %764 }
  0xe1   :  { %8501 = vst [vmem:[#allocation44_spill] sm:$0xff] %v4968_v50  ;;  %8502 = vst [vmem:[#allocation45_spill] sm:$0xff] %v4970_v51 }
  0xe2   :  { %1010 = vrot.lane.b32.xlu1 %v193_v42, %s4374_s23  ;;  %1008 = vrot.lane.b32.xlu0 %v192_v43, %s4374_s23 }
  0xe4   :  { %v4980_v10 = vpop.permute.xlu1 %770  ;;  %v4982_v11 = vpop.permute.xlu0 %768 }
  0xe5   :  { %8503 = vst [vmem:[#allocation46_spill] sm:$0xff] %v4980_v10  ;;  %8504 = vst [vmem:[#allocation47_spill] sm:$0xff] %v4982_v11 }
  0xe6   :  { %1014 = vrot.lane.b32.xlu1 %v195_v58, %s4374_s23  ;;  %1012 = vrot.lane.b32.xlu0 %v194_v59, %s4374_s23  ;;  %v199_v58 = vld [vmem:[%s8454_s0 + $0x5f2] sm:$0xff]  ;;  %v198_v59 = vld [vmem:[%s8454_s0 + $0x5ea] sm:$0xff] }
  0xe8   :  { %v4992_v42 = vpop.permute.xlu1 %774  ;;  %v4994_v43 = vpop.permute.xlu0 %772 }
  0xe9   :  { %8505 = vst [vmem:[#allocation48_spill] sm:$0xff] %v4992_v42  ;;  %8506 = vst [vmem:[#allocation49_spill] sm:$0xff] %v4994_v43 }
  0xea   :  { %1018 = vrot.lane.b32.xlu1 %v197_v26, %s4374_s23  ;;  %1016 = vrot.lane.b32.xlu0 %v196_v27, %s4374_s23  ;;  %v201_v26 = vld [vmem:[%s8454_s0 + $0x62a] sm:$0xff]  ;;  %v200_v27 = vld [vmem:[%s8454_s0 + $0x622] sm:$0xff] }
  0xec   :  { %v5004_v10 = vpop.permute.xlu1 %778  ;;  %v5006_v11 = vpop.permute.xlu0 %776 }
  0xed   :  { %8507 = vst [vmem:[#allocation50_spill] sm:$0xff] %v5004_v10  ;;  %8508 = vst [vmem:[#allocation51_spill] sm:$0xff] %v5006_v11 }
  0xee   :  { %1022 = vrot.lane.b32.xlu1 %v199_v58, %s4374_s23  ;;  %1020 = vrot.lane.b32.xlu0 %v198_v59, %s4374_s23  ;;  %v203_v58 = vld [vmem:[%s8454_s0 + $0x662] sm:$0xff]  ;;  %v202_v59 = vld [vmem:[%s8454_s0 + $0x65a] sm:$0xff] }
  0xf0   :  { %v5016_v42 = vpop.permute.xlu1 %782  ;;  %v5018_v43 = vpop.permute.xlu0 %780 }
  0xf1   :  { %8509 = vst [vmem:[#allocation52_spill] sm:$0xff] %v5016_v42  ;;  %8510 = vst [vmem:[#allocation53_spill] sm:$0xff] %v5018_v43 }
  0xf2   :  { %1026 = vrot.lane.b32.xlu1 %v201_v26, %s4374_s23  ;;  %1024 = vrot.lane.b32.xlu0 %v200_v27, %s4374_s23  ;;  %v205_v26 = vld [vmem:[%s8454_s0 + $0x69a] sm:$0xff]  ;;  %v204_v27 = vld [vmem:[%s8454_s0 + $0x692] sm:$0xff] }
  0xf4   :  { %v5028_v10 = vpop.permute.xlu1 %914  ;;  %v5030_v11 = vpop.permute.xlu0 %912 }
  0xf6   :  { %1030 = vrot.lane.b32.xlu1 %v203_v58, %s4374_s23  ;;  %1028 = vrot.lane.b32.xlu0 %v202_v59, %s4374_s23  ;;  %v207_v58 = vld [vmem:[%s8454_s0 + $0x6d2] sm:$0xff]  ;;  %v206_v59 = vld [vmem:[%s8454_s0 + $0x6ca] sm:$0xff] }
  0xf8   :  { %v5040_v43 = vpop.permute.xlu1 %918  ;;  %v5042_v42 = vpop.permute.xlu0 %916 }
  0xfa   :  { %1034 = vrot.lane.b32.xlu1 %v205_v26, %s4374_s23  ;;  %1032 = vrot.lane.b32.xlu0 %v204_v27, %s4374_s23  ;;  %v209_v26 = vld [vmem:[%s8454_s0 + $0x1a] sm:$0xff]  ;;  %v208_v27 = vld [vmem:[%s8454_s0 + $0x12] sm:$0xff] }
  0xfc   :  { %v5052_v50 = vpop.permute.xlu1 %922  ;;  %v5054_v51 = vpop.permute.xlu0 %920 }
  0xfe   :  { %1038 = vrot.lane.b32.xlu1 %v207_v58, %s4374_s23  ;;  %1036 = vrot.lane.b32.xlu0 %v206_v59, %s4374_s23  ;;  %v211_v58 = vld [vmem:[%s8454_s0 + $0x52] sm:$0xff]  ;;  %v210_v59 = vld [vmem:[%s8454_s0 + $0x4a] sm:$0xff] }
 0x100   :  { %v5064_v34 = vpop.permute.xlu1 %926  ;;  %v5066_v35 = vpop.permute.xlu0 %924 }
 0x102   :  { %1170 = vrot.lane.b32.xlu1 %v209_v26, %s4375_s26  ;;  %1168 = vrot.lane.b32.xlu0 %v208_v27, %s4375_s26  ;;  %v213_v26 = vld [vmem:[%s8454_s0 + $0x8a] sm:$0xff]  ;;  %v212_v27 = vld [vmem:[%s8454_s0 + $0x82] sm:$0xff] }
 0x104   :  { %v5076_v18 = vpop.permute.xlu1 %930  ;;  %v5078_v19 = vpop.permute.xlu0 %928 }
 0x106   :  { %1174 = vrot.lane.b32.xlu1 %v211_v58, %s4375_s26  ;;  %1172 = vrot.lane.b32.xlu0 %v210_v59, %s4375_s26  ;;  %v215_v58 = vld [vmem:[%s8454_s0 + $0xc2] sm:$0xff]  ;;  %v214_v59 = vld [vmem:[%s8454_s0 + $0xba] sm:$0xff] }
 0x108   :  { %v5088_v2 = vpop.permute.xlu1 %934  ;;  %v5090_v3 = vpop.permute.xlu0 %932 }
 0x109   :  { %8511 = vst [vmem:[#allocation54_spill] sm:$0xff] %v5088_v2 }
 0x10a   :  { %1178 = vrot.lane.b32.xlu1 %v213_v26, %s4375_s26  ;;  %1176 = vrot.lane.b32.xlu0 %v212_v27, %s4375_s26  ;;  %v217_v26 = vld [vmem:[%s8454_s0 + $0xfa] sm:$0xff]  ;;  %v216_v27 = vld [vmem:[%s8454_s0 + $0xf2] sm:$0xff] }
 0x10c   :  { %v5100_v54 = vpop.permute.xlu1 %938  ;;  %v5102_v55 = vpop.permute.xlu0 %936 }
 0x10d   :  { %8512 = vst [vmem:[#allocation55_spill] sm:$0xff] %v5100_v54  ;;  %8513 = vst [vmem:[#allocation56_spill] sm:$0xff] %v5102_v55 }
 0x10e   :  { %1182 = vrot.lane.b32.xlu1 %v215_v58, %s4375_s26  ;;  %1180 = vrot.lane.b32.xlu0 %v214_v59, %s4375_s26  ;;  %v219_v58 = vld [vmem:[%s8454_s0 + $0x132] sm:$0xff]  ;;  %v218_v59 = vld [vmem:[%s8454_s0 + $0x12a] sm:$0xff] }
 0x110   :  { %v5112_v46 = vpop.permute.xlu1 %942  ;;  %v5114_v47 = vpop.permute.xlu0 %940 }
 0x111   :  { %8514 = vst [vmem:[#allocation57_spill] sm:$0xff] %v5112_v46  ;;  %8515 = vst [vmem:[#allocation58_spill] sm:$0xff] %v5114_v47 }
 0x112   :  { %1186 = vrot.lane.b32.xlu1 %v217_v26, %s4375_s26  ;;  %1184 = vrot.lane.b32.xlu0 %v216_v27, %s4375_s26  ;;  %v221_v26 = vld [vmem:[%s8454_s0 + $0x16a] sm:$0xff]  ;;  %v220_v27 = vld [vmem:[%s8454_s0 + $0x162] sm:$0xff] }
 0x114   :  { %v5124_v38 = vpop.permute.xlu1 %946  ;;  %v5126_v39 = vpop.permute.xlu0 %944 }
 0x115   :  { %8516 = vst [vmem:[#allocation59_spill] sm:$0xff] %v5124_v38  ;;  %8517 = vst [vmem:[#allocation60_spill] sm:$0xff] %v5126_v39 }
 0x116   :  { %1190 = vrot.lane.b32.xlu1 %v219_v58, %s4375_s26  ;;  %1188 = vrot.lane.b32.xlu0 %v218_v59, %s4375_s26  ;;  %v223_v58 = vld [vmem:[%s8454_s0 + $0x1a2] sm:$0xff]  ;;  %v222_v59 = vld [vmem:[%s8454_s0 + $0x19a] sm:$0xff] }
 0x118   :  { %v5136_v30 = vpop.permute.xlu1 %950  ;;  %v5138_v31 = vpop.permute.xlu0 %948 }
 0x119   :  { %8518 = vst [vmem:[#allocation61_spill] sm:$0xff] %v5136_v30  ;;  %8519 = vst [vmem:[#allocation62_spill] sm:$0xff] %v5138_v31 }
 0x11a   :  { %1194 = vrot.lane.b32.xlu1 %v221_v26, %s4375_s26  ;;  %1192 = vrot.lane.b32.xlu0 %v220_v27, %s4375_s26  ;;  %v225_v26 = vld [vmem:[%s8454_s0 + $0x1da] sm:$0xff]  ;;  %v224_v27 = vld [vmem:[%s8454_s0 + $0x1d2] sm:$0xff] }
 0x11c   :  { %v5148_v22 = vpop.permute.xlu1 %954  ;;  %v5150_v23 = vpop.permute.xlu0 %952 }
 0x11d   :  { %8520 = vst [vmem:[#allocation63_spill] sm:$0xff] %v5148_v22  ;;  %8521 = vst [vmem:[#allocation64_spill] sm:$0xff] %v5150_v23 }
 0x11e   :  { %1198 = vrot.lane.b32.xlu1 %v223_v58, %s4375_s26  ;;  %1196 = vrot.lane.b32.xlu0 %v222_v59, %s4375_s26  ;;  %v227_v58 = vld [vmem:[%s8454_s0 + $0x212] sm:$0xff]  ;;  %v226_v59 = vld [vmem:[%s8454_s0 + $0x20a] sm:$0xff] }
 0x120   :  { %v5160_v14 = vpop.permute.xlu1 %958  ;;  %v5162_v15 = vpop.permute.xlu0 %956 }
 0x121   :  { %8522 = vst [vmem:[#allocation65_spill] sm:$0xff] %v5160_v14  ;;  %8523 = vst [vmem:[#allocation66_spill] sm:$0xff] %v5162_v15 }
 0x122   :  { %1202 = vrot.lane.b32.xlu1 %v225_v26, %s4375_s26  ;;  %1200 = vrot.lane.b32.xlu0 %v224_v27, %s4375_s26  ;;  %v229_v26 = vld [vmem:[%s8454_s0 + $0x24a] sm:$0xff]  ;;  %v228_v27 = vld [vmem:[%s8454_s0 + $0x242] sm:$0xff] }
 0x124   :  { %v5172_v6 = vpop.permute.xlu1 %962  ;;  %v5174_v7 = vpop.permute.xlu0 %960 }
 0x125   :  { %8524 = vst [vmem:[#allocation67_spill] sm:$0xff] %v5172_v6  ;;  %8525 = vst [vmem:[#allocation68_spill] sm:$0xff] %v5174_v7 }
 0x126   :  { %1206 = vrot.lane.b32.xlu1 %v227_v58, %s4375_s26  ;;  %1204 = vrot.lane.b32.xlu0 %v226_v59, %s4375_s26  ;;  %v231_v58 = vld [vmem:[%s8454_s0 + $0x282] sm:$0xff]  ;;  %v230_v59 = vld [vmem:[%s8454_s0 + $0x27a] sm:$0xff] }
 0x128   :  { %v5184_v62 = vpop.permute.xlu1 %966  ;;  %v5186_v63 = vpop.permute.xlu0 %964 }
 0x129   :  { %8526 = vst [vmem:[#allocation69_spill] sm:$0xff] %v5184_v62  ;;  %8527 = vst [vmem:[#allocation70_spill] sm:$0xff] %v5186_v63 }
 0x12a   :  { %1210 = vrot.lane.b32.xlu1 %v229_v26, %s4375_s26  ;;  %1208 = vrot.lane.b32.xlu0 %v228_v27, %s4375_s26  ;;  %v233_v26 = vld [vmem:[%s8454_s0 + $0x2ba] sm:$0xff]  ;;  %v232_v27 = vld [vmem:[%s8454_s0 + $0x2b2] sm:$0xff] }
 0x12c   :  { %v5196_v56 = vpop.permute.xlu1 %970  ;;  %v5198_v57 = vpop.permute.xlu0 %968 }
 0x12d   :  { %8528 = vst [vmem:[#allocation71_spill] sm:$0xff] %v5196_v56  ;;  %8529 = vst [vmem:[#allocation72_spill] sm:$0xff] %v5198_v57 }
 0x12e   :  { %1214 = vrot.lane.b32.xlu1 %v231_v58, %s4375_s26  ;;  %1212 = vrot.lane.b32.xlu0 %v230_v59, %s4375_s26  ;;  %v235_v58 = vld [vmem:[%s8454_s0 + $0x2f2] sm:$0xff]  ;;  %v234_v59 = vld [vmem:[%s8454_s0 + $0x2ea] sm:$0xff] }
 0x130   :  { %v5208_v52 = vpop.permute.xlu1 %974  ;;  %v5210_v53 = vpop.permute.xlu0 %972 }
 0x131   :  { %8530 = vst [vmem:[#allocation73_spill] sm:$0xff] %v5208_v52  ;;  %8531 = vst [vmem:[#allocation74_spill] sm:$0xff] %v5210_v53 }
 0x132   :  { %1218 = vrot.lane.b32.xlu1 %v233_v26, %s4375_s26  ;;  %1216 = vrot.lane.b32.xlu0 %v232_v27, %s4375_s26  ;;  %v237_v26 = vld [vmem:[%s8454_s0 + $0x32a] sm:$0xff]  ;;  %v236_v27 = vld [vmem:[%s8454_s0 + $0x322] sm:$0xff] }
 0x134   :  { %v5220_v56 = vpop.permute.xlu1 %978  ;;  %v5222_v57 = vpop.permute.xlu0 %976 }
 0x135   :  { %8532 = vst [vmem:[#allocation75_spill] sm:$0xff] %v5220_v56  ;;  %8533 = vst [vmem:[#allocation76_spill] sm:$0xff] %v5222_v57 }
 0x136   :  { %1222 = vrot.lane.b32.xlu1 %v235_v58, %s4375_s26  ;;  %1220 = vrot.lane.b32.xlu0 %v234_v59, %s4375_s26  ;;  %v239_v58 = vld [vmem:[%s8454_s0 + $0x362] sm:$0xff]  ;;  %v238_v59 = vld [vmem:[%s8454_s0 + $0x35a] sm:$0xff] }
 0x138   :  { %v5232_v52 = vpop.permute.xlu1 %982  ;;  %v5234_v53 = vpop.permute.xlu0 %980 }
 0x139   :  { %8534 = vst [vmem:[#allocation77_spill] sm:$0xff] %v5232_v52  ;;  %8535 = vst [vmem:[#allocation78_spill] sm:$0xff] %v5234_v53 }
 0x13a   :  { %1226 = vrot.lane.b32.xlu1 %v237_v26, %s4375_s26  ;;  %1224 = vrot.lane.b32.xlu0 %v236_v27, %s4375_s26  ;;  %v241_v26 = vld [vmem:[%s8454_s0 + $0x39a] sm:$0xff]  ;;  %v240_v27 = vld [vmem:[%s8454_s0 + $0x392] sm:$0xff] }
 0x13c   :  { %v5244_v56 = vpop.permute.xlu1 %986  ;;  %v5246_v57 = vpop.permute.xlu0 %984 }
 0x13d   :  { %8536 = vst [vmem:[#allocation79_spill] sm:$0xff] %v5244_v56  ;;  %8537 = vst [vmem:[#allocation80_spill] sm:$0xff] %v5246_v57 }
 0x13e   :  { %1230 = vrot.lane.b32.xlu1 %v239_v58, %s4375_s26  ;;  %1228 = vrot.lane.b32.xlu0 %v238_v59, %s4375_s26  ;;  %v243_v58 = vld [vmem:[%s8454_s0 + $0x3d2] sm:$0xff]  ;;  %v242_v59 = vld [vmem:[%s8454_s0 + $0x3ca] sm:$0xff] }
 0x140   :  { %v5256_v52 = vpop.permute.xlu1 %990  ;;  %v5258_v53 = vpop.permute.xlu0 %988 }
 0x141   :  { %8538 = vst [vmem:[#allocation81_spill] sm:$0xff] %v5256_v52  ;;  %8539 = vst [vmem:[#allocation82_spill] sm:$0xff] %v5258_v53 }
 0x142   :  { %1234 = vrot.lane.b32.xlu1 %v241_v26, %s4375_s26  ;;  %1232 = vrot.lane.b32.xlu0 %v240_v27, %s4375_s26  ;;  %v245_v26 = vld [vmem:[%s8454_s0 + $0x40a] sm:$0xff]  ;;  %v244_v27 = vld [vmem:[%s8454_s0 + $0x402] sm:$0xff] }
 0x144   :  { %v5268_v56 = vpop.permute.xlu1 %994  ;;  %v5270_v57 = vpop.permute.xlu0 %992 }
 0x145   :  { %8540 = vst [vmem:[#allocation83_spill] sm:$0xff] %v5268_v56  ;;  %8541 = vst [vmem:[#allocation84_spill] sm:$0xff] %v5270_v57 }
 0x146   :  { %1238 = vrot.lane.b32.xlu1 %v243_v58, %s4375_s26  ;;  %1236 = vrot.lane.b32.xlu0 %v242_v59, %s4375_s26  ;;  %v247_v58 = vld [vmem:[%s8454_s0 + $0x442] sm:$0xff]  ;;  %v246_v59 = vld [vmem:[%s8454_s0 + $0x43a] sm:$0xff] }
 0x148   :  { %v5280_v52 = vpop.permute.xlu1 %998  ;;  %v5282_v53 = vpop.permute.xlu0 %996 }
 0x149   :  { %8542 = vst [vmem:[#allocation85_spill] sm:$0xff] %v5280_v52  ;;  %8543 = vst [vmem:[#allocation86_spill] sm:$0xff] %v5282_v53 }
 0x14a   :  { %1242 = vrot.lane.b32.xlu1 %v245_v26, %s4375_s26  ;;  %1240 = vrot.lane.b32.xlu0 %v244_v27, %s4375_s26  ;;  %v249_v26 = vld [vmem:[%s8454_s0 + $0x47a] sm:$0xff]  ;;  %v248_v27 = vld [vmem:[%s8454_s0 + $0x472] sm:$0xff] }
 0x14c   :  { %v5292_v56 = vpop.permute.xlu1 %1002  ;;  %v5294_v57 = vpop.permute.xlu0 %1000 }
 0x14d   :  { %8544 = vst [vmem:[#allocation87_spill] sm:$0xff] %v5292_v56  ;;  %8545 = vst [vmem:[#allocation88_spill] sm:$0xff] %v5294_v57 }
 0x14e   :  { %1246 = vrot.lane.b32.xlu1 %v247_v58, %s4375_s26  ;;  %1244 = vrot.lane.b32.xlu0 %v246_v59, %s4375_s26  ;;  %v251_v58 = vld [vmem:[%s8454_s0 + $0x4b2] sm:$0xff]  ;;  %v250_v59 = vld [vmem:[%s8454_s0 + $0x4aa] sm:$0xff] }
 0x150   :  { %v5304_v52 = vpop.permute.xlu1 %1006  ;;  %v5306_v53 = vpop.permute.xlu0 %1004 }
 0x151   :  { %8546 = vst [vmem:[#allocation89_spill] sm:$0xff] %v5304_v52  ;;  %8547 = vst [vmem:[#allocation90_spill] sm:$0xff] %v5306_v53 }
 0x152   :  { %1250 = vrot.lane.b32.xlu1 %v249_v26, %s4375_s26  ;;  %1248 = vrot.lane.b32.xlu0 %v248_v27, %s4375_s26  ;;  %v253_v26 = vld [vmem:[%s8454_s0 + $0x4ea] sm:$0xff]  ;;  %v252_v27 = vld [vmem:[%s8454_s0 + $0x4e2] sm:$0xff] }
 0x154   :  { %v5316_v56 = vpop.permute.xlu1 %1010  ;;  %v5318_v57 = vpop.permute.xlu0 %1008 }
 0x155   :  { %8548 = vst [vmem:[#allocation91_spill] sm:$0xff] %v5316_v56  ;;  %8549 = vst [vmem:[#allocation92_spill] sm:$0xff] %v5318_v57 }
 0x156   :  { %1254 = vrot.lane.b32.xlu1 %v251_v58, %s4375_s26  ;;  %1252 = vrot.lane.b32.xlu0 %v250_v59, %s4375_s26  ;;  %v255_v58 = vld [vmem:[%s8454_s0 + $0x522] sm:$0xff]  ;;  %v254_v59 = vld [vmem:[%s8454_s0 + $0x51a] sm:$0xff] }
 0x158   :  { %v5328_v52 = vpop.permute.xlu1 %1014  ;;  %v5330_v53 = vpop.permute.xlu0 %1012 }
 0x159   :  { %8550 = vst [vmem:[#allocation93_spill] sm:$0xff] %v5328_v52  ;;  %8551 = vst [vmem:[#allocation94_spill] sm:$0xff] %v5330_v53 }
 0x15a   :  { %1258 = vrot.lane.b32.xlu1 %v253_v26, %s4375_s26  ;;  %1256 = vrot.lane.b32.xlu0 %v252_v27, %s4375_s26  ;;  %v257_v26 = vld [vmem:[%s8454_s0 + $0x55a] sm:$0xff]  ;;  %v256_v27 = vld [vmem:[%s8454_s0 + $0x552] sm:$0xff] }
 0x15c   :  { %v5340_v56 = vpop.permute.xlu1 %1018  ;;  %v5342_v57 = vpop.permute.xlu0 %1016 }
 0x15d   :  { %8552 = vst [vmem:[#allocation95_spill] sm:$0xff] %v5340_v56  ;;  %8553 = vst [vmem:[#allocation96_spill] sm:$0xff] %v5342_v57 }
 0x15e   :  { %1262 = vrot.lane.b32.xlu1 %v255_v58, %s4375_s26  ;;  %1260 = vrot.lane.b32.xlu0 %v254_v59, %s4375_s26  ;;  %v259_v58 = vld [vmem:[%s8454_s0 + $0x592] sm:$0xff]  ;;  %v258_v59 = vld [vmem:[%s8454_s0 + $0x58a] sm:$0xff] }
 0x160   :  { %v5352_v52 = vpop.permute.xlu1 %1022  ;;  %v5354_v53 = vpop.permute.xlu0 %1020 }
 0x161   :  { %8554 = vst [vmem:[#allocation97_spill] sm:$0xff] %v5352_v52  ;;  %8555 = vst [vmem:[#allocation98_spill] sm:$0xff] %v5354_v53 }
 0x162   :  { %1266 = vrot.lane.b32.xlu1 %v257_v26, %s4375_s26  ;;  %1264 = vrot.lane.b32.xlu0 %v256_v27, %s4375_s26  ;;  %v261_v26 = vld [vmem:[%s8454_s0 + $0x5ca] sm:$0xff]  ;;  %v260_v27 = vld [vmem:[%s8454_s0 + $0x5c2] sm:$0xff] }
 0x164   :  { %v5364_v56 = vpop.permute.xlu1 %1026  ;;  %v5366_v57 = vpop.permute.xlu0 %1024 }
 0x165   :  { %8556 = vst [vmem:[#allocation99_spill] sm:$0xff] %v5364_v56  ;;  %8557 = vst [vmem:[#allocation100_spill] sm:$0xff] %v5366_v57 }
 0x166   :  { %1270 = vrot.lane.b32.xlu1 %v259_v58, %s4375_s26  ;;  %1268 = vrot.lane.b32.xlu0 %v258_v59, %s4375_s26  ;;  %v263_v58 = vld [vmem:[%s8454_s0 + $0x602] sm:$0xff]  ;;  %v262_v59 = vld [vmem:[%s8454_s0 + $0x5fa] sm:$0xff] }
 0x168   :  { %v5376_v52 = vpop.permute.xlu1 %1030  ;;  %v5378_v53 = vpop.permute.xlu0 %1028 }
 0x169   :  { %8558 = vst [vmem:[#allocation101_spill] sm:$0xff] %v5376_v52  ;;  %8559 = vst [vmem:[#allocation102_spill] sm:$0xff] %v5378_v53 }
 0x16a   :  { %1274 = vrot.lane.b32.xlu1 %v261_v26, %s4375_s26  ;;  %1272 = vrot.lane.b32.xlu0 %v260_v27, %s4375_s26  ;;  %v265_v26 = vld [vmem:[%s8454_s0 + $0x63a] sm:$0xff]  ;;  %v264_v27 = vld [vmem:[%s8454_s0 + $0x632] sm:$0xff] }
 0x16c   :  { %v5388_v56 = vpop.permute.xlu1 %1034  ;;  %v5390_v57 = vpop.permute.xlu0 %1032 }
 0x16d   :  { %8560 = vst [vmem:[#allocation103_spill] sm:$0xff] %v5388_v56  ;;  %8561 = vst [vmem:[#allocation104_spill] sm:$0xff] %v5390_v57 }
 0x16e   :  { %1278 = vrot.lane.b32.xlu1 %v263_v58, %s4375_s26  ;;  %1276 = vrot.lane.b32.xlu0 %v262_v59, %s4375_s26  ;;  %v267_v58 = vld [vmem:[%s8454_s0 + $0x672] sm:$0xff]  ;;  %v266_v59 = vld [vmem:[%s8454_s0 + $0x66a] sm:$0xff] }
 0x170   :  { %v5400_v52 = vpop.permute.xlu1 %1038  ;;  %v5402_v53 = vpop.permute.xlu0 %1036 }
 0x171   :  { %8562 = vst [vmem:[#allocation105_spill] sm:$0xff] %v5400_v52  ;;  %8563 = vst [vmem:[#allocation106_spill] sm:$0xff] %v5402_v53 }
 0x172   :  { %1282 = vrot.lane.b32.xlu1 %v265_v26, %s4375_s26  ;;  %1280 = vrot.lane.b32.xlu0 %v264_v27, %s4375_s26  ;;  %v269_v26 = vld [vmem:[%s8454_s0 + $0x6aa] sm:$0xff]  ;;  %v268_v27 = vld [vmem:[%s8454_s0 + $0x6a2] sm:$0xff] }
 0x174   :  { %v5412_v56 = vpop.permute.xlu1 %1170  ;;  %v5414_v57 = vpop.permute.xlu0 %1168 }
 0x176   :  { %1286 = vrot.lane.b32.xlu1 %v267_v58, %s4375_s26  ;;  %1284 = vrot.lane.b32.xlu0 %v266_v59, %s4375_s26  ;;  %v271_v58 = vld [vmem:[%s8454_s0 + $0x6e2] sm:$0xff]  ;;  %v270_v59 = vld [vmem:[%s8454_s0 + $0x6da] sm:$0xff] }
 0x178   :  { %v5424_v53 = vpop.permute.xlu1 %1174  ;;  %v5426_v52 = vpop.permute.xlu0 %1172 }
 0x17a   :  { %1290 = vrot.lane.b32.xlu1 %v269_v26, %s4375_s26  ;;  %1288 = vrot.lane.b32.xlu0 %v268_v27, %s4375_s26  ;;  %v273_v26 = vld [vmem:[%s8454_s0 + $0x1b] sm:$0xff]  ;;  %v272_v27 = vld [vmem:[%s8454_s0 + $0x13] sm:$0xff] }
 0x17c   :  { %v5436_v62 = vpop.permute.xlu1 %1178  ;;  %v5438_v48 = vpop.permute.xlu0 %1176 }
 0x17e   :  { %1294 = vrot.lane.b32.xlu1 %v271_v58, %s4375_s26  ;;  %1292 = vrot.lane.b32.xlu0 %v270_v59, %s4375_s26  ;;  %v275_v58 = vld [vmem:[%s8454_s0 + $0x53] sm:$0xff]  ;;  %v274_v59 = vld [vmem:[%s8454_s0 + $0x4b] sm:$0xff]  ;;  %s4378_s26 = smov 48  }
 0x180   :  { %v5448_v63 = vpop.permute.xlu1 %1182  ;;  %v5450_v49 = vpop.permute.xlu0 %1180 }
 0x182   :  { %1426 = vrot.lane.b32.xlu1 %v273_v26, %s4376_s29  ;;  %1424 = vrot.lane.b32.xlu0 %v272_v27, %s4376_s29  ;;  %v277_v26 = vld [vmem:[%s8454_s0 + $0x8b] sm:$0xff]  ;;  %v276_v27 = vld [vmem:[%s8454_s0 + $0x83] sm:$0xff] }
 0x184   :  { %v5460_v6 = vpop.permute.xlu1 %1186  ;;  %v5462_v44 = vpop.permute.xlu0 %1184 }
 0x186   :  { %1430 = vrot.lane.b32.xlu1 %v275_v58, %s4376_s29  ;;  %1428 = vrot.lane.b32.xlu0 %v274_v59, %s4376_s29  ;;  %v279_v58 = vld [vmem:[%s8454_s0 + $0xc3] sm:$0xff]  ;;  %v278_v59 = vld [vmem:[%s8454_s0 + $0xbb] sm:$0xff] }
 0x188   :  { %v5472_v7 = vpop.permute.xlu1 %1190  ;;  %v5474_v45 = vpop.permute.xlu0 %1188 }
 0x189   :  { %8564 = vst [vmem:[#allocation107_spill] sm:$0xff] %v5472_v7 }
 0x18a   :  { %1434 = vrot.lane.b32.xlu1 %v277_v26, %s4376_s29  ;;  %1432 = vrot.lane.b32.xlu0 %v276_v27, %s4376_s29  ;;  %v281_v26 = vld [vmem:[%s8454_s0 + $0xfb] sm:$0xff]  ;;  %v280_v27 = vld [vmem:[%s8454_s0 + $0xf3] sm:$0xff] }
 0x18c   :  { %v5484_v14 = vpop.permute.xlu1 %1194  ;;  %v5486_v40 = vpop.permute.xlu0 %1192 }
 0x18d   :  { %8565 = vst [vmem:[#allocation108_spill] sm:$0xff] %v5484_v14  ;;  %8566 = vst [vmem:[#allocation109_spill] sm:$0xff] %v5486_v40 }
 0x18e   :  { %1438 = vrot.lane.b32.xlu1 %v279_v58, %s4376_s29  ;;  %1436 = vrot.lane.b32.xlu0 %v278_v59, %s4376_s29  ;;  %v283_v58 = vld [vmem:[%s8454_s0 + $0x133] sm:$0xff]  ;;  %v282_v59 = vld [vmem:[%s8454_s0 + $0x12b] sm:$0xff] }
 0x190   :  { %v5496_v15 = vpop.permute.xlu1 %1198  ;;  %v5498_v41 = vpop.permute.xlu0 %1196 }
 0x191   :  { %8567 = vst [vmem:[#allocation110_spill] sm:$0xff] %v5496_v15  ;;  %8568 = vst [vmem:[#allocation111_spill] sm:$0xff] %v5498_v41 }
 0x192   :  { %1442 = vrot.lane.b32.xlu1 %v281_v26, %s4376_s29  ;;  %1440 = vrot.lane.b32.xlu0 %v280_v27, %s4376_s29  ;;  %v285_v26 = vld [vmem:[%s8454_s0 + $0x16b] sm:$0xff]  ;;  %v284_v27 = vld [vmem:[%s8454_s0 + $0x163] sm:$0xff] }
 0x194   :  { %v5508_v22 = vpop.permute.xlu1 %1202  ;;  %v5510_v36 = vpop.permute.xlu0 %1200 }
 0x195   :  { %8569 = vst [vmem:[#allocation112_spill] sm:$0xff] %v5508_v22  ;;  %8570 = vst [vmem:[#allocation113_spill] sm:$0xff] %v5510_v36 }
 0x196   :  { %1446 = vrot.lane.b32.xlu1 %v283_v58, %s4376_s29  ;;  %1444 = vrot.lane.b32.xlu0 %v282_v59, %s4376_s29  ;;  %v287_v58 = vld [vmem:[%s8454_s0 + $0x1a3] sm:$0xff]  ;;  %v286_v59 = vld [vmem:[%s8454_s0 + $0x19b] sm:$0xff] }
 0x198   :  { %v5520_v23 = vpop.permute.xlu1 %1206  ;;  %v5522_v37 = vpop.permute.xlu0 %1204 }
 0x199   :  { %8571 = vst [vmem:[#allocation114_spill] sm:$0xff] %v5520_v23  ;;  %8572 = vst [vmem:[#allocation115_spill] sm:$0xff] %v5522_v37 }
 0x19a   :  { %1450 = vrot.lane.b32.xlu1 %v285_v26, %s4376_s29  ;;  %1448 = vrot.lane.b32.xlu0 %v284_v27, %s4376_s29  ;;  %v289_v26 = vld [vmem:[%s8454_s0 + $0x1db] sm:$0xff]  ;;  %v288_v27 = vld [vmem:[%s8454_s0 + $0x1d3] sm:$0xff] }
 0x19c   :  { %v5532_v30 = vpop.permute.xlu1 %1210  ;;  %v5534_v32 = vpop.permute.xlu0 %1208 }
 0x19d   :  { %8573 = vst [vmem:[#allocation116_spill] sm:$0xff] %v5532_v30  ;;  %8574 = vst [vmem:[#allocation117_spill] sm:$0xff] %v5534_v32 }
 0x19e   :  { %1454 = vrot.lane.b32.xlu1 %v287_v58, %s4376_s29  ;;  %1452 = vrot.lane.b32.xlu0 %v286_v59, %s4376_s29  ;;  %v291_v58 = vld [vmem:[%s8454_s0 + $0x213] sm:$0xff]  ;;  %v290_v59 = vld [vmem:[%s8454_s0 + $0x20b] sm:$0xff] }
 0x1a0   :  { %v5544_v23 = vpop.permute.xlu1 %1214  ;;  %v5546_v37 = vpop.permute.xlu0 %1212 }
 0x1a1   :  { %8575 = vst [vmem:[#allocation118_spill] sm:$0xff] %v5544_v23  ;;  %8576 = vst [vmem:[#allocation119_spill] sm:$0xff] %v5546_v37 }
 0x1a2   :  { %1458 = vrot.lane.b32.xlu1 %v289_v26, %s4376_s29  ;;  %1456 = vrot.lane.b32.xlu0 %v288_v27, %s4376_s29  ;;  %v293_v26 = vld [vmem:[%s8454_s0 + $0x24b] sm:$0xff]  ;;  %v292_v27 = vld [vmem:[%s8454_s0 + $0x243] sm:$0xff] }
 0x1a4   :  { %v5556_v30 = vpop.permute.xlu1 %1218  ;;  %v5558_v32 = vpop.permute.xlu0 %1216 }
 0x1a5   :  { %8577 = vst [vmem:[#allocation120_spill] sm:$0xff] %v5556_v30  ;;  %8578 = vst [vmem:[#allocation121_spill] sm:$0xff] %v5558_v32 }
 0x1a6   :  { %1462 = vrot.lane.b32.xlu1 %v291_v58, %s4376_s29  ;;  %1460 = vrot.lane.b32.xlu0 %v290_v59, %s4376_s29  ;;  %v295_v58 = vld [vmem:[%s8454_s0 + $0x283] sm:$0xff]  ;;  %v294_v59 = vld [vmem:[%s8454_s0 + $0x27b] sm:$0xff] }
 0x1a8   :  { %v5568_v23 = vpop.permute.xlu1 %1222  ;;  %v5570_v37 = vpop.permute.xlu0 %1220 }
 0x1a9   :  { %8579 = vst [vmem:[#allocation122_spill] sm:$0xff] %v5568_v23  ;;  %8580 = vst [vmem:[#allocation123_spill] sm:$0xff] %v5570_v37 }
 0x1aa   :  { %1466 = vrot.lane.b32.xlu1 %v293_v26, %s4376_s29  ;;  %1464 = vrot.lane.b32.xlu0 %v292_v27, %s4376_s29  ;;  %v297_v26 = vld [vmem:[%s8454_s0 + $0x2bb] sm:$0xff]  ;;  %v296_v27 = vld [vmem:[%s8454_s0 + $0x2b3] sm:$0xff] }
 0x1ac   :  { %v5580_v30 = vpop.permute.xlu1 %1226  ;;  %v5582_v32 = vpop.permute.xlu0 %1224 }
 0x1ad   :  { %8581 = vst [vmem:[#allocation124_spill] sm:$0xff] %v5580_v30  ;;  %8582 = vst [vmem:[#allocation125_spill] sm:$0xff] %v5582_v32 }
 0x1ae   :  { %1470 = vrot.lane.b32.xlu1 %v295_v58, %s4376_s29  ;;  %1468 = vrot.lane.b32.xlu0 %v294_v59, %s4376_s29  ;;  %v299_v58 = vld [vmem:[%s8454_s0 + $0x2f3] sm:$0xff]  ;;  %v298_v59 = vld [vmem:[%s8454_s0 + $0x2eb] sm:$0xff] }
 0x1b0   :  { %v5592_v23 = vpop.permute.xlu1 %1230  ;;  %v5594_v37 = vpop.permute.xlu0 %1228 }
 0x1b1   :  { %8583 = vst [vmem:[#allocation126_spill] sm:$0xff] %v5592_v23  ;;  %8584 = vst [vmem:[#allocation127_spill] sm:$0xff] %v5594_v37 }
 0x1b2   :  { %1474 = vrot.lane.b32.xlu1 %v297_v26, %s4376_s29  ;;  %1472 = vrot.lane.b32.xlu0 %v296_v27, %s4376_s29  ;;  %v301_v26 = vld [vmem:[%s8454_s0 + $0x32b] sm:$0xff]  ;;  %v300_v27 = vld [vmem:[%s8454_s0 + $0x323] sm:$0xff] }
 0x1b4   :  { %v5604_v30 = vpop.permute.xlu1 %1234  ;;  %v5606_v32 = vpop.permute.xlu0 %1232 }
 0x1b5   :  { %8585 = vst [vmem:[#allocation128_spill] sm:$0xff] %v5604_v30  ;;  %8586 = vst [vmem:[#allocation129_spill] sm:$0xff] %v5606_v32 }
 0x1b6   :  { %1478 = vrot.lane.b32.xlu1 %v299_v58, %s4376_s29  ;;  %1476 = vrot.lane.b32.xlu0 %v298_v59, %s4376_s29  ;;  %v303_v58 = vld [vmem:[%s8454_s0 + $0x363] sm:$0xff]  ;;  %v302_v59 = vld [vmem:[%s8454_s0 + $0x35b] sm:$0xff] }
 0x1b8   :  { %v5616_v23 = vpop.permute.xlu1 %1238  ;;  %v5618_v37 = vpop.permute.xlu0 %1236 }
 0x1b9   :  { %8587 = vst [vmem:[#allocation130_spill] sm:$0xff] %v5616_v23  ;;  %8588 = vst [vmem:[#allocation131_spill] sm:$0xff] %v5618_v37 }
 0x1ba   :  { %1482 = vrot.lane.b32.xlu1 %v301_v26, %s4376_s29  ;;  %1480 = vrot.lane.b32.xlu0 %v300_v27, %s4376_s29  ;;  %v305_v26 = vld [vmem:[%s8454_s0 + $0x39b] sm:$0xff]  ;;  %v304_v27 = vld [vmem:[%s8454_s0 + $0x393] sm:$0xff] }
 0x1bc   :  { %v5628_v30 = vpop.permute.xlu1 %1242  ;;  %v5630_v32 = vpop.permute.xlu0 %1240 }
 0x1bd   :  { %8589 = vst [vmem:[#allocation132_spill] sm:$0xff] %v5628_v30  ;;  %8590 = vst [vmem:[#allocation133_spill] sm:$0xff] %v5630_v32 }
 0x1be   :  { %1486 = vrot.lane.b32.xlu1 %v303_v58, %s4376_s29  ;;  %1484 = vrot.lane.b32.xlu0 %v302_v59, %s4376_s29  ;;  %v307_v58 = vld [vmem:[%s8454_s0 + $0x3d3] sm:$0xff]  ;;  %v306_v59 = vld [vmem:[%s8454_s0 + $0x3cb] sm:$0xff] }
 0x1c0   :  { %v5640_v23 = vpop.permute.xlu1 %1246  ;;  %v5642_v37 = vpop.permute.xlu0 %1244 }
 0x1c1   :  { %8591 = vst [vmem:[#allocation134_spill] sm:$0xff] %v5640_v23  ;;  %8592 = vst [vmem:[#allocation135_spill] sm:$0xff] %v5642_v37 }
 0x1c2   :  { %1490 = vrot.lane.b32.xlu1 %v305_v26, %s4376_s29  ;;  %1488 = vrot.lane.b32.xlu0 %v304_v27, %s4376_s29  ;;  %v309_v26 = vld [vmem:[%s8454_s0 + $0x40b] sm:$0xff]  ;;  %v308_v27 = vld [vmem:[%s8454_s0 + $0x403] sm:$0xff] }
 0x1c4   :  { %v5652_v30 = vpop.permute.xlu1 %1250  ;;  %v5654_v32 = vpop.permute.xlu0 %1248 }
 0x1c5   :  { %8593 = vst [vmem:[#allocation136_spill] sm:$0xff] %v5652_v30  ;;  %8594 = vst [vmem:[#allocation137_spill] sm:$0xff] %v5654_v32 }
 0x1c6   :  { %1494 = vrot.lane.b32.xlu1 %v307_v58, %s4376_s29  ;;  %1492 = vrot.lane.b32.xlu0 %v306_v59, %s4376_s29  ;;  %v311_v58 = vld [vmem:[%s8454_s0 + $0x443] sm:$0xff]  ;;  %v310_v59 = vld [vmem:[%s8454_s0 + $0x43b] sm:$0xff] }
 0x1c8   :  { %v5664_v23 = vpop.permute.xlu1 %1254  ;;  %v5666_v37 = vpop.permute.xlu0 %1252 }
 0x1c9   :  { %8595 = vst [vmem:[#allocation138_spill] sm:$0xff] %v5664_v23  ;;  %8596 = vst [vmem:[#allocation139_spill] sm:$0xff] %v5666_v37 }
 0x1ca   :  { %1498 = vrot.lane.b32.xlu1 %v309_v26, %s4376_s29  ;;  %1496 = vrot.lane.b32.xlu0 %v308_v27, %s4376_s29  ;;  %v313_v26 = vld [vmem:[%s8454_s0 + $0x47b] sm:$0xff]  ;;  %v312_v27 = vld [vmem:[%s8454_s0 + $0x473] sm:$0xff] }
 0x1cc   :  { %v5676_v30 = vpop.permute.xlu1 %1258  ;;  %v5678_v32 = vpop.permute.xlu0 %1256 }
 0x1cd   :  { %8597 = vst [vmem:[#allocation140_spill] sm:$0xff] %v5676_v30  ;;  %8598 = vst [vmem:[#allocation141_spill] sm:$0xff] %v5678_v32 }
 0x1ce   :  { %1502 = vrot.lane.b32.xlu1 %v311_v58, %s4376_s29  ;;  %1500 = vrot.lane.b32.xlu0 %v310_v59, %s4376_s29  ;;  %v315_v58 = vld [vmem:[%s8454_s0 + $0x4b3] sm:$0xff]  ;;  %v314_v59 = vld [vmem:[%s8454_s0 + $0x4ab] sm:$0xff] }
 0x1d0   :  { %v5688_v23 = vpop.permute.xlu1 %1262  ;;  %v5690_v37 = vpop.permute.xlu0 %1260 }
 0x1d1   :  { %8599 = vst [vmem:[#allocation142_spill] sm:$0xff] %v5688_v23  ;;  %8600 = vst [vmem:[#allocation143_spill] sm:$0xff] %v5690_v37 }
 0x1d2   :  { %1506 = vrot.lane.b32.xlu1 %v313_v26, %s4376_s29  ;;  %1504 = vrot.lane.b32.xlu0 %v312_v27, %s4376_s29  ;;  %v317_v26 = vld [vmem:[%s8454_s0 + $0x4eb] sm:$0xff]  ;;  %v316_v27 = vld [vmem:[%s8454_s0 + $0x4e3] sm:$0xff] }
 0x1d4   :  { %v5700_v30 = vpop.permute.xlu1 %1266  ;;  %v5702_v32 = vpop.permute.xlu0 %1264 }
 0x1d5   :  { %8601 = vst [vmem:[#allocation144_spill] sm:$0xff] %v5700_v30  ;;  %8602 = vst [vmem:[#allocation145_spill] sm:$0xff] %v5702_v32 }
 0x1d6   :  { %1510 = vrot.lane.b32.xlu1 %v315_v58, %s4376_s29  ;;  %1508 = vrot.lane.b32.xlu0 %v314_v59, %s4376_s29  ;;  %v319_v58 = vld [vmem:[%s8454_s0 + $0x523] sm:$0xff]  ;;  %v318_v59 = vld [vmem:[%s8454_s0 + $0x51b] sm:$0xff] }
 0x1d8   :  { %v5712_v23 = vpop.permute.xlu1 %1270  ;;  %v5714_v37 = vpop.permute.xlu0 %1268 }
 0x1d9   :  { %8603 = vst [vmem:[#allocation146_spill] sm:$0xff] %v5712_v23  ;;  %8604 = vst [vmem:[#allocation147_spill] sm:$0xff] %v5714_v37 }
 0x1da   :  { %1514 = vrot.lane.b32.xlu1 %v317_v26, %s4376_s29  ;;  %1512 = vrot.lane.b32.xlu0 %v316_v27, %s4376_s29  ;;  %v321_v26 = vld [vmem:[%s8454_s0 + $0x55b] sm:$0xff]  ;;  %v320_v27 = vld [vmem:[%s8454_s0 + $0x553] sm:$0xff] }
 0x1dc   :  { %v5724_v30 = vpop.permute.xlu1 %1274  ;;  %v5726_v32 = vpop.permute.xlu0 %1272 }
 0x1dd   :  { %8605 = vst [vmem:[#allocation148_spill] sm:$0xff] %v5724_v30  ;;  %8606 = vst [vmem:[#allocation149_spill] sm:$0xff] %v5726_v32 }
 0x1de   :  { %1518 = vrot.lane.b32.xlu1 %v319_v58, %s4376_s29  ;;  %1516 = vrot.lane.b32.xlu0 %v318_v59, %s4376_s29  ;;  %v323_v58 = vld [vmem:[%s8454_s0 + $0x593] sm:$0xff]  ;;  %v322_v59 = vld [vmem:[%s8454_s0 + $0x58b] sm:$0xff] }
 0x1e0   :  { %v5736_v23 = vpop.permute.xlu1 %1278  ;;  %v5738_v37 = vpop.permute.xlu0 %1276 }
 0x1e1   :  { %8607 = vst [vmem:[#allocation150_spill] sm:$0xff] %v5736_v23  ;;  %8608 = vst [vmem:[#allocation151_spill] sm:$0xff] %v5738_v37 }
 0x1e2   :  { %1522 = vrot.lane.b32.xlu1 %v321_v26, %s4376_s29  ;;  %1520 = vrot.lane.b32.xlu0 %v320_v27, %s4376_s29  ;;  %v325_v26 = vld [vmem:[%s8454_s0 + $0x5cb] sm:$0xff]  ;;  %v324_v27 = vld [vmem:[%s8454_s0 + $0x5c3] sm:$0xff] }
 0x1e4   :  { %v5748_v30 = vpop.permute.xlu1 %1282  ;;  %v5750_v32 = vpop.permute.xlu0 %1280 }
 0x1e5   :  { %8609 = vst [vmem:[#allocation152_spill] sm:$0xff] %v5748_v30  ;;  %8610 = vst [vmem:[#allocation153_spill] sm:$0xff] %v5750_v32 }
 0x1e6   :  { %1526 = vrot.lane.b32.xlu1 %v323_v58, %s4376_s29  ;;  %1524 = vrot.lane.b32.xlu0 %v322_v59, %s4376_s29  ;;  %v327_v58 = vld [vmem:[%s8454_s0 + $0x603] sm:$0xff]  ;;  %v326_v59 = vld [vmem:[%s8454_s0 + $0x5fb] sm:$0xff] }
 0x1e8   :  { %v5760_v23 = vpop.permute.xlu1 %1286  ;;  %v5762_v37 = vpop.permute.xlu0 %1284 }
 0x1e9   :  { %8611 = vst [vmem:[#allocation154_spill] sm:$0xff] %v5760_v23  ;;  %8612 = vst [vmem:[#allocation155_spill] sm:$0xff] %v5762_v37 }
 0x1ea   :  { %1530 = vrot.lane.b32.xlu1 %v325_v26, %s4376_s29  ;;  %1528 = vrot.lane.b32.xlu0 %v324_v27, %s4376_s29  ;;  %v329_v26 = vld [vmem:[%s8454_s0 + $0x63b] sm:$0xff]  ;;  %v328_v27 = vld [vmem:[%s8454_s0 + $0x633] sm:$0xff] }
 0x1ec   :  { %v5772_v30 = vpop.permute.xlu1 %1290  ;;  %v5774_v32 = vpop.permute.xlu0 %1288 }
 0x1ed   :  { %8613 = vst [vmem:[#allocation156_spill] sm:$0xff] %v5772_v30  ;;  %8614 = vst [vmem:[#allocation157_spill] sm:$0xff] %v5774_v32 }
 0x1ee   :  { %1534 = vrot.lane.b32.xlu1 %v327_v58, %s4376_s29  ;;  %1532 = vrot.lane.b32.xlu0 %v326_v59, %s4376_s29  ;;  %v331_v58 = vld [vmem:[%s8454_s0 + $0x673] sm:$0xff]  ;;  %v330_v59 = vld [vmem:[%s8454_s0 + $0x66b] sm:$0xff] }
 0x1f0   :  { %v5784_v23 = vpop.permute.xlu1 %1294  ;;  %v5786_v37 = vpop.permute.xlu0 %1292 }
 0x1f1   :  { %8615 = vst [vmem:[#allocation158_spill] sm:$0xff] %v5784_v23  ;;  %8616 = vst [vmem:[#allocation159_spill] sm:$0xff] %v5786_v37 }
 0x1f2   :  { %1538 = vrot.lane.b32.xlu1 %v329_v26, %s4376_s29  ;;  %1536 = vrot.lane.b32.xlu0 %v328_v27, %s4376_s29  ;;  %v333_v26 = vld [vmem:[%s8454_s0 + $0x6ab] sm:$0xff]  ;;  %v332_v27 = vld [vmem:[%s8454_s0 + $0x6a3] sm:$0xff] }
 0x1f4   :  { %v5796_v30 = vpop.permute.xlu1 %1426  ;;  %v5798_v32 = vpop.permute.xlu0 %1424 }
 0x1f6   :  { %1542 = vrot.lane.b32.xlu1 %v331_v58, %s4376_s29  ;;  %1540 = vrot.lane.b32.xlu0 %v330_v59, %s4376_s29  ;;  %v335_v58 = vld [vmem:[%s8454_s0 + $0x6e3] sm:$0xff]  ;;  %v334_v59 = vld [vmem:[%s8454_s0 + $0x6db] sm:$0xff] }
 0x1f8   :  { %v5808_v37 = vpop.permute.xlu1 %1430  ;;  %v5810_v23 = vpop.permute.xlu0 %1428 }
 0x1fa   :  { %1546 = vrot.lane.b32.xlu1 %v333_v26, %s4376_s29  ;;  %1544 = vrot.lane.b32.xlu0 %v332_v27, %s4376_s29  ;;  %v337_v26 = vld [vmem:[%s8454_s0 + $0x1c] sm:$0xff]  ;;  %v336_v27 = vld [vmem:[%s8454_s0 + $0x14] sm:$0xff] }
 0x1fc   :  { %v5820_v31 = vpop.permute.xlu1 %1434  ;;  %v5822_v33 = vpop.permute.xlu0 %1432 }
 0x1fe   :  { %1550 = vrot.lane.b32.xlu1 %v335_v58, %s4376_s29  ;;  %1548 = vrot.lane.b32.xlu0 %v334_v59, %s4376_s29  ;;  %v339_v58 = vld [vmem:[%s8454_s0 + $0x54] sm:$0xff]  ;;  %v338_v59 = vld [vmem:[%s8454_s0 + $0x4c] sm:$0xff] }
 0x200   :  { %v5832_v22 = vpop.permute.xlu1 %1438  ;;  %v5834_v38 = vpop.permute.xlu0 %1436 }
 0x202   :  { %1682 = vrot.lane.b32.xlu1 %v337_v26, %s4377_s6  ;;  %1680 = vrot.lane.b32.xlu0 %v336_v27, %s4377_s6  ;;  %v341_v26 = vld [vmem:[%s8454_s0 + $0x8c] sm:$0xff]  ;;  %v340_v27 = vld [vmem:[%s8454_s0 + $0x84] sm:$0xff] }
 0x204   :  { %v5844_v28 = vpop.permute.xlu1 %1442  ;;  %v5846_v36 = vpop.permute.xlu0 %1440 }
 0x206   :  { %1686 = vrot.lane.b32.xlu1 %v339_v58, %s4377_s6  ;;  %1684 = vrot.lane.b32.xlu0 %v338_v59, %s4377_s6  ;;  %v343_v58 = vld [vmem:[%s8454_s0 + $0xc4] sm:$0xff]  ;;  %v342_v59 = vld [vmem:[%s8454_s0 + $0xbc] sm:$0xff] }
 0x208   :  { %v5856_v39 = vpop.permute.xlu1 %1446  ;;  %v5858_v29 = vpop.permute.xlu0 %1444 }
 0x209   :  { %8617 = vst [vmem:[#allocation160_spill] sm:$0xff] %v5856_v39 }
 0x20a   :  { %1690 = vrot.lane.b32.xlu1 %v341_v26, %s4377_s6  ;;  %1688 = vrot.lane.b32.xlu0 %v340_v27, %s4377_s6  ;;  %v345_v26 = vld [vmem:[%s8454_s0 + $0xfc] sm:$0xff]  ;;  %v344_v27 = vld [vmem:[%s8454_s0 + $0xf4] sm:$0xff] }
 0x20c   :  { %v5868_v15 = vpop.permute.xlu1 %1450  ;;  %v5870_v46 = vpop.permute.xlu0 %1448 }
 0x20d   :  { %8618 = vst [vmem:[#allocation161_spill] sm:$0xff] %v5868_v15  ;;  %8619 = vst [vmem:[#allocation162_spill] sm:$0xff] %v5870_v46 }
 0x20e   :  { %1694 = vrot.lane.b32.xlu1 %v343_v58, %s4377_s6  ;;  %1692 = vrot.lane.b32.xlu0 %v342_v59, %s4377_s6  ;;  %v347_v58 = vld [vmem:[%s8454_s0 + $0x134] sm:$0xff]  ;;  %v346_v59 = vld [vmem:[%s8454_s0 + $0x12c] sm:$0xff] }
 0x210   :  { %v5880_v24 = vpop.permute.xlu1 %1454  ;;  %v5882_v41 = vpop.permute.xlu0 %1452 }
 0x211   :  { %8620 = vst [vmem:[#allocation163_spill] sm:$0xff] %v5880_v24  ;;  %8621 = vst [vmem:[#allocation164_spill] sm:$0xff] %v5882_v41 }
 0x212   :  { %1698 = vrot.lane.b32.xlu1 %v345_v26, %s4377_s6  ;;  %1696 = vrot.lane.b32.xlu0 %v344_v27, %s4377_s6  ;;  %v349_v26 = vld [vmem:[%s8454_s0 + $0x16c] sm:$0xff]  ;;  %v348_v27 = vld [vmem:[%s8454_s0 + $0x164] sm:$0xff] }
 0x214   :  { %v5892_v47 = vpop.permute.xlu1 %1458  ;;  %v5894_v25 = vpop.permute.xlu0 %1456 }
 0x215   :  { %8622 = vst [vmem:[#allocation165_spill] sm:$0xff] %v5892_v47  ;;  %8623 = vst [vmem:[#allocation166_spill] sm:$0xff] %v5894_v25 }
 0x216   :  { %1702 = vrot.lane.b32.xlu1 %v347_v58, %s4377_s6  ;;  %1700 = vrot.lane.b32.xlu0 %v346_v59, %s4377_s6  ;;  %v351_v58 = vld [vmem:[%s8454_s0 + $0x1a4] sm:$0xff]  ;;  %v350_v59 = vld [vmem:[%s8454_s0 + $0x19c] sm:$0xff] }
 0x218   :  { %v5904_v24 = vpop.permute.xlu1 %1462  ;;  %v5906_v41 = vpop.permute.xlu0 %1460 }
 0x219   :  { %8624 = vst [vmem:[#allocation167_spill] sm:$0xff] %v5904_v24  ;;  %8625 = vst [vmem:[#allocation168_spill] sm:$0xff] %v5906_v41 }
 0x21a   :  { %1706 = vrot.lane.b32.xlu1 %v349_v26, %s4377_s6  ;;  %1704 = vrot.lane.b32.xlu0 %v348_v27, %s4377_s6  ;;  %v353_v26 = vld [vmem:[%s8454_s0 + $0x1dc] sm:$0xff]  ;;  %v352_v27 = vld [vmem:[%s8454_s0 + $0x1d4] sm:$0xff] }
 0x21c   :  { %v5916_v47 = vpop.permute.xlu1 %1466  ;;  %v5918_v25 = vpop.permute.xlu0 %1464 }
 0x21d   :  { %8626 = vst [vmem:[#allocation169_spill] sm:$0xff] %v5916_v47  ;;  %8627 = vst [vmem:[#allocation170_spill] sm:$0xff] %v5918_v25 }
 0x21e   :  { %1710 = vrot.lane.b32.xlu1 %v351_v58, %s4377_s6  ;;  %1708 = vrot.lane.b32.xlu0 %v350_v59, %s4377_s6  ;;  %v355_v58 = vld [vmem:[%s8454_s0 + $0x214] sm:$0xff]  ;;  %v354_v59 = vld [vmem:[%s8454_s0 + $0x20c] sm:$0xff] }
 0x220   :  { %v5928_v24 = vpop.permute.xlu1 %1470  ;;  %v5930_v41 = vpop.permute.xlu0 %1468 }
 0x221   :  { %8628 = vst [vmem:[#allocation171_spill] sm:$0xff] %v5928_v24  ;;  %8629 = vst [vmem:[#allocation172_spill] sm:$0xff] %v5930_v41 }
 0x222   :  { %1714 = vrot.lane.b32.xlu1 %v353_v26, %s4377_s6  ;;  %1712 = vrot.lane.b32.xlu0 %v352_v27, %s4377_s6  ;;  %v357_v26 = vld [vmem:[%s8454_s0 + $0x24c] sm:$0xff]  ;;  %v356_v27 = vld [vmem:[%s8454_s0 + $0x244] sm:$0xff] }
 0x224   :  { %v5940_v47 = vpop.permute.xlu1 %1474  ;;  %v5942_v25 = vpop.permute.xlu0 %1472 }
 0x225   :  { %8630 = vst [vmem:[#allocation173_spill] sm:$0xff] %v5940_v47  ;;  %8631 = vst [vmem:[#allocation174_spill] sm:$0xff] %v5942_v25 }
 0x226   :  { %1718 = vrot.lane.b32.xlu1 %v355_v58, %s4377_s6  ;;  %1716 = vrot.lane.b32.xlu0 %v354_v59, %s4377_s6  ;;  %v359_v58 = vld [vmem:[%s8454_s0 + $0x284] sm:$0xff]  ;;  %v358_v59 = vld [vmem:[%s8454_s0 + $0x27c] sm:$0xff] }
 0x228   :  { %v5952_v24 = vpop.permute.xlu1 %1478  ;;  %v5954_v41 = vpop.permute.xlu0 %1476 }
 0x229   :  { %8632 = vst [vmem:[#allocation175_spill] sm:$0xff] %v5952_v24  ;;  %8633 = vst [vmem:[#allocation176_spill] sm:$0xff] %v5954_v41 }
 0x22a   :  { %1722 = vrot.lane.b32.xlu1 %v357_v26, %s4377_s6  ;;  %1720 = vrot.lane.b32.xlu0 %v356_v27, %s4377_s6  ;;  %v361_v26 = vld [vmem:[%s8454_s0 + $0x2bc] sm:$0xff]  ;;  %v360_v27 = vld [vmem:[%s8454_s0 + $0x2b4] sm:$0xff] }
 0x22c   :  { %v5964_v47 = vpop.permute.xlu1 %1482  ;;  %v5966_v25 = vpop.permute.xlu0 %1480 }
 0x22d   :  { %8634 = vst [vmem:[#allocation177_spill] sm:$0xff] %v5964_v47  ;;  %8635 = vst [vmem:[#allocation178_spill] sm:$0xff] %v5966_v25 }
 0x22e   :  { %1726 = vrot.lane.b32.xlu1 %v359_v58, %s4377_s6  ;;  %1724 = vrot.lane.b32.xlu0 %v358_v59, %s4377_s6  ;;  %v363_v58 = vld [vmem:[%s8454_s0 + $0x2f4] sm:$0xff]  ;;  %v362_v59 = vld [vmem:[%s8454_s0 + $0x2ec] sm:$0xff] }
 0x230   :  { %v5976_v24 = vpop.permute.xlu1 %1486  ;;  %v5978_v41 = vpop.permute.xlu0 %1484 }
 0x231   :  { %8636 = vst [vmem:[#allocation179_spill] sm:$0xff] %v5976_v24  ;;  %8637 = vst [vmem:[#allocation180_spill] sm:$0xff] %v5978_v41 }
 0x232   :  { %1730 = vrot.lane.b32.xlu1 %v361_v26, %s4377_s6  ;;  %1728 = vrot.lane.b32.xlu0 %v360_v27, %s4377_s6  ;;  %v365_v26 = vld [vmem:[%s8454_s0 + $0x32c] sm:$0xff]  ;;  %v364_v27 = vld [vmem:[%s8454_s0 + $0x324] sm:$0xff] }
 0x234   :  { %v5988_v47 = vpop.permute.xlu1 %1490  ;;  %v5990_v25 = vpop.permute.xlu0 %1488 }
 0x235   :  { %8638 = vst [vmem:[#allocation181_spill] sm:$0xff] %v5988_v47  ;;  %8639 = vst [vmem:[#allocation182_spill] sm:$0xff] %v5990_v25 }
 0x236   :  { %1734 = vrot.lane.b32.xlu1 %v363_v58, %s4377_s6  ;;  %1732 = vrot.lane.b32.xlu0 %v362_v59, %s4377_s6  ;;  %v367_v58 = vld [vmem:[%s8454_s0 + $0x364] sm:$0xff]  ;;  %v366_v59 = vld [vmem:[%s8454_s0 + $0x35c] sm:$0xff] }
 0x238   :  { %v6000_v24 = vpop.permute.xlu1 %1494  ;;  %v6002_v41 = vpop.permute.xlu0 %1492 }
 0x239   :  { %8640 = vst [vmem:[#allocation183_spill] sm:$0xff] %v6000_v24  ;;  %8641 = vst [vmem:[#allocation184_spill] sm:$0xff] %v6002_v41 }
 0x23a   :  { %1738 = vrot.lane.b32.xlu1 %v365_v26, %s4377_s6  ;;  %1736 = vrot.lane.b32.xlu0 %v364_v27, %s4377_s6  ;;  %v369_v26 = vld [vmem:[%s8454_s0 + $0x39c] sm:$0xff]  ;;  %v368_v27 = vld [vmem:[%s8454_s0 + $0x394] sm:$0xff] }
 0x23c   :  { %v6012_v47 = vpop.permute.xlu1 %1498  ;;  %v6014_v25 = vpop.permute.xlu0 %1496 }
 0x23d   :  { %8642 = vst [vmem:[#allocation185_spill] sm:$0xff] %v6012_v47  ;;  %8643 = vst [vmem:[#allocation186_spill] sm:$0xff] %v6014_v25 }
 0x23e   :  { %1742 = vrot.lane.b32.xlu1 %v367_v58, %s4377_s6  ;;  %1740 = vrot.lane.b32.xlu0 %v366_v59, %s4377_s6  ;;  %v371_v58 = vld [vmem:[%s8454_s0 + $0x3d4] sm:$0xff]  ;;  %v370_v59 = vld [vmem:[%s8454_s0 + $0x3cc] sm:$0xff] }
 0x240   :  { %v6024_v24 = vpop.permute.xlu1 %1502  ;;  %v6026_v41 = vpop.permute.xlu0 %1500 }
 0x241   :  { %8644 = vst [vmem:[#allocation187_spill] sm:$0xff] %v6024_v24  ;;  %8645 = vst [vmem:[#allocation188_spill] sm:$0xff] %v6026_v41 }
 0x242   :  { %1746 = vrot.lane.b32.xlu1 %v369_v26, %s4377_s6  ;;  %1744 = vrot.lane.b32.xlu0 %v368_v27, %s4377_s6  ;;  %v373_v26 = vld [vmem:[%s8454_s0 + $0x40c] sm:$0xff]  ;;  %v372_v27 = vld [vmem:[%s8454_s0 + $0x404] sm:$0xff] }
 0x244   :  { %v6036_v47 = vpop.permute.xlu1 %1506  ;;  %v6038_v25 = vpop.permute.xlu0 %1504 }
 0x245   :  { %8646 = vst [vmem:[#allocation189_spill] sm:$0xff] %v6036_v47  ;;  %8647 = vst [vmem:[#allocation190_spill] sm:$0xff] %v6038_v25 }
 0x246   :  { %1750 = vrot.lane.b32.xlu1 %v371_v58, %s4377_s6  ;;  %1748 = vrot.lane.b32.xlu0 %v370_v59, %s4377_s6  ;;  %v375_v58 = vld [vmem:[%s8454_s0 + $0x444] sm:$0xff]  ;;  %v374_v59 = vld [vmem:[%s8454_s0 + $0x43c] sm:$0xff] }
 0x248   :  { %v6048_v24 = vpop.permute.xlu1 %1510  ;;  %v6050_v41 = vpop.permute.xlu0 %1508 }
 0x249   :  { %8648 = vst [vmem:[#allocation191_spill] sm:$0xff] %v6048_v24  ;;  %8649 = vst [vmem:[#allocation192_spill] sm:$0xff] %v6050_v41 }
 0x24a   :  { %1754 = vrot.lane.b32.xlu1 %v373_v26, %s4377_s6  ;;  %1752 = vrot.lane.b32.xlu0 %v372_v27, %s4377_s6  ;;  %v377_v26 = vld [vmem:[%s8454_s0 + $0x47c] sm:$0xff]  ;;  %v376_v27 = vld [vmem:[%s8454_s0 + $0x474] sm:$0xff] }
 0x24c   :  { %v6060_v47 = vpop.permute.xlu1 %1514  ;;  %v6062_v25 = vpop.permute.xlu0 %1512 }
 0x24d   :  { %8650 = vst [vmem:[#allocation193_spill] sm:$0xff] %v6060_v47  ;;  %8651 = vst [vmem:[#allocation194_spill] sm:$0xff] %v6062_v25 }
 0x24e   :  { %1758 = vrot.lane.b32.xlu1 %v375_v58, %s4377_s6  ;;  %1756 = vrot.lane.b32.xlu0 %v374_v59, %s4377_s6  ;;  %v379_v58 = vld [vmem:[%s8454_s0 + $0x4b4] sm:$0xff]  ;;  %v378_v59 = vld [vmem:[%s8454_s0 + $0x4ac] sm:$0xff] }
 0x250   :  { %v6072_v24 = vpop.permute.xlu1 %1518  ;;  %v6074_v41 = vpop.permute.xlu0 %1516 }
 0x251   :  { %8652 = vst [vmem:[#allocation195_spill] sm:$0xff] %v6072_v24  ;;  %8653 = vst [vmem:[#allocation196_spill] sm:$0xff] %v6074_v41 }
 0x252   :  { %1762 = vrot.lane.b32.xlu1 %v377_v26, %s4377_s6  ;;  %1760 = vrot.lane.b32.xlu0 %v376_v27, %s4377_s6  ;;  %v381_v26 = vld [vmem:[%s8454_s0 + $0x4ec] sm:$0xff]  ;;  %v380_v27 = vld [vmem:[%s8454_s0 + $0x4e4] sm:$0xff] }
 0x254   :  { %v6084_v47 = vpop.permute.xlu1 %1522  ;;  %v6086_v25 = vpop.permute.xlu0 %1520 }
 0x255   :  { %8654 = vst [vmem:[#allocation197_spill] sm:$0xff] %v6084_v47  ;;  %8655 = vst [vmem:[#allocation198_spill] sm:$0xff] %v6086_v25  ;;  %v3168_v47 = vld [vmem:[%s8455_s1 + $0x40] sm:$0xff] }
 0x256   :  { %1766 = vrot.lane.b32.xlu1 %v379_v58, %s4377_s6  ;;  %1764 = vrot.lane.b32.xlu0 %v378_v59, %s4377_s6  ;;  %v383_v58 = vld [vmem:[%s8454_s0 + $0x524] sm:$0xff]  ;;  %v382_v59 = vld [vmem:[%s8454_s0 + $0x51c] sm:$0xff] }
 0x257   :  { %4232 = vmatprep.subr.mxu0 %v3168_v47  ;;  %4346 = vmatprep.subr.mxu1 %v3168_v47 }
 0x258   :  { %v6096_v24 = vpop.permute.xlu1 %1526  ;;  %v6098_v41 = vpop.permute.xlu0 %1524  ;;  %4233 = vmatpush3.msra.mxu0 %v3168_v47  ;;  %4355 = vmatpush3.msra.mxu1 %v3168_v47 }
 0x259   :  { %8656 = vst [vmem:[#allocation199_spill] sm:$0xff] %v6096_v24  ;;  %8657 = vst [vmem:[#allocation200_spill] sm:$0xff] %v6098_v41 }
 0x25a   :  { %1770 = vrot.lane.b32.xlu1 %v381_v26, %s4377_s6  ;;  %1768 = vrot.lane.b32.xlu0 %v380_v27, %s4377_s6  ;;  %v3167_v26 = vld [vmem:[%s8455_s1 + $0x38] sm:$0xff]  ;;  %v3166_v27 = vld [vmem:[%s8455_s1 + $0x30] sm:$0xff] }
 0x25b   :  { %4234 = vmatprep.subr.mxu0 %v3167_v26  ;;  %4347 = vmatprep.subr.mxu1 %v3167_v26 }
 0x25c   :  { %v6111_v25 = vpop.permute.xlu1 %1530  ;;  %v6113_v24 = vpop.permute.xlu0 %1528  ;;  %4235 = vmatpush3.msra.mxu0 %v3167_v26  ;;  %4356 = vmatpush3.msra.mxu1 %v3167_v26 }
 0x25d   :  { %8658 = vst [vmem:[#allocation201_spill] sm:$0xff] %v6111_v25  ;;  %8659 = vst [vmem:[#allocation202_spill] sm:$0xff] %v6113_v24  ;;  %v385_v25 = vld [vmem:[%s8454_s0 + $0x55c] sm:$0xff]  ;;  %v384_v24 = vld [vmem:[%s8454_s0 + $0x554] sm:$0xff]  ;;  %4236 = vmatprep.subr.mxu0 %v3166_v27  ;;  %4348 = vmatprep.subr.mxu1 %v3166_v27 }
 0x25e   :  { %1774 = vrot.lane.b32.xlu1 %v383_v58, %s4377_s6  ;;  %1772 = vrot.lane.b32.xlu0 %v382_v59, %s4377_s6  ;;  %v3165_v58 = vld [vmem:[%s8455_s1 + $0x28] sm:$0xff]  ;;  %v387_v59 = vld [vmem:[%s8454_s0 + $0x594] sm:$0xff] }
 0x25f   :  { %4237 = vmatpush3.msra.mxu0 %v3166_v27  ;;  %4357 = vmatpush3.msra.mxu1 %v3166_v27  ;;  %v389_v27 = vld [vmem:[%s8454_s0 + $0x5cc] sm:$0xff] }
 0x260   :  { %v6129_v41 = vpop.permute.xlu1 %1534  ;;  %v6131_v47 = vpop.permute.xlu0 %1532  ;;  %4238 = vmatprep.subr.mxu0 %v3165_v58  ;;  %4349 = vmatprep.subr.mxu1 %v3165_v58 }
 0x261   :  { %8660 = vst [vmem:[#allocation203_spill] sm:$0xff] %v6129_v41  ;;  %8661 = vst [vmem:[#allocation204_spill] sm:$0xff] %v6131_v47  ;;  %v386_v41 = vld [vmem:[%s8454_s0 + $0x58c] sm:$0xff]  ;;  %4239 = vmatpush3.msra.mxu0 %v3165_v58  ;;  %4358 = vmatpush3.msra.mxu1 %v3165_v58 }
 0x262   :  { %1778 = vrot.lane.b32.xlu1 %v385_v25, %s4377_s6  ;;  %1776 = vrot.lane.b32.xlu0 %v384_v24, %s4377_s6  ;;  %v3164_v25 = vld [vmem:[%s8455_s1 + $0x20] sm:$0xff]  ;;  %v3163_v24 = vld [vmem:[%s8455_s1 + $0x18] sm:$0xff] }
 0x263   :  { %4240 = vmatprep.subr.mxu0 %v3164_v25  ;;  %4350 = vmatprep.subr.mxu1 %v3164_v25 }
 0x264   :  { %v6144_v26 = vpop.permute.xlu1 %1538  ;;  %v6146_v47 = vpop.permute.xlu0 %1536  ;;  %4241 = vmatpush3.msra.mxu0 %v3164_v25  ;;  %4359 = vmatpush3.msra.mxu1 %v3164_v25 }
 0x265   :  { %8662 = vst [vmem:[#allocation205_spill] sm:$0xff] %v6144_v26  ;;  %8663 = vst [vmem:[#allocation206_spill] sm:$0xff] %v6146_v47  ;;  %v388_v26 = vld [vmem:[%s8454_s0 + $0x5c4] sm:$0xff]  ;;  %4242 = vmatprep.subr.mxu0 %v3163_v24  ;;  %4351 = vmatprep.subr.mxu1 %v3163_v24 }
 0x266   :  { %1782 = vrot.lane.b32.xlu1 %v387_v59, %s4377_s6  ;;  %1780 = vrot.lane.b32.xlu0 %v386_v41, %s4377_s6  ;;  %v3162_v41 = vld [vmem:[%s8455_s1 + $0x10] sm:$0xff]  ;;  %v400_v59 = vld [vmem:[%s8454_s0 + $0x24] sm:$0xff] }
 0x267   :  { %4243 = vmatpush3.msra.mxu0 %v3163_v24  ;;  %4360 = vmatpush3.msra.mxu1 %v3163_v24  ;;  %v464_v24 = vld [vmem:[%s8454_s0 + $0x25] sm:$0xff] }
 0x268   :  { %v6162_v47 = vpop.permute.xlu1 %1542  ;;  %v6164_v58 = vpop.permute.xlu0 %1540  ;;  %4244 = vmatprep.subr.mxu0 %v3162_v41  ;;  %4352 = vmatprep.subr.mxu1 %v3162_v41 }
 0x269   :  { %8664 = vst [vmem:[#allocation207_spill] sm:$0xff] %v6162_v47  ;;  %8665 = vst [vmem:[#allocation208_spill] sm:$0xff] %v6164_v58  ;;  %v390_v47 = vld [vmem:[%s8454_s0 + $0x5fc] sm:$0xff]  ;;  %4245 = vmatpush3.msra.mxu0 %v3162_v41  ;;  %4361 = vmatpush3.msra.mxu1 %v3162_v41 }
 0x26a   :  { %1786 = vrot.lane.b32.xlu1 %v389_v27, %s4377_s6  ;;  %1784 = vrot.lane.b32.xlu0 %v388_v26, %s4377_s6  ;;  %v3161_v27 = vld [vmem:[%s8455_s1 + $0x8] sm:$0xff]  ;;  %v3160_v26 = vld [vmem:[%s8455_s1] sm:$0xff] }
 0x26b   :  { %4246 = vmatprep.subr.mxu0 %v3161_v27  ;;  %4353 = vmatprep.subr.mxu1 %v3161_v27 }
 0x26c   :  { %v6177_v25 = vpop.permute.xlu1 %1546  ;;  %v6179_v58 = vpop.permute.xlu0 %1544  ;;  %4247 = vmatpush3.msra.mxu0 %v3161_v27  ;;  %4362 = vmatpush3.msra.mxu1 %v3161_v27 }
 0x26d   :  { %8666 = vst [vmem:[#allocation209_spill] sm:$0xff] %v6177_v25  ;;  %8667 = vst [vmem:[#allocation210_spill] sm:$0xff] %v6179_v58  ;;  %v401_v25 = vld [vmem:[%s8454_s0 + $0x2c] sm:$0xff]  ;;  %4248 = vmatprep.subr.mxu0 %v3160_v26  ;;  %4354 = vmatprep.subr.mxu1 %v3160_v26 }
 0x26e   :  { %1936 = vrot.lane.b32.xlu1 %v400_v59, %s4378_s26  ;;  %1788 = vrot.lane.b32.xlu0 %v390_v47, %s4377_s6  ;;  %v528_v47 = vld [vmem:[%s8454_s0 + $0x26] sm:$0xff] }
 0x26f   :  { %v465_v59 = vld [vmem:[%s8454_s0 + $0x2d] sm:$0xff]  ;;  %4249 = vmatpush3.msra.mxu0 %v3160_v26  ;;  %4363 = vmatpush3.msra.mxu1 %v3160_v26 }
 0x270   :  { %v6195_v41 = vpop.permute.xlu1 %1550  ;;  %v6197_v58 = vpop.permute.xlu0 %1548 }
 0x271   :  { %8668 = vst [vmem:[#allocation211_spill] sm:$0xff] %v6195_v41  ;;  %8669 = vst [vmem:[#allocation212_spill] sm:$0xff] %v6197_v58 }
 0x272   :  { %2192 = vrot.lane.b32.xlu1 %v464_v24, %s4379_s12  ;;  %1938 = vrot.lane.b32.xlu0 %v401_v25, %s4378_s26  ;;  %v402_v25 = vld [vmem:[%s8454_s0 + $0x5c] sm:$0xff]  ;;  %v529_v24 = vld [vmem:[%s8454_s0 + $0x2e] sm:$0xff] }
 0x274   :  { %v6207_v58 = vpop.permute.xlu1 %1682  ;;  %v6209_v27 = vpop.permute.xlu0 %1680 }
 0x276   :  { %2448 = vrot.lane.b32.xlu1 %v528_v47, %s4380_s16  ;;  %2194 = vrot.lane.b32.xlu0 %v465_v59, %s4379_s12  ;;  %v466_v47 = vld [vmem:[%s8454_s0 + $0x5d] sm:$0xff] }
 0x277   :  { %v403_v59 = vld [vmem:[%s8454_s0 + $0x64] sm:$0xff] }
 0x278   :  { %v6219_v41 = vpop.permute.xlu1 %1686  ;;  %v6221_v26 = vpop.permute.xlu0 %1684 }
 0x27a   :  { %1940 = vrot.lane.b32.xlu1 %v402_v25, %s4378_s26  ;;  %2450 = vrot.lane.b32.xlu0 %v529_v24, %s4380_s16  ;;  %v530_v25 = vld [vmem:[%s8454_s0 + $0x5e] sm:$0xff] }
 0x27b   :  { %v467_v24 = vld [vmem:[%s8454_s0 + $0x65] sm:$0xff] }
 0x27c   :  { %v6231_v15 = vpop.permute.xlu1 %1690  ;;  %v6233_v14 = vpop.permute.xlu0 %1688 }
 0x27e   :  { %2196 = vrot.lane.b32.xlu1 %v466_v47, %s4379_s12  ;;  %1942 = vrot.lane.b32.xlu0 %v403_v59, %s4378_s26  ;;  %v404_v47 = vld [vmem:[%s8454_s0 + $0x94] sm:$0xff]  ;;  %v531_v59 = vld [vmem:[%s8454_s0 + $0x66] sm:$0xff] }
 0x280   :  { %v6243_v54 = vpop.permute.xlu1 %1694  ;;  %v6245_v20 = vpop.permute.xlu0 %1692 }
 0x282   :  { %2452 = vrot.lane.b32.xlu1 %v530_v25, %s4380_s16  ;;  %2198 = vrot.lane.b32.xlu0 %v467_v24, %s4379_s12  ;;  %v468_v25 = vld [vmem:[%s8454_s0 + $0x95] sm:$0xff] }
 0x283   :  { %v405_v24 = vld [vmem:[%s8454_s0 + $0x9c] sm:$0xff] }
 0x284   :  { %v6255_v46 = vpop.permute.xlu1 %1698  ;;  %v6257_v40 = vpop.permute.xlu0 %1696 }
 0x286   :  { %1944 = vrot.lane.b32.xlu1 %v404_v47, %s4378_s26  ;;  %2454 = vrot.lane.b32.xlu0 %v531_v59, %s4380_s16  ;;  %v532_v47 = vld [vmem:[%s8454_s0 + $0x96] sm:$0xff] }
 0x287   :  { %v469_v59 = vld [vmem:[%s8454_s0 + $0x9d] sm:$0xff] }
 0x288   :  { %v6267_v55 = vpop.permute.xlu1 %1702  ;;  %v6269_v21 = vpop.permute.xlu0 %1700 }
 0x289   :  { %8670 = vst [vmem:[#allocation213_spill] sm:$0xff] %v6267_v55  ;;  %8671 = vst [vmem:[#allocation214_spill] sm:$0xff] %v6269_v21 }
 0x28a   :  { %2200 = vrot.lane.b32.xlu1 %v468_v25, %s4379_s12  ;;  %1946 = vrot.lane.b32.xlu0 %v405_v24, %s4378_s26  ;;  %v406_v25 = vld [vmem:[%s8454_s0 + $0xcc] sm:$0xff]  ;;  %v533_v24 = vld [vmem:[%s8454_s0 + $0x9e] sm:$0xff] }
 0x28c   :  { %v6279_v39 = vpop.permute.xlu1 %1706  ;;  %v6281_v7 = vpop.permute.xlu0 %1704 }
 0x28d   :  { %8672 = vst [vmem:[#allocation215_spill] sm:$0xff] %v6279_v39  ;;  %8673 = vst [vmem:[#allocation216_spill] sm:$0xff] %v6281_v7 }
 0x28e   :  { %2456 = vrot.lane.b32.xlu1 %v532_v47, %s4380_s16  ;;  %2202 = vrot.lane.b32.xlu0 %v469_v59, %s4379_s12  ;;  %v470_v47 = vld [vmem:[%s8454_s0 + $0xcd] sm:$0xff] }
 0x28f   :  { %v407_v59 = vld [vmem:[%s8454_s0 + $0xd4] sm:$0xff] }
 0x290   :  { %v6291_v55 = vpop.permute.xlu1 %1710  ;;  %v6293_v2 = vpop.permute.xlu0 %1708 }
 0x291   :  { %8674 = vst [vmem:[#allocation217_spill] sm:$0xff] %v6291_v55  ;;  %8675 = vst [vmem:[#allocation218_spill] sm:$0xff] %v6293_v2 }
 0x292   :  { %1948 = vrot.lane.b32.xlu1 %v406_v25, %s4378_s26  ;;  %2458 = vrot.lane.b32.xlu0 %v533_v24, %s4380_s16  ;;  %v534_v25 = vld [vmem:[%s8454_s0 + $0xce] sm:$0xff] }
 0x293   :  { %v471_v24 = vld [vmem:[%s8454_s0 + $0xd5] sm:$0xff] }
 0x294   :  { %v6303_v39 = vpop.permute.xlu1 %1714  ;;  %v6305_v7 = vpop.permute.xlu0 %1712 }
 0x295   :  { %8676 = vst [vmem:[#allocation219_spill] sm:$0xff] %v6303_v39  ;;  %8677 = vst [vmem:[#allocation220_spill] sm:$0xff] %v6305_v7 }
 0x296   :  { %2204 = vrot.lane.b32.xlu1 %v470_v47, %s4379_s12  ;;  %1950 = vrot.lane.b32.xlu0 %v407_v59, %s4378_s26  ;;  %v408_v47 = vld [vmem:[%s8454_s0 + $0x104] sm:$0xff]  ;;  %v535_v59 = vld [vmem:[%s8454_s0 + $0xd6] sm:$0xff] }
 0x298   :  { %v6315_v55 = vpop.permute.xlu1 %1718  ;;  %v6317_v2 = vpop.permute.xlu0 %1716 }
 0x299   :  { %8678 = vst [vmem:[#allocation221_spill] sm:$0xff] %v6315_v55  ;;  %8679 = vst [vmem:[#allocation222_spill] sm:$0xff] %v6317_v2 }
 0x29a   :  { %2460 = vrot.lane.b32.xlu1 %v534_v25, %s4380_s16  ;;  %2206 = vrot.lane.b32.xlu0 %v471_v24, %s4379_s12  ;;  %v472_v25 = vld [vmem:[%s8454_s0 + $0x105] sm:$0xff] }
 0x29b   :  { %v409_v24 = vld [vmem:[%s8454_s0 + $0x10c] sm:$0xff] }
 0x29c   :  { %v6327_v39 = vpop.permute.xlu1 %1722  ;;  %v6329_v7 = vpop.permute.xlu0 %1720 }
 0x29d   :  { %8680 = vst [vmem:[#allocation223_spill] sm:$0xff] %v6327_v39  ;;  %8681 = vst [vmem:[#allocation224_spill] sm:$0xff] %v6329_v7 }
 0x29e   :  { %1952 = vrot.lane.b32.xlu1 %v408_v47, %s4378_s26  ;;  %2462 = vrot.lane.b32.xlu0 %v535_v59, %s4380_s16  ;;  %v536_v47 = vld [vmem:[%s8454_s0 + $0x106] sm:$0xff] }
 0x29f   :  { %v473_v59 = vld [vmem:[%s8454_s0 + $0x10d] sm:$0xff] }
 0x2a0   :  { %v6339_v55 = vpop.permute.xlu1 %1726  ;;  %v6341_v2 = vpop.permute.xlu0 %1724 }
 0x2a1   :  { %8682 = vst [vmem:[#allocation225_spill] sm:$0xff] %v6339_v55  ;;  %8683 = vst [vmem:[#allocation226_spill] sm:$0xff] %v6341_v2 }
 0x2a2   :  { %2208 = vrot.lane.b32.xlu1 %v472_v25, %s4379_s12  ;;  %1954 = vrot.lane.b32.xlu0 %v409_v24, %s4378_s26  ;;  %v410_v25 = vld [vmem:[%s8454_s0 + $0x13c] sm:$0xff]  ;;  %v537_v24 = vld [vmem:[%s8454_s0 + $0x10e] sm:$0xff] }
 0x2a4   :  { %v6351_v39 = vpop.permute.xlu1 %1730  ;;  %v6353_v7 = vpop.permute.xlu0 %1728 }
 0x2a5   :  { %8684 = vst [vmem:[#allocation227_spill] sm:$0xff] %v6351_v39  ;;  %8685 = vst [vmem:[#allocation228_spill] sm:$0xff] %v6353_v7 }
 0x2a6   :  { %2464 = vrot.lane.b32.xlu1 %v536_v47, %s4380_s16  ;;  %2210 = vrot.lane.b32.xlu0 %v473_v59, %s4379_s12  ;;  %v474_v47 = vld [vmem:[%s8454_s0 + $0x13d] sm:$0xff] }
 0x2a7   :  { %v411_v59 = vld [vmem:[%s8454_s0 + $0x144] sm:$0xff] }
 0x2a8   :  { %v6363_v55 = vpop.permute.xlu1 %1734  ;;  %v6365_v2 = vpop.permute.xlu0 %1732 }
 0x2a9   :  { %8686 = vst [vmem:[#allocation229_spill] sm:$0xff] %v6363_v55  ;;  %8687 = vst [vmem:[#allocation230_spill] sm:$0xff] %v6365_v2 }
 0x2aa   :  { %1956 = vrot.lane.b32.xlu1 %v410_v25, %s4378_s26  ;;  %2466 = vrot.lane.b32.xlu0 %v537_v24, %s4380_s16  ;;  %v538_v25 = vld [vmem:[%s8454_s0 + $0x13e] sm:$0xff] }
 0x2ab   :  { %v475_v24 = vld [vmem:[%s8454_s0 + $0x145] sm:$0xff] }
 0x2ac   :  { %v6375_v39 = vpop.permute.xlu1 %1738  ;;  %v6377_v7 = vpop.permute.xlu0 %1736 }
 0x2ad   :  { %8688 = vst [vmem:[#allocation231_spill] sm:$0xff] %v6375_v39  ;;  %8689 = vst [vmem:[#allocation232_spill] sm:$0xff] %v6377_v7 }
 0x2ae   :  { %2212 = vrot.lane.b32.xlu1 %v474_v47, %s4379_s12  ;;  %1958 = vrot.lane.b32.xlu0 %v411_v59, %s4378_s26  ;;  %v412_v47 = vld [vmem:[%s8454_s0 + $0x174] sm:$0xff]  ;;  %v539_v59 = vld [vmem:[%s8454_s0 + $0x146] sm:$0xff] }
 0x2b0   :  { %v6387_v55 = vpop.permute.xlu1 %1742  ;;  %v6389_v2 = vpop.permute.xlu0 %1740 }
 0x2b1   :  { %8690 = vst [vmem:[#allocation233_spill] sm:$0xff] %v6387_v55  ;;  %8691 = vst [vmem:[#allocation234_spill] sm:$0xff] %v6389_v2 }
 0x2b2   :  { %2468 = vrot.lane.b32.xlu1 %v538_v25, %s4380_s16  ;;  %2214 = vrot.lane.b32.xlu0 %v475_v24, %s4379_s12  ;;  %v476_v25 = vld [vmem:[%s8454_s0 + $0x175] sm:$0xff] }
 0x2b3   :  { %v413_v24 = vld [vmem:[%s8454_s0 + $0x17c] sm:$0xff] }
 0x2b4   :  { %v6399_v39 = vpop.permute.xlu1 %1746  ;;  %v6401_v7 = vpop.permute.xlu0 %1744 }
 0x2b5   :  { %8692 = vst [vmem:[#allocation235_spill] sm:$0xff] %v6399_v39  ;;  %8693 = vst [vmem:[#allocation236_spill] sm:$0xff] %v6401_v7 }
 0x2b6   :  { %1960 = vrot.lane.b32.xlu1 %v412_v47, %s4378_s26  ;;  %2470 = vrot.lane.b32.xlu0 %v539_v59, %s4380_s16  ;;  %v540_v47 = vld [vmem:[%s8454_s0 + $0x176] sm:$0xff] }
 0x2b7   :  { %v477_v59 = vld [vmem:[%s8454_s0 + $0x17d] sm:$0xff] }
 0x2b8   :  { %v6411_v55 = vpop.permute.xlu1 %1750  ;;  %v6413_v2 = vpop.permute.xlu0 %1748 }
 0x2b9   :  { %8694 = vst [vmem:[#allocation237_spill] sm:$0xff] %v6411_v55  ;;  %8695 = vst [vmem:[#allocation238_spill] sm:$0xff] %v6413_v2 }
 0x2ba   :  { %2216 = vrot.lane.b32.xlu1 %v476_v25, %s4379_s12  ;;  %1962 = vrot.lane.b32.xlu0 %v413_v24, %s4378_s26  ;;  %v414_v25 = vld [vmem:[%s8454_s0 + $0x1ac] sm:$0xff]  ;;  %v541_v24 = vld [vmem:[%s8454_s0 + $0x17e] sm:$0xff] }
 0x2bc   :  { %v6423_v39 = vpop.permute.xlu1 %1754  ;;  %v6425_v7 = vpop.permute.xlu0 %1752 }
 0x2bd   :  { %8696 = vst [vmem:[#allocation239_spill] sm:$0xff] %v6423_v39  ;;  %8697 = vst [vmem:[#allocation240_spill] sm:$0xff] %v6425_v7 }
 0x2be   :  { %2472 = vrot.lane.b32.xlu1 %v540_v47, %s4380_s16  ;;  %2218 = vrot.lane.b32.xlu0 %v477_v59, %s4379_s12  ;;  %v478_v47 = vld [vmem:[%s8454_s0 + $0x1ad] sm:$0xff] }
 0x2bf   :  { %v415_v59 = vld [vmem:[%s8454_s0 + $0x1b4] sm:$0xff] }
 0x2c0   :  { %v6435_v55 = vpop.permute.xlu1 %1758  ;;  %v6437_v2 = vpop.permute.xlu0 %1756 }
 0x2c1   :  { %8698 = vst [vmem:[#allocation241_spill] sm:$0xff] %v6435_v55  ;;  %8699 = vst [vmem:[#allocation242_spill] sm:$0xff] %v6437_v2 }
 0x2c2   :  { %1964 = vrot.lane.b32.xlu1 %v414_v25, %s4378_s26  ;;  %2474 = vrot.lane.b32.xlu0 %v541_v24, %s4380_s16  ;;  %v542_v25 = vld [vmem:[%s8454_s0 + $0x1ae] sm:$0xff] }
 0x2c3   :  { %v479_v24 = vld [vmem:[%s8454_s0 + $0x1b5] sm:$0xff] }
 0x2c4   :  { %v6447_v39 = vpop.permute.xlu1 %1762  ;;  %v6449_v7 = vpop.permute.xlu0 %1760 }
 0x2c5   :  { %8700 = vst [vmem:[#allocation243_spill] sm:$0xff] %v6447_v39  ;;  %8701 = vst [vmem:[#allocation244_spill] sm:$0xff] %v6449_v7 }
 0x2c6   :  { %2220 = vrot.lane.b32.xlu1 %v478_v47, %s4379_s12  ;;  %1966 = vrot.lane.b32.xlu0 %v415_v59, %s4378_s26  ;;  %v416_v47 = vld [vmem:[%s8454_s0 + $0x1e4] sm:$0xff]  ;;  %v543_v59 = vld [vmem:[%s8454_s0 + $0x1b6] sm:$0xff] }
 0x2c8   :  { %v6459_v55 = vpop.permute.xlu1 %1766  ;;  %v6461_v2 = vpop.permute.xlu0 %1764 }
 0x2c9   :  { %8702 = vst [vmem:[#allocation245_spill] sm:$0xff] %v6459_v55  ;;  %8703 = vst [vmem:[#allocation246_spill] sm:$0xff] %v6461_v2 }
 0x2ca   :  { %2476 = vrot.lane.b32.xlu1 %v542_v25, %s4380_s16  ;;  %2222 = vrot.lane.b32.xlu0 %v479_v24, %s4379_s12  ;;  %v480_v25 = vld [vmem:[%s8454_s0 + $0x1e5] sm:$0xff] }
 0x2cb   :  { %v417_v24 = vld [vmem:[%s8454_s0 + $0x1ec] sm:$0xff] }
 0x2cc   :  { %v6471_v39 = vpop.permute.xlu1 %1770  ;;  %v6473_v7 = vpop.permute.xlu0 %1768 }
 0x2cd   :  { %8704 = vst [vmem:[#allocation247_spill] sm:$0xff] %v6471_v39  ;;  %8705 = vst [vmem:[#allocation248_spill] sm:$0xff] %v6473_v7 }
 0x2ce   :  { %1968 = vrot.lane.b32.xlu1 %v416_v47, %s4378_s26  ;;  %2478 = vrot.lane.b32.xlu0 %v543_v59, %s4380_s16  ;;  %v544_v47 = vld [vmem:[%s8454_s0 + $0x1e6] sm:$0xff] }
 0x2cf   :  { %v481_v59 = vld [vmem:[%s8454_s0 + $0x1ed] sm:$0xff] }
 0x2d0   :  { %v6483_v55 = vpop.permute.xlu1 %1774  ;;  %v6485_v2 = vpop.permute.xlu0 %1772 }
 0x2d1   :  { %8706 = vst [vmem:[#allocation249_spill] sm:$0xff] %v6483_v55  ;;  %8707 = vst [vmem:[#allocation250_spill] sm:$0xff] %v6485_v2 }
 0x2d2   :  { %2224 = vrot.lane.b32.xlu1 %v480_v25, %s4379_s12  ;;  %1970 = vrot.lane.b32.xlu0 %v417_v24, %s4378_s26  ;;  %v418_v25 = vld [vmem:[%s8454_s0 + $0x21c] sm:$0xff]  ;;  %v545_v24 = vld [vmem:[%s8454_s0 + $0x1ee] sm:$0xff] }
 0x2d4   :  { %v6495_v39 = vpop.permute.xlu1 %1778  ;;  %v6497_v7 = vpop.permute.xlu0 %1776 }
 0x2d5   :  { %8708 = vst [vmem:[#allocation251_spill] sm:$0xff] %v6495_v39  ;;  %8709 = vst [vmem:[#allocation252_spill] sm:$0xff] %v6497_v7 }
 0x2d6   :  { %2480 = vrot.lane.b32.xlu1 %v544_v47, %s4380_s16  ;;  %2226 = vrot.lane.b32.xlu0 %v481_v59, %s4379_s12  ;;  %v482_v47 = vld [vmem:[%s8454_s0 + $0x21d] sm:$0xff] }
 0x2d7   :  { %v419_v59 = vld [vmem:[%s8454_s0 + $0x224] sm:$0xff] }
 0x2d8   :  { %v6507_v55 = vpop.permute.xlu1 %1782  ;;  %v6509_v2 = vpop.permute.xlu0 %1780 }
 0x2d9   :  { %8710 = vst [vmem:[#allocation253_spill] sm:$0xff] %v6507_v55  ;;  %8711 = vst [vmem:[#allocation254_spill] sm:$0xff] %v6509_v2  ;;  %v483_v55 = vld [vmem:[%s8454_s0 + $0x225] sm:$0xff] }
 0x2da   :  { %1972 = vrot.lane.b32.xlu1 %v418_v25, %s4378_s26  ;;  %2482 = vrot.lane.b32.xlu0 %v545_v24, %s4380_s16  ;;  %v16_v25 = vld [vmem:[%s8454_s0] sm:$0xff] }
 0x2db   :  { %v546_v24 = vld [vmem:[%s8454_s0 + $0x21e] sm:$0xff] }
 0x2dc   :  { %v6519_v39 = vpop.permute.xlu1 %1786  ;;  %v6521_v7 = vpop.permute.xlu0 %1784 }
 0x2dd   :  { %8712 = vst [vmem:[#allocation255_spill] sm:$0xff] %v6519_v39  ;;  %8713 = vst [vmem:[#allocation256_spill] sm:$0xff] %v6521_v7 }
 0x2de   :  { %2228 = vrot.lane.b32.xlu1 %v482_v47, %s4379_s12  ;;  %1974 = vrot.lane.b32.xlu0 %v419_v59, %s4378_s26  ;;  %v2641_v47 = vsel %vm2640_vm0, %v16_v25, %v4646_v61  ;;  %v17_v59 = vld [vmem:[%s8454_s0 + $0x8] sm:$0xff] }
 0x2df   :  { %v2706_v2 = vsel %vm2705_vm1, %v2641_v47, %v5030_v11  ;;  %v547_v61 = vld [vmem:[%s8454_s0 + $0x226] sm:$0xff]  ;;  %v2642_v11 = vsel %vm2640_vm0, %v17_v59, %v4658_v1  ;;  %v421_v1 = vld [vmem:[%s8454_s0 + $0x25c] sm:$0xff] }
 0x2e0   :  { %v1937_v39 = vpop.permute.xlu1 %1936  ;;  %v6534_v7 = vpop.permute.xlu0 %1788  ;;  %v2771_v25 = vsel %vm2770_vm2, %v2706_v2, %v5414_v57  ;;  %v2707_v57 = vsel %vm2705_vm1, %v2642_v11, %v5028_v10 }
 0x2e1   :  { %8714 = vst [vmem:[#allocation257_spill] sm:$0xff] %v6534_v7  ;;  %v420_v7 = vld [vmem:[%s8454_s0 + $0x254] sm:$0xff]  ;;  %v2836_v21 = vsel %vm2835_vm3, %v2771_v25, %v5798_v32 }
 0x2e2   :  { %2484 = vrot.lane.b32.xlu1 %v546_v24, %s4380_s16  ;;  %2230 = vrot.lane.b32.xlu0 %v483_v55, %s4379_s12  ;;  %v2901_v47 = vsel %vm2900_vm4, %v2836_v21, %v6209_v27  ;;  %v484_v32 = vld [vmem:[%s8454_s0 + $0x255] sm:$0xff]  ;;  %v2772_v21 = vsel %vm2770_vm2, %v2707_v57, %v5412_v56 }
 0x2e3   :  { %v2966_v2 = vsel %vm2965_vm5, %v2901_v47, %v1937_v39  ;;  %v2837_v10 = vsel %vm2835_vm3, %v2772_v21, %v5796_v30  ;;  %v18_v56 = vld [vmem:[%s8454_s0 + $0x38] sm:$0xff] }
 0x2e4   :  { %v2193_v55 = vpop.permute.xlu1 %2192  ;;  %v1939_v24 = vpop.permute.xlu0 %1938  ;;  %v548_v30 = vld [vmem:[%s8454_s0 + $0x256] sm:$0xff] }
 0x2e6   :  { %1976 = vrot.lane.b32.xlu1 %v420_v7, %s4378_s26  ;;  %2486 = vrot.lane.b32.xlu0 %v547_v61, %s4380_s16  ;;  %v3031_v7 = vsel %vm3030_vm6, %v2966_v2, %v2193_v55  ;;  %v2902_v61 = vsel %vm2900_vm4, %v2837_v10, %v6207_v58  ;;  %v485_v58 = vld [vmem:[%s8454_s0 + $0x25d] sm:$0xff]  ;;  %v2643_v2 = vsel %vm2640_vm0, %v18_v56, %v4644_v60 }
 0x2e7   :  { %v2967_v25 = vsel %vm2965_vm5, %v2902_v61, %v1939_v24  ;;  %v19_v24 = vld [vmem:[%s8454_s0 + $0x40] sm:$0xff]  ;;  %v486_v61 = vld [vmem:[%s8454_s0 + $0x28d] sm:$0xff] }
 0x2e8   :  { %v2449_v27 = vpop.permute.xlu1 %2448  ;;  %v2195_v59 = vpop.permute.xlu0 %2194  ;;  %v549_v60 = vld [vmem:[%s8454_s0 + $0x25e] sm:$0xff] }
 0x2e9   :  { %v3096_v39 = vsel %vm3095_vm7, %v3031_v7, %v2449_v27  ;;  %v3032_v55 = vsel %vm3030_vm6, %v2967_v25, %v2195_v59 }
 0x2ea   :  { %2232 = vrot.lane.b32.xlu1 %v484_v32, %s4379_s12  ;;  %1978 = vrot.lane.b32.xlu0 %v421_v1, %s4378_s26  ;;  %v2708_v32 = vsel %vm2705_vm1, %v2643_v2, %v5042_v42  ;;  %v422_v1 = vld [vmem:[%s8454_s0 + $0x28c] sm:$0xff]  ;;  %v2644_v42 = vsel %vm2640_vm0, %v19_v24, %v4656_v0  ;;  %v423_v0 = vld [vmem:[%s8454_s0 + $0x294] sm:$0xff] }
 0x2eb   :  { %4250 = vmatprep.mubr.msk.f32.mxu0 %vm3176_vm8, %v3096_v39  ;;  %v2773_v21 = vsel %vm2770_vm2, %v2708_v32, %v5426_v52  ;;  %v2709_v39 = vsel %vm2705_vm1, %v2644_v42, %v5040_v43  ;;  %v21_v32 = vld [vmem:[%s8454_s0 + $0x78] sm:$0xff] }
 0x2ec   :  { %v1941_v11 = vpop.permute.xlu1 %1940  ;;  %v2451_v47 = vpop.permute.xlu0 %2450  ;;  %v2838_v59 = vsel %vm2835_vm3, %v2773_v21, %v5810_v23  ;;  %v2774_v23 = vsel %vm2770_vm2, %v2709_v39, %v5424_v53  ;;  %v20_v53 = vld [vmem:[%s8454_s0 + $0x70] sm:$0xff]  ;;  %v488_v39 = vld [vmem:[%s8454_s0 + $0x2c5] sm:$0xff] }
 0x2ed   :  { %v3097_v57 = vsel %vm3095_vm7, %v3032_v55, %v2451_v47  ;;  %v2903_v10 = vsel %vm2900_vm4, %v2838_v59, %v6221_v26  ;;  %v2839_v43 = vsel %vm2835_vm3, %v2774_v23, %v5808_v37  ;;  %v550_v37 = vld [vmem:[%s8454_s0 + $0x28e] sm:$0xff]  ;;  %v2645_v24 = vsel %vm2640_vm0, %v20_v53, %v4670_v5  ;;  %v551_v5 = vld [vmem:[%s8454_s0 + $0x296] sm:$0xff] }
 0x2ee   :  { %2488 = vrot.lane.b32.xlu1 %v548_v30, %s4380_s16  ;;  %2234 = vrot.lane.b32.xlu0 %v485_v58, %s4379_s12  ;;  %v2968_v52 = vsel %vm2965_vm5, %v2903_v10, %v1941_v11  ;;  %v2904_v58 = vsel %vm2900_vm4, %v2839_v43, %v6219_v41  ;;  %v487_v41 = vld [vmem:[%s8454_s0 + $0x295] sm:$0xff] }
 0x2ef   :  { %4251 = vmatmul.mubr.msk.f32.vlgmr.msra.gmra.mxu0 %vm3176_vm8, %v3097_v57  ;;  %v23_v53 = vld [vmem:[%s8454_s0 + $0xb0] sm:$0xff] }
 0x2f0   :  { %v2197_v7 = vpop.permute.xlu1 %2196  ;;  %v1943_v27 = vpop.permute.xlu0 %1942 }
 0x2f1   :  { %v3033_v26 = vsel %vm3030_vm6, %v2968_v52, %v2197_v7  ;;  %v2969_v55 = vsel %vm2965_vm5, %v2904_v58, %v1943_v27 }
 0x2f2   :  { %1980 = vrot.lane.b32.xlu1 %v422_v1, %s4378_s26  ;;  %2490 = vrot.lane.b32.xlu0 %v549_v60, %s4380_s16  ;;  %v2710_v1 = vsel %vm2705_vm1, %v2645_v24, %v5054_v51  ;;  %v424_v60 = vld [vmem:[%s8454_s0 + $0x2c4] sm:$0xff]  ;;  %v2646_v51 = vsel %vm2640_vm0, %v21_v32, %v4668_v4  ;;  %v425_v4 = vld [vmem:[%s8454_s0 + $0x2cc] sm:$0xff] }
 0x2f3   :  { %v2775_v21 = vsel %vm2770_vm2, %v2710_v1, %v5438_v48  ;;  %v2711_v10 = vsel %vm2705_vm1, %v2646_v51, %v5052_v50  ;;  %v490_v32 = vld [vmem:[%s8454_s0 + $0x2fd] sm:$0xff] }
 0x2f4   :  { %v2453_v56 = vpop.permute.xlu1 %2452  ;;  %v2199_v25 = vpop.permute.xlu0 %2198  ;;  %v2840_v59 = vsel %vm2835_vm3, %v2775_v21, %v5822_v33  ;;  %v2776_v33 = vsel %vm2770_vm2, %v2711_v10, %v5436_v62  ;;  %v22_v62 = vld [vmem:[%s8454_s0 + $0xa8] sm:$0xff] }
 0x2f5   :  { %v3098_v30 = vsel %vm3095_vm7, %v3033_v26, %v2453_v56  ;;  %v3034_v11 = vsel %vm3030_vm6, %v2969_v55, %v2199_v25  ;;  %v2905_v42 = vsel %vm2900_vm4, %v2840_v59, %v6233_v14  ;;  %v2841_v50 = vsel %vm2835_vm3, %v2776_v33, %v5820_v31  ;;  %v552_v31 = vld [vmem:[%s8454_s0 + $0x2c6] sm:$0xff] }
 0x2f6   :  { %2236 = vrot.lane.b32.xlu1 %v486_v61, %s4379_s12  ;;  %1982 = vrot.lane.b32.xlu0 %v423_v0, %s4378_s26  ;;  %v2906_v23 = vsel %vm2900_vm4, %v2841_v50, %v6231_v15  ;;  %v489_v15 = vld [vmem:[%s8454_s0 + $0x2cd] sm:$0xff]  ;;  %v2647_v58 = vsel %vm2640_vm0, %v22_v62, %v4682_v9 }
 0x2f7   :  { %4253 = vmatprep.mubr.msk.f32.mxu0 %vm3176_vm8, %v3098_v30  ;;  %v2712_v55 = vsel %vm2705_vm1, %v2647_v58, %v5066_v35  ;;  %v553_v9 = vld [vmem:[%s8454_s0 + $0x2ce] sm:$0xff]  ;;  %v2648_v35 = vsel %vm2640_vm0, %v23_v53, %v4680_v8  ;;  %v427_v8 = vld [vmem:[%s8454_s0 + $0x304] sm:$0xff] }
 0x2f8   :  { %v1945_v47 = vpop.permute.xlu1 %1944  ;;  %v2455_v57 = vpop.permute.xlu0 %2454  ;;  %v2713_v24 = vsel %vm2705_vm1, %v2648_v35, %v5064_v34  ;;  %v8715_v35 = vld [vmem:[#allocation214_spill] sm:$0xff] }
 0x2f9   :  { %v3099_v2 = vsel %vm3095_vm7, %v3034_v11, %v2455_v57  ;;  %v2970_v48 = vsel %vm2965_vm5, %v2905_v42, %v1945_v47 }
 0x2fa   :  { %2492 = vrot.lane.b32.xlu1 %v550_v37, %s4380_s16  ;;  %2238 = vrot.lane.b32.xlu0 %v487_v41, %s4379_s12  ;;  %v426_v37 = vld [vmem:[%s8454_s0 + $0x2fc] sm:$0xff]  ;;  %v2777_v41 = vsel %vm2770_vm2, %v2712_v55, %v5450_v49 }
 0x2fb   :  { %4254 = vmatmul.mubr.msk.f32.gmra.mxu0 %vm3176_vm8, %v3099_v2  ;;  %v2842_v57 = vsel %vm2835_vm3, %v2777_v41, %v5834_v38  ;;  %v27_v55 = vld [vmem:[%s8454_s0 + $0x120] sm:$0xff] }
 0x2fc   :  { %v2201_v7 = vpop.permute.xlu1 %2200  ;;  %v1947_v27 = vpop.permute.xlu0 %1946  ;;  %v2907_v2 = vsel %vm2900_vm4, %v2842_v57, %v6245_v20  ;;  %v2778_v20 = vsel %vm2770_vm2, %v2713_v24, %v5448_v63  ;;  %v24_v63 = vld [vmem:[%s8454_s0 + $0xe0] sm:$0xff] }
 0x2fd   :  { %v3035_v14 = vsel %vm3030_vm6, %v2970_v48, %v2201_v7  ;;  %v2971_v26 = vsel %vm2965_vm5, %v2906_v23, %v1947_v27  ;;  %v2843_v34 = vsel %vm2835_vm3, %v2778_v20, %v5832_v22  ;;  %v554_v22 = vld [vmem:[%s8454_s0 + $0x2fe] sm:$0xff]  ;;  %v2649_v10 = vsel %vm2640_vm0, %v24_v63, %v4694_v13  ;;  %v25_v48 = vld [vmem:[%s8454_s0 + $0xe8] sm:$0xff]  ;;  %v492_v23 = vld [vmem:[%s8454_s0 + $0x335] sm:$0xff] }
 0x2fe   :  { %1984 = vrot.lane.b32.xlu1 %v424_v60, %s4378_s26  ;;  %2494 = vrot.lane.b32.xlu0 %v551_v5, %s4380_s16  ;;  %v2908_v21 = vsel %vm2900_vm4, %v2843_v34, %v6243_v54  ;;  %v491_v54 = vld [vmem:[%s8454_s0 + $0x305] sm:$0xff] }
 0x2ff   :  { %v555_v13 = vld [vmem:[%s8454_s0 + $0x306] sm:$0xff] }
 0x300   :  { %v2457_v52 = vpop.permute.xlu1 %2456  ;;  %v2203_v61 = vpop.permute.xlu0 %2202  ;;  %v8716_v24 = vld [vmem:[#allocation54_spill] sm:$0xff] }
 0x301   :  { %v3100_v0 = vsel %vm3095_vm7, %v3035_v14, %v2457_v52  ;;  %v3036_v56 = vsel %vm3030_vm6, %v2971_v26, %v2203_v61 }
 0x302   :  { %2240 = vrot.lane.b32.xlu1 %v488_v39, %s4379_s12  ;;  %1986 = vrot.lane.b32.xlu0 %v425_v4, %s4378_s26  ;;  %v2714_v39 = vsel %vm2705_vm1, %v2649_v10, %v5078_v19  ;;  %v428_v4 = vld [vmem:[%s8454_s0 + $0x334] sm:$0xff]  ;;  %v2650_v19 = vsel %vm2640_vm0, %v25_v48, %v4692_v12  ;;  %v429_v12 = vld [vmem:[%s8454_s0 + $0x33c] sm:$0xff]  ;;  %v8720_v48 = vld [vmem:[#allocation3_spill] sm:$0xff] }
 0x303   :  { %4256 = vmatprep.mubr.msk.f32.mxu0 %vm3176_vm8, %v3100_v0  ;;  %v2779_v33 = vsel %vm2770_vm2, %v2714_v39, %v5462_v44  ;;  %v2715_v0 = vsel %vm2705_vm1, %v2650_v19, %v5076_v18 }
 0x304   :  { %v1949_v25 = vpop.permute.xlu1 %1948  ;;  %v2459_v43 = vpop.permute.xlu0 %2458  ;;  %v2844_v61 = vsel %vm2835_vm3, %v2779_v33, %v5846_v36  ;;  %v2780_v36 = vsel %vm2770_vm2, %v2715_v0, %v5460_v6  ;;  %v26_v6 = vld [vmem:[%s8454_s0 + $0x118] sm:$0xff] }
 0x305   :  { %v3101_v30 = vsel %vm3095_vm7, %v3036_v56, %v2459_v43  ;;  %v2972_v49 = vsel %vm2965_vm5, %v2907_v2, %v1949_v25  ;;  %v2909_v50 = vsel %vm2900_vm4, %v2844_v61, %v6257_v40  ;;  %v2845_v18 = vsel %vm2835_vm3, %v2780_v36, %v5844_v28  ;;  %v556_v28 = vld [vmem:[%s8454_s0 + $0x336] sm:$0xff] }
 0x306   :  { %2496 = vrot.lane.b32.xlu1 %v552_v31, %s4380_s16  ;;  %2242 = vrot.lane.b32.xlu0 %v489_v15, %s4379_s12  ;;  %v2910_v15 = vsel %vm2900_vm4, %v2845_v18, %v6255_v46  ;;  %v493_v46 = vld [vmem:[%s8454_s0 + $0x33d] sm:$0xff]  ;;  %v2651_v53 = vsel %vm2640_vm0, %v26_v6, %v4706_v17  ;;  %v433_v6 = vld [vmem:[%s8454_s0 + $0x3ac] sm:$0xff] }
 0x307   :  { %4257 = vmatmul.mubr.msk.f32.gmra.mxu0 %vm3176_vm8, %v3101_v30  ;;  %v557_v17 = vld [vmem:[%s8454_s0 + $0x33e] sm:$0xff] }
 0x308   :  { %v2205_v11 = vpop.permute.xlu1 %2204  ;;  %v1951_v47 = vpop.permute.xlu0 %1950  ;;  %v8722_v61 = vld [vmem:[#allocation109_spill] sm:$0xff] }
 0x309   :  { %v3037_v38 = vsel %vm3030_vm6, %v2972_v49, %v2205_v11  ;;  %v2973_v7 = vsel %vm2965_vm5, %v2908_v21, %v1951_v47  ;;  %v8719_v21 = vld [vmem:[#allocation213_spill] sm:$0xff] }
 0x30a   :  { %1988 = vrot.lane.b32.xlu1 %v426_v37, %s4378_s26  ;;  %2498 = vrot.lane.b32.xlu0 %v553_v9, %s4380_s16  ;;  %v2716_v37 = vsel %vm2705_vm1, %v2651_v53, %v5090_v3  ;;  %v430_v9 = vld [vmem:[%s8454_s0 + $0x36c] sm:$0xff]  ;;  %v2652_v3 = vsel %vm2640_vm0, %v27_v55, %v4704_v16  ;;  %v431_v16 = vld [vmem:[%s8454_s0 + $0x374] sm:$0xff] }
 0x30b   :  { %v2781_v41 = vsel %vm2770_vm2, %v2716_v37, %v5474_v45  ;;  %v2717_v49 = vsel %vm2705_vm1, %v2652_v3, %v8716_v24  ;;  %v8729_v55 = vld [vmem:[#allocation215_spill] sm:$0xff] }
 0x30c   :  { %v2461_v1 = vpop.permute.xlu1 %2460  ;;  %v2207_v60 = vpop.permute.xlu0 %2206  ;;  %v2846_v57 = vsel %vm2835_vm3, %v2781_v41, %v5858_v29  ;;  %v8717_v29 = vld [vmem:[#allocation107_spill] sm:$0xff] }
 0x30d   :  { %v3102_v5 = vsel %vm3095_vm7, %v3037_v38, %v2461_v1  ;;  %v3038_v27 = vsel %vm3030_vm6, %v2973_v7, %v2207_v60  ;;  %v2911_v2 = vsel %vm2900_vm4, %v2846_v57, %v8715_v35  ;;  %v8718_v60 = vld [vmem:[#allocation160_spill] sm:$0xff]  ;;  %v560_v41 = vld [vmem:[%s8454_s0 + $0x3a6] sm:$0xff] }
 0x30e   :  { %2244 = vrot.lane.b32.xlu1 %v490_v32, %s4379_s12  ;;  %1990 = vrot.lane.b32.xlu0 %v427_v8, %s4378_s26  ;;  %v494_v32 = vld [vmem:[%s8454_s0 + $0x36d] sm:$0xff]  ;;  %v2782_v8 = vsel %vm2770_vm2, %v2717_v49, %v8717_v29 }
 0x30f   :  { %4259 = vmatprep.mubr.msk.f32.mxu0 %vm3176_vm8, %v3102_v5  ;;  %v2847_v34 = vsel %vm2835_vm3, %v2782_v8, %v8718_v60  ;;  %v28_v7 = vld [vmem:[%s8454_s0 + $0x150] sm:$0xff]  ;;  %v8732_v8 = vld [vmem:[#allocation111_spill] sm:$0xff] }
 0x310   :  { %v1953_v59 = vpop.permute.xlu1 %1952  ;;  %v2463_v51 = vpop.permute.xlu0 %2462  ;;  %v2912_v63 = vsel %vm2900_vm4, %v2847_v34, %v8719_v21  ;;  %v2653_v39 = vsel %vm2640_vm0, %v28_v7, %v8720_v48  ;;  %v31_v49 = vld [vmem:[%s8454_s0 + $0x190] sm:$0xff] }
 0x311   :  { %v3103_v42 = vsel %vm3095_vm7, %v3038_v27, %v2463_v51  ;;  %v2974_v44 = vsel %vm2965_vm5, %v2909_v50, %v1953_v59  ;;  %v495_v27 = vld [vmem:[%s8454_s0 + $0x375] sm:$0xff] }
 0x312   :  { %2500 = vrot.lane.b32.xlu1 %v554_v22, %s4380_s16  ;;  %2246 = vrot.lane.b32.xlu0 %v491_v54, %s4379_s12  ;;  %v558_v54 = vld [vmem:[%s8454_s0 + $0x36e] sm:$0xff] }
 0x313   :  { %4260 = vmatmul.mubr.msk.f32.gmra.mxu0 %vm3176_vm8, %v3103_v42  ;;  %v561_v29 = vld [vmem:[%s8454_s0 + $0x3ae] sm:$0xff] }
 0x314   :  { %v2209_v14 = vpop.permute.xlu1 %2208  ;;  %v1955_v52 = vpop.permute.xlu0 %1954  ;;  %v8733_v60 = vld [vmem:[#allocation164_spill] sm:$0xff] }
 0x315   :  { %v3039_v40 = vsel %vm3030_vm6, %v2974_v44, %v2209_v14  ;;  %v2975_v56 = vsel %vm2965_vm5, %v2910_v15, %v1955_v52  ;;  %v432_v14 = vld [vmem:[%s8454_s0 + $0x3a4] sm:$0xff]  ;;  %v559_v52 = vld [vmem:[%s8454_s0 + $0x376] sm:$0xff] }
 0x316   :  { %1992 = vrot.lane.b32.xlu1 %v428_v4, %s4378_s26  ;;  %2502 = vrot.lane.b32.xlu0 %v555_v13, %s4380_s16  ;;  %v29_v4 = vld [vmem:[%s8454_s0 + $0x158] sm:$0xff]  ;;  %v8721_v13 = vld [vmem:[#allocation56_spill] sm:$0xff]  ;;  %v8723_v44 = vld [vmem:[#allocation162_spill] sm:$0xff] }
 0x317   :  { %v2718_v33 = vsel %vm2705_vm1, %v2653_v39, %v8721_v13  ;;  %v496_v15 = vld [vmem:[%s8454_s0 + $0x3a5] sm:$0xff] }
 0x318   :  { %v2465_v62 = vpop.permute.xlu1 %2464  ;;  %v2211_v26 = vpop.permute.xlu0 %2210  ;;  %v2783_v19 = vsel %vm2770_vm2, %v2718_v33, %v8722_v61  ;;  %v8738_v13 = vld [vmem:[#allocation163_spill] sm:$0xff] }
 0x319   :  { %v3104_v31 = vsel %vm3095_vm7, %v3039_v40, %v2465_v62  ;;  %v3040_v25 = vsel %vm3030_vm6, %v2975_v56, %v2211_v26  ;;  %v8725_v40 = vld [vmem:[#allocation216_spill] sm:$0xff]  ;;  %v8726_v26 = vld [vmem:[#allocation55_spill] sm:$0xff] }
 0x31a   :  { %2248 = vrot.lane.b32.xlu1 %v492_v23, %s4379_s12  ;;  %1994 = vrot.lane.b32.xlu0 %v429_v12, %s4378_s26  ;;  %v2848_v23 = vsel %vm2835_vm3, %v2783_v19, %v8723_v44  ;;  %v8724_v12 = vld [vmem:[#allocation2_spill] sm:$0xff]  ;;  %v8727_v56 = vld [vmem:[#allocation108_spill] sm:$0xff] }
 0x31b   :  { %4262 = vmatprep.mubr.msk.f32.mxu0 %vm3176_vm8, %v3104_v31  ;;  %v2654_v36 = vsel %vm2640_vm0, %v29_v4, %v8724_v12  ;;  %v2913_v62 = vsel %vm2900_vm4, %v2848_v23, %v8725_v40  ;;  %v32_v19 = vld [vmem:[%s8454_s0 + $0x1c0] sm:$0xff] }
 0x31c   :  { %v1957_v43 = vpop.permute.xlu1 %1956  ;;  %v2467_v30 = vpop.permute.xlu0 %2466  ;;  %v2719_v18 = vsel %vm2705_vm1, %v2654_v36, %v8726_v26  ;;  %v499_v44 = vld [vmem:[%s8454_s0 + $0x3e5] sm:$0xff] }
 0x31d   :  { %v3105_v58 = vsel %vm3095_vm7, %v3040_v25, %v2467_v30  ;;  %v2976_v45 = vsel %vm2965_vm5, %v2911_v2, %v1957_v43  ;;  %v8728_v30 = vld [vmem:[#allocation161_spill] sm:$0xff] }
 0x31e   :  { %2504 = vrot.lane.b32.xlu1 %v556_v28, %s4380_s16  ;;  %2250 = vrot.lane.b32.xlu0 %v493_v46, %s4379_s12  ;;  %v2784_v28 = vsel %vm2770_vm2, %v2719_v18, %v8727_v56  ;;  %v8730_v2 = vld [vmem:[#allocation5_spill] sm:$0xff]  ;;  %v33_v18 = vld [vmem:[%s8454_s0 + $0x1c8] sm:$0xff] }
 0x31f   :  { %4263 = vmatmul.mubr.msk.f32.gmra.mxu0 %vm3176_vm8, %v3105_v58  ;;  %v2849_v58 = vsel %vm2835_vm3, %v2784_v28, %v8728_v30  ;;  %v563_v56 = vld [vmem:[%s8454_s0 + $0x3e6] sm:$0xff]  ;;  %v8742_v28 = vld [vmem:[#allocation113_spill] sm:$0xff] }
 0x320   :  { %v2213_v11 = vpop.permute.xlu1 %2212  ;;  %v1959_v47 = vpop.permute.xlu0 %1958  ;;  %v2914_v37 = vsel %vm2900_vm4, %v2849_v58, %v8729_v55  ;;  %v8743_v30 = vld [vmem:[#allocation166_spill] sm:$0xff] }
 0x321   :  { %v3041_v20 = vsel %vm3030_vm6, %v2976_v45, %v2213_v11  ;;  %v2977_v22 = vsel %vm2965_vm5, %v2912_v63, %v1959_v47  ;;  %v497_v11 = vld [vmem:[%s8454_s0 + $0x3ad] sm:$0xff]  ;;  %v8731_v45 = vld [vmem:[#allocation58_spill] sm:$0xff] }
 0x322   :  { %1996 = vrot.lane.b32.xlu1 %v430_v9, %s4378_s26  ;;  %2506 = vrot.lane.b32.xlu0 %v557_v17, %s4380_s16  ;;  %v30_v9 = vld [vmem:[%s8454_s0 + $0x188] sm:$0xff]  ;;  %v8735_v63 = vld [vmem:[#allocation218_spill] sm:$0xff] }
 0x323   :  { %v2655_v24 = vsel %vm2640_vm0, %v30_v9, %v8730_v2 }
 0x324   :  { %v2469_v38 = vpop.permute.xlu1 %2468  ;;  %v2215_v1 = vpop.permute.xlu0 %2214 }
 0x325   :  { %v3106_v5 = vsel %vm3095_vm7, %v3041_v20, %v2469_v38  ;;  %v3042_v59 = vsel %vm3030_vm6, %v2977_v22, %v2215_v1  ;;  %v8736_v22 = vld [vmem:[#allocation57_spill] sm:$0xff] }
 0x326   :  { %2252 = vrot.lane.b32.xlu1 %v494_v32, %s4379_s12  ;;  %1998 = vrot.lane.b32.xlu0 %v431_v16, %s4378_s26  ;;  %v2720_v32 = vsel %vm2705_vm1, %v2655_v24, %v8731_v45  ;;  %v434_v16 = vld [vmem:[%s8454_s0 + $0x3dc] sm:$0xff] }
 0x327   :  { %4265 = vmatprep.mubr.msk.f32.mxu0 %vm3176_vm8, %v3106_v5  ;;  %v2785_v20 = vsel %vm2770_vm2, %v2720_v32, %v8732_v8  ;;  %v8734_v5 = vld [vmem:[#allocation4_spill] sm:$0xff]  ;;  %v8748_v45 = vld [vmem:[#allocation165_spill] sm:$0xff] }
 0x328   :  { %v1961_v51 = vpop.permute.xlu1 %1960  ;;  %v2471_v42 = vpop.permute.xlu0 %2470  ;;  %v2850_v34 = vsel %vm2835_vm3, %v2785_v20, %v8733_v60  ;;  %v2656_v21 = vsel %vm2640_vm0, %v31_v49, %v8734_v5  ;;  %v34_v20 = vld [vmem:[%s8454_s0 + $0x1f8] sm:$0xff] }
 0x329   :  { %v3107_v10 = vsel %vm3095_vm7, %v3042_v59, %v2471_v42  ;;  %v2978_v31 = vsel %vm2965_vm5, %v2913_v62, %v1961_v51  ;;  %v2915_v7 = vsel %vm2900_vm4, %v2850_v34, %v8735_v63  ;;  %v498_v59 = vld [vmem:[%s8454_s0 + $0x3dd] sm:$0xff]  ;;  %v8740_v62 = vld [vmem:[#allocation7_spill] sm:$0xff] }
 0x32a   :  { %2508 = vrot.lane.b32.xlu1 %v558_v54, %s4380_s16  ;;  %2254 = vrot.lane.b32.xlu0 %v495_v27, %s4379_s12  ;;  %v2721_v54 = vsel %vm2705_vm1, %v2656_v21, %v8736_v22  ;;  %v435_v51 = vld [vmem:[%s8454_s0 + $0x3e4] sm:$0xff]  ;;  %v2657_v26 = vsel %vm2640_vm0, %v32_v19, %v8740_v62 }
 0x32b   :  { %4266 = vmatmul.mubr.msk.f32.gmra.mxu0 %vm3176_vm8, %v3107_v10  ;;  %v8737_v42 = vld [vmem:[#allocation110_spill] sm:$0xff] }
 0x32c   :  { %v2217_v50 = vpop.permute.xlu1 %2216  ;;  %v1963_v0 = vpop.permute.xlu0 %1962  ;;  %v2786_v10 = vsel %vm2770_vm2, %v2721_v54, %v8737_v42  ;;  %v501_v60 = vld [vmem:[%s8454_s0 + $0x41d] sm:$0xff] }
 0x32d   :  { %v3043_v46 = vsel %vm3030_vm6, %v2978_v31, %v2217_v50  ;;  %v2979_v17 = vsel %vm2965_vm5, %v2914_v37, %v1963_v0  ;;  %v2851_v33 = vsel %vm2835_vm3, %v2786_v10, %v8738_v13  ;;  %v562_v0 = vld [vmem:[%s8454_s0 + $0x3de] sm:$0xff]  ;;  %v8741_v31 = vld [vmem:[#allocation60_spill] sm:$0xff]  ;;  %v8752_v10 = vld [vmem:[#allocation115_spill] sm:$0xff] }
 0x32e   :  { %2000 = vrot.lane.b32.xlu1 %v432_v14, %s4378_s26  ;;  %2510 = vrot.lane.b32.xlu0 %v559_v52, %s4380_s16  ;;  %v8739_v52 = vld [vmem:[#allocation217_spill] sm:$0xff]  ;;  %v8745_v37 = vld [vmem:[#allocation220_spill] sm:$0xff]  ;;  %v35_v54 = vld [vmem:[%s8454_s0 + $0x200] sm:$0xff] }
 0x32f   :  { %v2916_v61 = vsel %vm2900_vm4, %v2851_v33, %v8739_v52  ;;  %v565_v42 = vld [vmem:[%s8454_s0 + $0x41e] sm:$0xff]  ;;  %v8753_v13 = vld [vmem:[#allocation168_spill] sm:$0xff] }
 0x330   :  { %v2473_v25 = vpop.permute.xlu1 %2472  ;;  %v2219_v43 = vpop.permute.xlu0 %2218 }
 0x331   :  { %v3108_v53 = vsel %vm3095_vm7, %v3043_v46, %v2473_v25  ;;  %v3044_v47 = vsel %vm3030_vm6, %v2979_v17, %v2219_v43  ;;  %v8746_v17 = vld [vmem:[#allocation59_spill] sm:$0xff] }
 0x332   :  { %2256 = vrot.lane.b32.xlu1 %v496_v15, %s4379_s12  ;;  %2002 = vrot.lane.b32.xlu0 %v433_v6, %s4378_s26  ;;  %v2722_v15 = vsel %vm2705_vm1, %v2657_v26, %v8741_v31  ;;  %v436_v6 = vld [vmem:[%s8454_s0 + $0x414] sm:$0xff]  ;;  %v8758_v31 = vld [vmem:[#allocation167_spill] sm:$0xff] }
 0x333   :  { %4268 = vmatprep.mubr.msk.f32.mxu0 %vm3176_vm8, %v3108_v53  ;;  %v2787_v46 = vsel %vm2770_vm2, %v2722_v15, %v8742_v28  ;;  %v8744_v53 = vld [vmem:[#allocation6_spill] sm:$0xff] }
 0x334   :  { %v1965_v57 = vpop.permute.xlu1 %1964  ;;  %v2475_v3 = vpop.permute.xlu0 %2474  ;;  %v2852_v58 = vsel %vm2835_vm3, %v2787_v46, %v8743_v30  ;;  %v2658_v55 = vsel %vm2640_vm0, %v33_v18, %v8744_v53  ;;  %v36_v46 = vld [vmem:[%s8454_s0 + $0x230] sm:$0xff] }
 0x335   :  { %v3109_v35 = vsel %vm3095_vm7, %v3044_v47, %v2475_v3  ;;  %v2980_v27 = vsel %vm2965_vm5, %v2915_v7, %v1965_v57  ;;  %v2917_v9 = vsel %vm2900_vm4, %v2852_v58, %v8745_v37  ;;  %v500_v47 = vld [vmem:[%s8454_s0 + $0x415] sm:$0xff] }
 0x336   :  { %2512 = vrot.lane.b32.xlu1 %v560_v41, %s4380_s16  ;;  %2258 = vrot.lane.b32.xlu0 %v497_v11, %s4379_s12  ;;  %v2723_v41 = vsel %vm2705_vm1, %v2658_v55, %v8746_v17  ;;  %v437_v57 = vld [vmem:[%s8454_s0 + $0x41c] sm:$0xff]  ;;  %v8747_v3 = vld [vmem:[#allocation112_spill] sm:$0xff] }
 0x337   :  { %4269 = vmatmul.mubr.msk.f32.gmra.mxu0 %vm3176_vm8, %v3109_v35  ;;  %v2788_v35 = vsel %vm2770_vm2, %v2723_v41, %v8747_v3  ;;  %v8750_v7 = vld [vmem:[#allocation9_spill] sm:$0xff] }
 0x338   :  { %v2221_v38 = vpop.permute.xlu1 %2220  ;;  %v1967_v1 = vpop.permute.xlu0 %1966  ;;  %v2853_v32 = vsel %vm2835_vm3, %v2788_v35, %v8748_v45  ;;  %v2659_v22 = vsel %vm2640_vm0, %v34_v20, %v8750_v7  ;;  %v503_v30 = vld [vmem:[%s8454_s0 + $0x455] sm:$0xff]  ;;  %v8763_v45 = vld [vmem:[#allocation170_spill] sm:$0xff] }
 0x339   :  { %v3045_v48 = vsel %vm3030_vm6, %v2980_v27, %v2221_v38  ;;  %v2981_v50 = vsel %vm2965_vm5, %v2916_v61, %v1967_v1  ;;  %v564_v1 = vld [vmem:[%s8454_s0 + $0x416] sm:$0xff]  ;;  %v8751_v27 = vld [vmem:[#allocation62_spill] sm:$0xff] }
 0x33a   :  { %2004 = vrot.lane.b32.xlu1 %v434_v16, %s4378_s26  ;;  %2514 = vrot.lane.b32.xlu0 %v561_v29, %s4380_s16  ;;  %v8749_v29 = vld [vmem:[#allocation219_spill] sm:$0xff]  ;;  %v8755_v61 = vld [vmem:[#allocation222_spill] sm:$0xff]  ;;  %v37_v41 = vld [vmem:[%s8454_s0 + $0x238] sm:$0xff] }
 0x33b   :  { %v2918_v8 = vsel %vm2900_vm4, %v2853_v32, %v8749_v29  ;;  %v567_v3 = vld [vmem:[%s8454_s0 + $0x456] sm:$0xff] }
 0x33c   :  { %v2477_v39 = vpop.permute.xlu1 %2476  ;;  %v2223_v4 = vpop.permute.xlu0 %2222  ;;  %v8762_v35 = vld [vmem:[#allocation117_spill] sm:$0xff] }
 0x33d   :  { %v3110_v14 = vsel %vm3095_vm7, %v3045_v48, %v2477_v39  ;;  %v3046_v23 = vsel %vm3030_vm6, %v2981_v50, %v2223_v4  ;;  %v8756_v50 = vld [vmem:[#allocation61_spill] sm:$0xff] }
 0x33e   :  { %2260 = vrot.lane.b32.xlu1 %v498_v59, %s4379_s12  ;;  %2006 = vrot.lane.b32.xlu0 %v435_v51, %s4378_s26  ;;  %v2724_v59 = vsel %vm2705_vm1, %v2659_v22, %v8751_v27  ;;  %v438_v51 = vld [vmem:[%s8454_s0 + $0x44c] sm:$0xff]  ;;  %v8768_v27 = vld [vmem:[#allocation169_spill] sm:$0xff] }
 0x33f   :  { %4271 = vmatprep.mubr.msk.f32.mxu0 %vm3176_vm8, %v3110_v14  ;;  %v2789_v48 = vsel %vm2770_vm2, %v2724_v59, %v8752_v10  ;;  %v8754_v14 = vld [vmem:[#allocation8_spill] sm:$0xff] }
 0x340   :  { %v1969_v12 = vpop.permute.xlu1 %1968  ;;  %v2479_v36 = vpop.permute.xlu0 %2478  ;;  %v2854_v33 = vsel %vm2835_vm3, %v2789_v48, %v8753_v13  ;;  %v2660_v52 = vsel %vm2640_vm0, %v35_v54, %v8754_v14  ;;  %v38_v48 = vld [vmem:[%s8454_s0 + $0x268] sm:$0xff] }
 0x341   :  { %v3111_v40 = vsel %vm3095_vm7, %v3046_v23, %v2479_v36  ;;  %v2982_v11 = vsel %vm2965_vm5, %v2917_v9, %v1969_v12  ;;  %v2919_v19 = vsel %vm2900_vm4, %v2854_v33, %v8755_v61  ;;  %v502_v23 = vld [vmem:[%s8454_s0 + $0x44d] sm:$0xff]  ;;  %v8757_v36 = vld [vmem:[#allocation114_spill] sm:$0xff] }
 0x342   :  { %2516 = vrot.lane.b32.xlu1 %v562_v0, %s4380_s16  ;;  %2262 = vrot.lane.b32.xlu0 %v499_v44, %s4379_s12  ;;  %v2725_v0 = vsel %vm2705_vm1, %v2660_v52, %v8756_v50  ;;  %v439_v12 = vld [vmem:[%s8454_s0 + $0x454] sm:$0xff]  ;;  %v8760_v9 = vld [vmem:[#allocation11_spill] sm:$0xff] }
 0x343   :  { %4272 = vmatmul.mubr.msk.f32.gmra.mxu0 %vm3176_vm8, %v3111_v40  ;;  %v2790_v40 = vsel %vm2770_vm2, %v2725_v0, %v8757_v36  ;;  %v2661_v17 = vsel %vm2640_vm0, %v36_v46, %v8760_v9  ;;  %v505_v13 = vld [vmem:[%s8454_s0 + $0x48d] sm:$0xff] }
 0x344   :  { %v2225_v25 = vpop.permute.xlu1 %2224  ;;  %v1971_v43 = vpop.permute.xlu0 %1970  ;;  %v2855_v15 = vsel %vm2835_vm3, %v2790_v40, %v8758_v31  ;;  %v39_v0 = vld [vmem:[%s8454_s0 + $0x270] sm:$0xff]  ;;  %v8772_v40 = vld [vmem:[#allocation119_spill] sm:$0xff] }
 0x345   :  { %v3047_v2 = vsel %vm3030_vm6, %v2982_v11, %v2225_v25  ;;  %v2983_v38 = vsel %vm2965_vm5, %v2918_v8, %v1971_v43  ;;  %v566_v43 = vld [vmem:[%s8454_s0 + $0x44e] sm:$0xff] }
 0x346   :  { %2008 = vrot.lane.b32.xlu1 %v436_v6, %s4378_s26  ;;  %2518 = vrot.lane.b32.xlu0 %v563_v56, %s4380_s16  ;;  %v8759_v56 = vld [vmem:[#allocation221_spill] sm:$0xff]  ;;  %v8761_v11 = vld [vmem:[#allocation64_spill] sm:$0xff] }
 0x347   :  { %v2920_v28 = vsel %vm2900_vm4, %v2855_v15, %v8759_v56  ;;  %v8765_v8 = vld [vmem:[#allocation224_spill] sm:$0xff] }
 0x348   :  { %v2481_v24 = vpop.permute.xlu1 %2480  ;;  %v2227_v49 = vpop.permute.xlu0 %2226  ;;  %v569_v36 = vld [vmem:[%s8454_s0 + $0x48e] sm:$0xff] }
 0x349   :  { %v3112_v16 = vsel %vm3095_vm7, %v3047_v2, %v2481_v24  ;;  %v3048_v34 = vsel %vm3030_vm6, %v2983_v38, %v2227_v49  ;;  %v8766_v38 = vld [vmem:[#allocation63_spill] sm:$0xff]  ;;  %v8773_v31 = vld [vmem:[#allocation172_spill] sm:$0xff] }
 0x34a   :  { %2264 = vrot.lane.b32.xlu1 %v500_v47, %s4379_s12  ;;  %2010 = vrot.lane.b32.xlu0 %v437_v57, %s4378_s26  ;;  %v2726_v47 = vsel %vm2705_vm1, %v2661_v17, %v8761_v11  ;;  %v440_v57 = vld [vmem:[%s8454_s0 + $0x484] sm:$0xff] }
 0x34b   :  { %4274 = vmatprep.mubr.msk.f32.mxu0 %vm3176_vm8, %v3112_v16  ;;  %v2791_v2 = vsel %vm2770_vm2, %v2726_v47, %v8762_v35  ;;  %v8764_v16 = vld [vmem:[#allocation10_spill] sm:$0xff]  ;;  %v8778_v11 = vld [vmem:[#allocation171_spill] sm:$0xff] }
 0x34c   :  { %v1973_v5 = vpop.permute.xlu1 %1972  ;;  %v2483_v21 = vpop.permute.xlu0 %2482  ;;  %v2856_v32 = vsel %vm2835_vm3, %v2791_v2, %v8763_v45  ;;  %v2662_v29 = vsel %vm2640_vm0, %v37_v41, %v8764_v16  ;;  %v40_v2 = vld [vmem:[%s8454_s0 + $0x2a0] sm:$0xff] }
 0x34d   :  { %v3113_v63 = vsel %vm3095_vm7, %v3048_v34, %v2483_v21  ;;  %v2984_v44 = vsel %vm2965_vm5, %v2919_v19, %v1973_v5  ;;  %v2921_v20 = vsel %vm2900_vm4, %v2856_v32, %v8765_v8  ;;  %v504_v34 = vld [vmem:[%s8454_s0 + $0x485] sm:$0xff]  ;;  %v8767_v21 = vld [vmem:[#allocation116_spill] sm:$0xff]  ;;  %v8770_v19 = vld [vmem:[#allocation13_spill] sm:$0xff] }
 0x34e   :  { %2520 = vrot.lane.b32.xlu1 %v564_v1, %s4380_s16  ;;  %2266 = vrot.lane.b32.xlu0 %v501_v60, %s4379_s12  ;;  %v2727_v1 = vsel %vm2705_vm1, %v2662_v29, %v8766_v38  ;;  %v441_v5 = vld [vmem:[%s8454_s0 + $0x48c] sm:$0xff]  ;;  %v2663_v50 = vsel %vm2640_vm0, %v38_v48, %v8770_v19 }
 0x34f   :  { %4275 = vmatmul.mubr.msk.f32.gmra.mxu0 %vm3176_vm8, %v3113_v63  ;;  %v2792_v63 = vsel %vm2770_vm2, %v2727_v1, %v8767_v21  ;;  %v507_v45 = vld [vmem:[%s8454_s0 + $0x4c5] sm:$0xff] }
 0x350   :  { %v2229_v39 = vpop.permute.xlu1 %2228  ;;  %v1975_v4 = vpop.permute.xlu0 %1974  ;;  %v2857_v59 = vsel %vm2835_vm3, %v2792_v63, %v8768_v27  ;;  %v41_v1 = vld [vmem:[%s8454_s0 + $0x2a8] sm:$0xff]  ;;  %v8782_v63 = vld [vmem:[#allocation121_spill] sm:$0xff]  ;;  %v8783_v27 = vld [vmem:[#allocation174_spill] sm:$0xff] }
 0x351   :  { %v3049_v62 = vsel %vm3030_vm6, %v2984_v44, %v2229_v39  ;;  %v2985_v25 = vsel %vm2965_vm5, %v2920_v28, %v1975_v4  ;;  %v568_v4 = vld [vmem:[%s8454_s0 + $0x486] sm:$0xff] }
 0x352   :  { %2012 = vrot.lane.b32.xlu1 %v438_v51, %s4378_s26  ;;  %2522 = vrot.lane.b32.xlu0 %v565_v42, %s4380_s16  ;;  %v8769_v42 = vld [vmem:[#allocation223_spill] sm:$0xff]  ;;  %v8771_v44 = vld [vmem:[#allocation66_spill] sm:$0xff] }
 0x353   :  { %v2922_v10 = vsel %vm2900_vm4, %v2857_v59, %v8769_v42  ;;  %v8775_v28 = vld [vmem:[#allocation226_spill] sm:$0xff] }
 0x354   :  { %v2485_v26 = vpop.permute.xlu1 %2484  ;;  %v2231_v18 = vpop.permute.xlu0 %2230  ;;  %v571_v21 = vld [vmem:[%s8454_s0 + $0x4c6] sm:$0xff] }
 0x355   :  { %v3114_v6 = vsel %vm3095_vm7, %v3049_v62, %v2485_v26  ;;  %v3050_v58 = vsel %vm3030_vm6, %v2985_v25, %v2231_v18  ;;  %v8776_v25 = vld [vmem:[#allocation65_spill] sm:$0xff] }
 0x356   :  { %2268 = vrot.lane.b32.xlu1 %v502_v23, %s4379_s12  ;;  %2014 = vrot.lane.b32.xlu0 %v439_v12, %s4378_s26  ;;  %v2728_v23 = vsel %vm2705_vm1, %v2663_v50, %v8771_v44  ;;  %v442_v12 = vld [vmem:[%s8454_s0 + $0x4bc] sm:$0xff] }
 0x357   :  { %4277 = vmatprep.mubr.msk.f32.mxu0 %vm3176_vm8, %v3114_v6  ;;  %v2793_v62 = vsel %vm2770_vm2, %v2728_v23, %v8772_v40  ;;  %v8774_v6 = vld [vmem:[#allocation12_spill] sm:$0xff]  ;;  %v8788_v44 = vld [vmem:[#allocation173_spill] sm:$0xff] }
 0x358   :  { %v1977_v53 = vpop.permute.xlu1 %1976  ;;  %v2487_v55 = vpop.permute.xlu0 %2486  ;;  %v2858_v15 = vsel %vm2835_vm3, %v2793_v62, %v8773_v31  ;;  %v2664_v56 = vsel %vm2640_vm0, %v39_v0, %v8774_v6  ;;  %v42_v62 = vld [vmem:[%s8454_s0 + $0x2d8] sm:$0xff] }
 0x359   :  { %v3115_v37 = vsel %vm3095_vm7, %v3050_v58, %v2487_v55  ;;  %v2986_v60 = vsel %vm2965_vm5, %v2921_v20, %v1977_v53  ;;  %v2923_v46 = vsel %vm2900_vm4, %v2858_v15, %v8775_v28  ;;  %v506_v58 = vld [vmem:[%s8454_s0 + $0x4bd] sm:$0xff]  ;;  %v8780_v20 = vld [vmem:[#allocation15_spill] sm:$0xff] }
 0x35a   :  { %2524 = vrot.lane.b32.xlu1 %v566_v43, %s4380_s16  ;;  %2270 = vrot.lane.b32.xlu0 %v503_v30, %s4379_s12  ;;  %v2729_v43 = vsel %vm2705_vm1, %v2664_v56, %v8776_v25  ;;  %v443_v53 = vld [vmem:[%s8454_s0 + $0x4c4] sm:$0xff]  ;;  %v2665_v38 = vsel %vm2640_vm0, %v40_v2, %v8780_v20 }
 0x35b   :  { %4278 = vmatmul.mubr.msk.f32.gmra.mxu0 %vm3176_vm8, %v3115_v37  ;;  %v8777_v55 = vld [vmem:[#allocation118_spill] sm:$0xff] }
 0x35c   :  { %v2233_v24 = vpop.permute.xlu1 %2232  ;;  %v1979_v49 = vpop.permute.xlu0 %1978  ;;  %v2794_v37 = vsel %vm2770_vm2, %v2729_v43, %v8777_v55  ;;  %v509_v31 = vld [vmem:[%s8454_s0 + $0x4fd] sm:$0xff] }
 0x35d   :  { %v3051_v7 = vsel %vm3030_vm6, %v2986_v60, %v2233_v24  ;;  %v2987_v39 = vsel %vm2965_vm5, %v2922_v10, %v1979_v49  ;;  %v2859_v47 = vsel %vm2835_vm3, %v2794_v37, %v8778_v11  ;;  %v570_v49 = vld [vmem:[%s8454_s0 + $0x4be] sm:$0xff]  ;;  %v8781_v60 = vld [vmem:[#allocation68_spill] sm:$0xff]  ;;  %v8792_v37 = vld [vmem:[#allocation123_spill] sm:$0xff] }
 0x35e   :  { %2016 = vrot.lane.b32.xlu1 %v440_v57, %s4378_s26  ;;  %2526 = vrot.lane.b32.xlu0 %v567_v3, %s4380_s16  ;;  %v8779_v3 = vld [vmem:[#allocation225_spill] sm:$0xff]  ;;  %v8785_v10 = vld [vmem:[#allocation228_spill] sm:$0xff]  ;;  %v43_v43 = vld [vmem:[%s8454_s0 + $0x2e0] sm:$0xff] }
 0x35f   :  { %v2924_v35 = vsel %vm2900_vm4, %v2859_v47, %v8779_v3  ;;  %v573_v55 = vld [vmem:[%s8454_s0 + $0x4fe] sm:$0xff]  ;;  %v8793_v11 = vld [vmem:[#allocation176_spill] sm:$0xff] }
 0x360   :  { %v2489_v22 = vpop.permute.xlu1 %2488  ;;  %v2235_v54 = vpop.permute.xlu0 %2234 }
 0x361   :  { %v3116_v51 = vsel %vm3095_vm7, %v3051_v7, %v2489_v22  ;;  %v3052_v33 = vsel %vm3030_vm6, %v2987_v39, %v2235_v54  ;;  %v8786_v39 = vld [vmem:[#allocation67_spill] sm:$0xff] }
 0x362   :  { %2272 = vrot.lane.b32.xlu1 %v504_v34, %s4379_s12  ;;  %2018 = vrot.lane.b32.xlu0 %v441_v5, %s4378_s26  ;;  %v2730_v34 = vsel %vm2705_vm1, %v2665_v38, %v8781_v60  ;;  %v444_v5 = vld [vmem:[%s8454_s0 + $0x4f4] sm:$0xff]  ;;  %v8798_v60 = vld [vmem:[#allocation175_spill] sm:$0xff] }
 0x363   :  { %4280 = vmatprep.mubr.msk.f32.mxu0 %vm3176_vm8, %v3116_v51  ;;  %v2795_v7 = vsel %vm2770_vm2, %v2730_v34, %v8782_v63  ;;  %v8784_v51 = vld [vmem:[#allocation14_spill] sm:$0xff] }
 0x364   :  { %v1981_v14 = vpop.permute.xlu1 %1980  ;;  %v2491_v52 = vpop.permute.xlu0 %2490  ;;  %v2860_v59 = vsel %vm2835_vm3, %v2795_v7, %v8783_v27  ;;  %v2666_v42 = vsel %vm2640_vm0, %v41_v1, %v8784_v51  ;;  %v44_v7 = vld [vmem:[%s8454_s0 + $0x310] sm:$0xff] }
 0x365   :  { %v3117_v61 = vsel %vm3095_vm7, %v3052_v33, %v2491_v52  ;;  %v2988_v30 = vsel %vm2965_vm5, %v2923_v46, %v1981_v14  ;;  %v2925_v48 = vsel %vm2900_vm4, %v2860_v59, %v8785_v10  ;;  %v508_v33 = vld [vmem:[%s8454_s0 + $0x4f5] sm:$0xff] }
 0x366   :  { %2528 = vrot.lane.b32.xlu1 %v568_v4, %s4380_s16  ;;  %2274 = vrot.lane.b32.xlu0 %v505_v13, %s4379_s12  ;;  %v2731_v4 = vsel %vm2705_vm1, %v2666_v42, %v8786_v39  ;;  %v445_v14 = vld [vmem:[%s8454_s0 + $0x4fc] sm:$0xff]  ;;  %v8787_v52 = vld [vmem:[#allocation120_spill] sm:$0xff] }
 0x367   :  { %4281 = vmatmul.mubr.msk.f32.gmra.mxu0 %vm3176_vm8, %v3117_v61  ;;  %v2796_v61 = vsel %vm2770_vm2, %v2731_v4, %v8787_v52  ;;  %v8790_v46 = vld [vmem:[#allocation17_spill] sm:$0xff] }
 0x368   :  { %v2237_v26 = vpop.permute.xlu1 %2236  ;;  %v1983_v18 = vpop.permute.xlu0 %1982  ;;  %v2861_v23 = vsel %vm2835_vm3, %v2796_v61, %v8788_v44  ;;  %v2667_v25 = vsel %vm2640_vm0, %v42_v62, %v8790_v46  ;;  %v511_v27 = vld [vmem:[%s8454_s0 + $0x535] sm:$0xff]  ;;  %v8803_v44 = vld [vmem:[#allocation178_spill] sm:$0xff] }
 0x369   :  { %v3053_v9 = vsel %vm3030_vm6, %v2988_v30, %v2237_v26  ;;  %v2989_v24 = vsel %vm2965_vm5, %v2924_v35, %v1983_v18  ;;  %v572_v18 = vld [vmem:[%s8454_s0 + $0x4f6] sm:$0xff]  ;;  %v8791_v30 = vld [vmem:[#allocation70_spill] sm:$0xff] }
 0x36a   :  { %2020 = vrot.lane.b32.xlu1 %v442_v12, %s4378_s26  ;;  %2530 = vrot.lane.b32.xlu0 %v569_v36, %s4380_s16  ;;  %v8789_v36 = vld [vmem:[#allocation227_spill] sm:$0xff]  ;;  %v8795_v35 = vld [vmem:[#allocation230_spill] sm:$0xff]  ;;  %v45_v4 = vld [vmem:[%s8454_s0 + $0x318] sm:$0xff] }
 0x36b   :  { %v2926_v40 = vsel %vm2900_vm4, %v2861_v23, %v8789_v36  ;;  %v575_v52 = vld [vmem:[%s8454_s0 + $0x536] sm:$0xff] }
 0x36c   :  { %v2493_v17 = vpop.permute.xlu1 %2492  ;;  %v2239_v41 = vpop.permute.xlu0 %2238  ;;  %v8802_v61 = vld [vmem:[#allocation125_spill] sm:$0xff] }
 0x36d   :  { %v3118_v57 = vsel %vm3095_vm7, %v3053_v9, %v2493_v17  ;;  %v3054_v32 = vsel %vm3030_vm6, %v2989_v24, %v2239_v41  ;;  %v8796_v24 = vld [vmem:[#allocation69_spill] sm:$0xff] }
 0x36e   :  { %2276 = vrot.lane.b32.xlu1 %v506_v58, %s4379_s12  ;;  %2022 = vrot.lane.b32.xlu0 %v443_v53, %s4378_s26  ;;  %v2732_v58 = vsel %vm2705_vm1, %v2667_v25, %v8791_v30  ;;  %v446_v53 = vld [vmem:[%s8454_s0 + $0x52c] sm:$0xff]  ;;  %v8808_v30 = vld [vmem:[#allocation177_spill] sm:$0xff] }
 0x36f   :  { %4283 = vmatprep.mubr.msk.f32.mxu0 %vm3176_vm8, %v3118_v57  ;;  %v2797_v9 = vsel %vm2770_vm2, %v2732_v58, %v8792_v37  ;;  %v8794_v57 = vld [vmem:[#allocation16_spill] sm:$0xff] }
 0x370   :  { %v1985_v16 = vpop.permute.xlu1 %1984  ;;  %v2495_v29 = vpop.permute.xlu0 %2494  ;;  %v2862_v47 = vsel %vm2835_vm3, %v2797_v9, %v8793_v11  ;;  %v2668_v3 = vsel %vm2640_vm0, %v43_v43, %v8794_v57  ;;  %v46_v9 = vld [vmem:[%s8454_s0 + $0x348] sm:$0xff] }
 0x371   :  { %v3119_v8 = vsel %vm3095_vm7, %v3054_v32, %v2495_v29  ;;  %v2990_v13 = vsel %vm2965_vm5, %v2925_v48, %v1985_v16  ;;  %v2927_v2 = vsel %vm2900_vm4, %v2862_v47, %v8795_v35  ;;  %v510_v32 = vld [vmem:[%s8454_s0 + $0x52d] sm:$0xff]  ;;  %v8797_v29 = vld [vmem:[#allocation122_spill] sm:$0xff] }
 0x372   :  { %2532 = vrot.lane.b32.xlu1 %v570_v49, %s4380_s16  ;;  %2278 = vrot.lane.b32.xlu0 %v507_v45, %s4379_s12  ;;  %v2733_v49 = vsel %vm2705_vm1, %v2668_v3, %v8796_v24  ;;  %v447_v16 = vld [vmem:[%s8454_s0 + $0x534] sm:$0xff]  ;;  %v8800_v48 = vld [vmem:[#allocation19_spill] sm:$0xff] }
 0x373   :  { %4284 = vmatmul.mubr.msk.f32.gmra.mxu0 %vm3176_vm8, %v3119_v8  ;;  %v2798_v8 = vsel %vm2770_vm2, %v2733_v49, %v8797_v29  ;;  %v2669_v39 = vsel %vm2640_vm0, %v44_v7, %v8800_v48  ;;  %v513_v11 = vld [vmem:[%s8454_s0 + $0x56d] sm:$0xff] }
 0x374   :  { %v2241_v22 = vpop.permute.xlu1 %2240  ;;  %v1987_v54 = vpop.permute.xlu0 %1986  ;;  %v2863_v34 = vsel %vm2835_vm3, %v2798_v8, %v8798_v60  ;;  %v47_v49 = vld [vmem:[%s8454_s0 + $0x350] sm:$0xff]  ;;  %v8812_v8 = vld [vmem:[#allocation127_spill] sm:$0xff] }
 0x375   :  { %v3055_v19 = vsel %vm3030_vm6, %v2990_v13, %v2241_v22  ;;  %v2991_v26 = vsel %vm2965_vm5, %v2926_v40, %v1987_v54  ;;  %v574_v54 = vld [vmem:[%s8454_s0 + $0x52e] sm:$0xff] }
 0x376   :  { %2024 = vrot.lane.b32.xlu1 %v444_v5, %s4378_s26  ;;  %2534 = vrot.lane.b32.xlu0 %v571_v21, %s4380_s16  ;;  %v8799_v21 = vld [vmem:[#allocation229_spill] sm:$0xff]  ;;  %v8801_v13 = vld [vmem:[#allocation72_spill] sm:$0xff] }
 0x377   :  { %v2928_v63 = vsel %vm2900_vm4, %v2863_v34, %v8799_v21  ;;  %v8805_v40 = vld [vmem:[#allocation232_spill] sm:$0xff] }
 0x378   :  { %v2497_v50 = vpop.permute.xlu1 %2496  ;;  %v2243_v0 = vpop.permute.xlu0 %2242  ;;  %v577_v29 = vld [vmem:[%s8454_s0 + $0x56e] sm:$0xff] }
 0x379   :  { %v3120_v12 = vsel %vm3095_vm7, %v3055_v19, %v2497_v50  ;;  %v3056_v15 = vsel %vm3030_vm6, %v2991_v26, %v2243_v0  ;;  %v8806_v26 = vld [vmem:[#allocation71_spill] sm:$0xff]  ;;  %v8813_v60 = vld [vmem:[#allocation180_spill] sm:$0xff] }
 0x37a   :  { %2280 = vrot.lane.b32.xlu1 %v508_v33, %s4379_s12  ;;  %2026 = vrot.lane.b32.xlu0 %v445_v14, %s4378_s26  ;;  %v2734_v33 = vsel %vm2705_vm1, %v2669_v39, %v8801_v13  ;;  %v448_v14 = vld [vmem:[%s8454_s0 + $0x564] sm:$0xff] }
 0x37b   :  { %4286 = vmatprep.mubr.msk.f32.mxu0 %vm3176_vm8, %v3120_v12  ;;  %v2799_v19 = vsel %vm2770_vm2, %v2734_v33, %v8802_v61  ;;  %v8804_v12 = vld [vmem:[#allocation18_spill] sm:$0xff]  ;;  %v8818_v13 = vld [vmem:[#allocation179_spill] sm:$0xff] }
 0x37c   :  { %v1989_v6 = vpop.permute.xlu1 %1988  ;;  %v2499_v56 = vpop.permute.xlu0 %2498  ;;  %v2864_v23 = vsel %vm2835_vm3, %v2799_v19, %v8803_v44  ;;  %v2670_v36 = vsel %vm2640_vm0, %v45_v4, %v8804_v12  ;;  %v48_v19 = vld [vmem:[%s8454_s0 + $0x380] sm:$0xff] }
 0x37d   :  { %v3121_v28 = vsel %vm3095_vm7, %v3056_v15, %v2499_v56  ;;  %v2992_v45 = vsel %vm2965_vm5, %v2927_v2, %v1989_v6  ;;  %v2929_v62 = vsel %vm2900_vm4, %v2864_v23, %v8805_v40  ;;  %v512_v15 = vld [vmem:[%s8454_s0 + $0x565] sm:$0xff]  ;;  %v8807_v56 = vld [vmem:[#allocation124_spill] sm:$0xff]  ;;  %v8810_v2 = vld [vmem:[#allocation21_spill] sm:$0xff] }
 0x37e   :  { %2536 = vrot.lane.b32.xlu1 %v572_v18, %s4380_s16  ;;  %2282 = vrot.lane.b32.xlu0 %v509_v31, %s4379_s12  ;;  %v2735_v18 = vsel %vm2705_vm1, %v2670_v36, %v8806_v26  ;;  %v449_v6 = vld [vmem:[%s8454_s0 + $0x56c] sm:$0xff]  ;;  %v2671_v24 = vsel %vm2640_vm0, %v46_v9, %v8810_v2 }
 0x37f   :  { %4287 = vmatmul.mubr.msk.f32.gmra.mxu0 %vm3176_vm8, %v3121_v28  ;;  %v2800_v28 = vsel %vm2770_vm2, %v2735_v18, %v8807_v56  ;;  %v515_v44 = vld [vmem:[%s8454_s0 + $0x5a5] sm:$0xff] }
 0x380   :  { %v2245_v17 = vpop.permute.xlu1 %2244  ;;  %v1991_v41 = vpop.permute.xlu0 %1990  ;;  %v2865_v58 = vsel %vm2835_vm3, %v2800_v28, %v8808_v30  ;;  %v49_v18 = vld [vmem:[%s8454_s0 + $0x388] sm:$0xff]  ;;  %v8822_v28 = vld [vmem:[#allocation129_spill] sm:$0xff]  ;;  %v8823_v30 = vld [vmem:[#allocation182_spill] sm:$0xff] }
 0x381   :  { %v3057_v20 = vsel %vm3030_vm6, %v2992_v45, %v2245_v17  ;;  %v2993_v22 = vsel %vm2965_vm5, %v2928_v63, %v1991_v41  ;;  %v576_v41 = vld [vmem:[%s8454_s0 + $0x566] sm:$0xff] }
 0x382   :  { %2028 = vrot.lane.b32.xlu1 %v446_v53, %s4378_s26  ;;  %2538 = vrot.lane.b32.xlu0 %v573_v55, %s4380_s16  ;;  %v8809_v55 = vld [vmem:[#allocation231_spill] sm:$0xff]  ;;  %v8811_v45 = vld [vmem:[#allocation74_spill] sm:$0xff] }
 0x383   :  { %v2930_v37 = vsel %vm2900_vm4, %v2865_v58, %v8809_v55  ;;  %v8815_v63 = vld [vmem:[#allocation234_spill] sm:$0xff] }
 0x384   :  { %v2501_v38 = vpop.permute.xlu1 %2500  ;;  %v2247_v1 = vpop.permute.xlu0 %2246  ;;  %v579_v56 = vld [vmem:[%s8454_s0 + $0x5a6] sm:$0xff] }
 0x385   :  { %v3122_v5 = vsel %vm3095_vm7, %v3057_v20, %v2501_v38  ;;  %v3058_v59 = vsel %vm3030_vm6, %v2993_v22, %v2247_v1  ;;  %v8816_v22 = vld [vmem:[#allocation73_spill] sm:$0xff] }
 0x386   :  { %2284 = vrot.lane.b32.xlu1 %v510_v32, %s4379_s12  ;;  %2030 = vrot.lane.b32.xlu0 %v447_v16, %s4378_s26  ;;  %v2736_v32 = vsel %vm2705_vm1, %v2671_v24, %v8811_v45  ;;  %v450_v16 = vld [vmem:[%s8454_s0 + $0x59c] sm:$0xff] }
 0x387   :  { %4289 = vmatprep.mubr.msk.f32.mxu0 %vm3176_vm8, %v3122_v5  ;;  %v2801_v20 = vsel %vm2770_vm2, %v2736_v32, %v8812_v8  ;;  %v8814_v5 = vld [vmem:[#allocation20_spill] sm:$0xff]  ;;  %v8828_v45 = vld [vmem:[#allocation181_spill] sm:$0xff] }
 0x388   :  { %v1993_v51 = vpop.permute.xlu1 %1992  ;;  %v2503_v42 = vpop.permute.xlu0 %2502  ;;  %v2866_v34 = vsel %vm2835_vm3, %v2801_v20, %v8813_v60  ;;  %v2672_v21 = vsel %vm2640_vm0, %v47_v49, %v8814_v5  ;;  %v50_v20 = vld [vmem:[%s8454_s0 + $0x3b8] sm:$0xff] }
 0x389   :  { %v3123_v10 = vsel %vm3095_vm7, %v3058_v59, %v2503_v42  ;;  %v2994_v31 = vsel %vm2965_vm5, %v2929_v62, %v1993_v51  ;;  %v2931_v7 = vsel %vm2900_vm4, %v2866_v34, %v8815_v63  ;;  %v514_v59 = vld [vmem:[%s8454_s0 + $0x59d] sm:$0xff]  ;;  %v8820_v62 = vld [vmem:[#allocation23_spill] sm:$0xff] }
 0x38a   :  { %2540 = vrot.lane.b32.xlu1 %v574_v54, %s4380_s16  ;;  %2286 = vrot.lane.b32.xlu0 %v511_v27, %s4379_s12  ;;  %v2737_v54 = vsel %vm2705_vm1, %v2672_v21, %v8816_v22  ;;  %v451_v51 = vld [vmem:[%s8454_s0 + $0x5a4] sm:$0xff]  ;;  %v2673_v26 = vsel %vm2640_vm0, %v48_v19, %v8820_v62  ;;  %v8834_v19 = vld [vmem:[#allocation184_spill] sm:$0xff] }
 0x38b   :  { %4290 = vmatmul.mubr.msk.f32.gmra.mxu0 %vm3176_vm8, %v3123_v10  ;;  %v8817_v42 = vld [vmem:[#allocation126_spill] sm:$0xff] }
 0x38c   :  { %v2249_v50 = vpop.permute.xlu1 %2248  ;;  %v1995_v0 = vpop.permute.xlu0 %1994  ;;  %v2802_v10 = vsel %vm2770_vm2, %v2737_v54, %v8817_v42  ;;  %v517_v60 = vld [vmem:[%s8454_s0 + $0x5dd] sm:$0xff] }
 0x38d   :  { %v3059_v46 = vsel %vm3030_vm6, %v2994_v31, %v2249_v50  ;;  %v2995_v17 = vsel %vm2965_vm5, %v2930_v37, %v1995_v0  ;;  %v2867_v33 = vsel %vm2835_vm3, %v2802_v10, %v8818_v13  ;;  %v578_v0 = vld [vmem:[%s8454_s0 + $0x59e] sm:$0xff]  ;;  %v8821_v31 = vld [vmem:[#allocation76_spill] sm:$0xff] }
 0x38e   :  { %2032 = vrot.lane.b32.xlu1 %v448_v14, %s4378_s26  ;;  %2542 = vrot.lane.b32.xlu0 %v575_v52, %s4380_s16  ;;  %v8819_v52 = vld [vmem:[#allocation233_spill] sm:$0xff]  ;;  %v8825_v37 = vld [vmem:[#allocation236_spill] sm:$0xff]  ;;  %v51_v22 = vld [vmem:[%s8454_s0 + $0x3c0] sm:$0xff] }
 0x38f   :  { %v2932_v61 = vsel %vm2900_vm4, %v2867_v33, %v8819_v52  ;;  %v8830_v54 = vld [vmem:[#allocation25_spill] sm:$0xff]  ;;  %v391_v10 = vld [vmem:[%s8454_s0 + $0x604] sm:$0xff]  ;;  %v8833_v52 = vld [vmem:[#allocation24_spill] sm:$0xff] }
 0x390   :  { %v2505_v25 = vpop.permute.xlu1 %2504  ;;  %v2251_v43 = vpop.permute.xlu0 %2250 }
 0x391   :  { %v3124_v53 = vsel %vm3095_vm7, %v3059_v46, %v2505_v25  ;;  %v3060_v47 = vsel %vm3030_vm6, %v2995_v17, %v2251_v43  ;;  %v8826_v17 = vld [vmem:[#allocation75_spill] sm:$0xff] }
 0x392   :  { %2288 = vrot.lane.b32.xlu1 %v512_v15, %s4379_s12  ;;  %2034 = vrot.lane.b32.xlu0 %v449_v6, %s4378_s26  ;;  %v2738_v15 = vsel %vm2705_vm1, %v2673_v26, %v8821_v31  ;;  %v452_v6 = vld [vmem:[%s8454_s0 + $0x5d4] sm:$0xff]  ;;  %v8837_v26 = vld [vmem:[#allocation130_spill] sm:$0xff] }
 0x393   :  { %4292 = vmatprep.mubr.msk.f32.mxu0 %vm3176_vm8, %v3124_v53  ;;  %v2803_v46 = vsel %vm2770_vm2, %v2738_v15, %v8822_v28  ;;  %v8824_v53 = vld [vmem:[#allocation22_spill] sm:$0xff]  ;;  %v455_v15 = vld [vmem:[%s8454_s0 + $0x614] sm:$0xff] }
 0x394   :  { %v1997_v57 = vpop.permute.xlu1 %1996  ;;  %v2507_v3 = vpop.permute.xlu0 %2506  ;;  %v2868_v58 = vsel %vm2835_vm3, %v2803_v46, %v8823_v30  ;;  %v2674_v55 = vsel %vm2640_vm0, %v49_v18, %v8824_v53 }
 0x395   :  { %v3125_v35 = vsel %vm3095_vm7, %v3060_v47, %v2507_v3  ;;  %v2996_v27 = vsel %vm2965_vm5, %v2931_v7, %v1997_v57  ;;  %v2933_v9 = vsel %vm2900_vm4, %v2868_v58, %v8825_v37  ;;  %v516_v47 = vld [vmem:[%s8454_s0 + $0x5d5] sm:$0xff]  ;;  %v7524_v7 = vld [vmem:[%s8456_s2] ss:$0 sm:$0xff] }
 0x396   :  { %2544 = vrot.lane.b32.xlu1 %v576_v41, %s4380_s16  ;;  %2290 = vrot.lane.b32.xlu0 %v513_v11, %s4379_s12  ;;  %v2739_v41 = vsel %vm2705_vm1, %v2674_v55, %v8826_v17  ;;  %v453_v57 = vld [vmem:[%s8454_s0 + $0x5dc] sm:$0xff]  ;;  %v8827_v3 = vld [vmem:[#allocation128_spill] sm:$0xff] }
 0x397   :  { %4293 = vmatmul.mubr.msk.f32.gmra.mxu0 %vm3176_vm8, %v3125_v35  ;;  %v2804_v35 = vsel %vm2770_vm2, %v2739_v41, %v8827_v3  ;;  %v8839_v58 = vld [vmem:[#allocation237_spill] sm:$0xff]  ;;  %v52_v41 = vld [vmem:[%s8454_s0 + $0x3f0] sm:$0xff] }
 0x398   :  { %v2253_v38 = vpop.permute.xlu1 %2252  ;;  %v1999_v1 = vpop.permute.xlu0 %1998  ;;  %v2869_v32 = vsel %vm2835_vm3, %v2804_v35, %v8828_v45  ;;  %v8840_v45 = vld [vmem:[#allocation27_spill] sm:$0xff] }
 0x399   :  { %v3061_v48 = vsel %vm3030_vm6, %v2996_v27, %v2253_v38  ;;  %v2997_v50 = vsel %vm2965_vm5, %v2932_v61, %v1999_v1  ;;  %v580_v1 = vld [vmem:[%s8454_s0 + $0x5d6] sm:$0xff]  ;;  %v2675_v27 = vsel %vm2640_vm0, %v50_v20, %v8830_v54  ;;  %v2676_v61 = vsel %vm2640_vm0, %v51_v22, %v8833_v52  ;;  %v8843_v22 = vld [vmem:[#allocation186_spill] sm:$0xff] }
 0x39a   :  { %2036 = vrot.lane.b32.xlu1 %v450_v16, %s4378_s26  ;;  %2546 = vrot.lane.b32.xlu0 %v577_v29, %s4380_s16  ;;  %v8829_v29 = vld [vmem:[#allocation235_spill] sm:$0xff]  ;;  %v583_v52 = vld [vmem:[%s8454_s0 + $0x616] sm:$0xff] }
 0x39b   :  { %v2934_v8 = vsel %vm2900_vm4, %v2869_v32, %v8829_v29  ;;  %v2677_v32 = vsel %vm2640_vm0, %v52_v41, %v8840_v45  ;;  %v8841_v29 = vld [vmem:[#allocation80_spill] sm:$0xff] }
 0x39c   :  { %v2509_v39 = vpop.permute.xlu1 %2508  ;;  %v2255_v4 = vpop.permute.xlu0 %2254  ;;  %v55_v41 = vld [vmem:[%s8454_s0 + $0x430] sm:$0xff] }
 0x39d   :  { %v3126_v14 = vsel %vm3095_vm7, %v3061_v48, %v2509_v39  ;;  %v3062_v23 = vsel %vm3030_vm6, %v2997_v50, %v2255_v4  ;;  %v581_v48 = vld [vmem:[%s8454_s0 + $0x5de] sm:$0xff]  ;;  %v8832_v39 = vld [vmem:[#allocation131_spill] sm:$0xff] }
 0x39e   :  { %2292 = vrot.lane.b32.xlu1 %v514_v59, %s4379_s12  ;;  %2038 = vrot.lane.b32.xlu0 %v451_v51, %s4378_s26  ;;  %v8831_v59 = vld [vmem:[#allocation78_spill] sm:$0xff] }
 0x39f   :  { %4295 = vmatprep.mubr.msk.f32.mxu0 %vm3176_vm8, %v3126_v14  ;;  %v2740_v51 = vsel %vm2705_vm1, %v2675_v27, %v8831_v59  ;;  %v8844_v59 = vld [vmem:[#allocation26_spill] sm:$0xff] }
 0x3a0   :  { %v2001_v12 = vpop.permute.xlu1 %2000  ;;  %v2511_v36 = vpop.permute.xlu0 %2510  ;;  %v2805_v4 = vsel %vm2770_vm2, %v2740_v51, %v8832_v39 }
 0x3a1   :  { %v3127_v40 = vsel %vm3095_vm7, %v3062_v23, %v2511_v36  ;;  %v2998_v11 = vsel %vm2965_vm5, %v2933_v9, %v2001_v12  ;;  %v2870_v50 = vsel %vm2835_vm3, %v2805_v4, %v8834_v19  ;;  %v8836_v12 = vld [vmem:[#allocation238_spill] sm:$0xff]  ;;  %v8846_v4 = vld [vmem:[#allocation79_spill] sm:$0xff] }
 0x3a2   :  { %2548 = vrot.lane.b32.xlu1 %v578_v0, %s4380_s16  ;;  %2294 = vrot.lane.b32.xlu0 %v515_v44, %s4379_s12  ;;  %v8835_v44 = vld [vmem:[#allocation77_spill] sm:$0xff]  ;;  %v2935_v36 = vsel %vm2900_vm4, %v2870_v50, %v8836_v12 }
 0x3a3   :  { %4296 = vmatmul.mubr.msk.f32.gmra.mxu0 %vm3176_vm8, %v3127_v40  ;;  %v2741_v23 = vsel %vm2705_vm1, %v2676_v61, %v8835_v44  ;;  %v8847_v61 = vld [vmem:[#allocation132_spill] sm:$0xff]  ;;  %v8848_v12 = vld [vmem:[#allocation185_spill] sm:$0xff] }
 0x3a4   :  { %v2257_v25 = vpop.permute.xlu1 %2256  ;;  %v2003_v43 = vpop.permute.xlu0 %2002  ;;  %v2806_v18 = vsel %vm2770_vm2, %v2741_v23, %v8837_v26 }
 0x3a5   :  { %v3063_v2 = vsel %vm3030_vm6, %v2998_v11, %v2257_v25  ;;  %v2999_v38 = vsel %vm2965_vm5, %v2934_v8, %v2003_v43  ;;  %v2742_v8 = vsel %vm2705_vm1, %v2677_v32, %v8841_v29 }
 0x3a6   :  { %2040 = vrot.lane.b32.xlu1 %v452_v6, %s4378_s26  ;;  %2550 = vrot.lane.b32.xlu0 %v579_v56, %s4380_s16  ;;  %v454_v6 = vld [vmem:[%s8454_s0 + $0x60c] sm:$0xff] }
 0x3a7   :  { %v8838_v56 = vld [vmem:[#allocation183_spill] sm:$0xff] }
 0x3a8   :  { %v2513_v24 = vpop.permute.xlu1 %2512  ;;  %v2259_v49 = vpop.permute.xlu0 %2258  ;;  %v2871_v28 = vsel %vm2835_vm3, %v2806_v18, %v8838_v56  ;;  %v457_v56 = vld [vmem:[%s8454_s0 + $0x64c] sm:$0xff] }
 0x3a9   :  { %v3128_v16 = vsel %vm3095_vm7, %v3063_v2, %v2513_v24  ;;  %v3064_v34 = vsel %vm3030_vm6, %v2999_v38, %v2259_v49  ;;  %v2936_v53 = vsel %vm2900_vm4, %v2871_v28, %v8839_v58  ;;  %v392_v38 = vld [vmem:[%s8454_s0 + $0x634] sm:$0xff]  ;;  %v456_v28 = vld [vmem:[%s8454_s0 + $0x644] sm:$0xff] }
 0x3aa   :  { %2296 = vrot.lane.b32.xlu1 %v516_v47, %s4379_s12  ;;  %2042 = vrot.lane.b32.xlu0 %v453_v57, %s4378_s26  ;;  %v519_v47 = vld [vmem:[%s8454_s0 + $0x615] sm:$0xff]  ;;  %v518_v57 = vld [vmem:[%s8454_s0 + $0x60d] sm:$0xff] }
 0x3ab   :  { %4298 = vmatprep.mubr.msk.f32.mxu1 %vm3176_vm8, %v3128_v16  ;;  %v53_v16 = vld [vmem:[%s8454_s0 + $0x3f8] sm:$0xff] }
 0x3ac   :  { %v2005_v5 = vpop.permute.xlu1 %2004  ;;  %v2515_v21 = vpop.permute.xlu0 %2514  ;;  %v2678_v51 = vsel %vm2640_vm0, %v53_v16, %v8844_v59  ;;  %v8853_v16 = vld [vmem:[#allocation188_spill] sm:$0xff]  ;;  %v8857_v59 = vld [vmem:[#allocation134_spill] sm:$0xff] }
 0x3ad   :  { %v3129_v63 = vsel %vm3095_vm7, %v3064_v34, %v2515_v21  ;;  %v3000_v31 = vsel %vm2965_vm5, %v2935_v36, %v2005_v5 }
 0x3ae   :  { %2552 = vrot.lane.b32.xlu1 %v580_v1, %s4380_s16  ;;  %2298 = vrot.lane.b32.xlu0 %v517_v60, %s4379_s12  ;;  %v582_v1 = vld [vmem:[%s8454_s0 + $0x60e] sm:$0xff]  ;;  %v8842_v60 = vld [vmem:[#allocation133_spill] sm:$0xff] }
 0x3af   :  { %v4252_v42 = vpop.f32.mrf.mxu0  ;;  %4299 = vmatmul.mubr.msk.f32.vlgmr.msra.gmra.mxu1 %vm3176_vm8, %v3129_v63  ;;  %v2807_v34 = vsel %vm2770_vm2, %v2742_v8, %v8842_v60 }
 0x3b0   :  { %v3441_v13 = vadd.f32 %v4252_v42, %v7524_v7  ;;  %v2261_v33 = vpop.permute.xlu1 %2260  ;;  %v2007_v14 = vpop.permute.xlu0 %2006  ;;  %v2872_v54 = vsel %vm2835_vm3, %v2807_v34, %v8843_v22  ;;  %v8845_v42 = vld [vmem:[#allocation240_spill] sm:$0xff] }
 0x3b1   :  { %v3435_v0 = vpop.f32.mrf.mxu0  ;;  %v3065_v46 = vsel %vm3030_vm6, %v3000_v31, %v2261_v33  ;;  %v3001_v11 = vsel %vm2965_vm5, %v2936_v53, %v2007_v14  ;;  %v393_v14 = vld [vmem:[%s8454_s0 + $0x63c] sm:$0xff] }
 0x3b2   :  { %v3755_v40 = vmax.f32 %v3441_v13, 0.0  ;;  %v3436_v62 = vadd.f32 %v7524_v7, %v3435_v0  ;;  %1790 = vrot.lane.b32.xlu1 %v391_v10, %s4377_s6  ;;  %2554 = vrot.lane.b32.xlu0 %v581_v48, %s4380_s16  ;;  %v2937_v10 = vsel %vm2900_vm4, %v2872_v54, %v8845_v42  ;;  %v2743_v13 = vsel %vm2705_vm1, %v2678_v51, %v8846_v4  ;;  %v394_v54 = vld [vmem:[%s8454_s0 + $0x66c] sm:$0xff] }
 0x3b3   :  { %v2808_v19 = vsel %vm2770_vm2, %v2743_v13, %v8847_v61  ;;  %v8858_v4 = vld [vmem:[#allocation187_spill] sm:$0xff] }
 0x3b4   :  { %3819 = vst [vmem:[%s8457_s3 + $0x8] sm:$0xff] %v3755_v40  ;;  %v3754_v25 = vmax.f32 %v3436_v62, 0.0  ;;  %v2517_v43 = vpop.permute.xlu1 %2516  ;;  %v2263_v30 = vpop.permute.xlu0 %2262  ;;  %v3953_v37 = vmul.f32 %v3755_v40, %v3755_v40  ;;  %v2873_v36 = vsel %vm2835_vm3, %v2808_v19, %v8848_v12  ;;  %v8849_v62 = vld [vmem:[#allocation239_spill] sm:$0xff] }
 0x3b5   :  { %v3130_v55 = vsel %vm3095_vm7, %v3065_v46, %v2517_v43  ;;  %v3066_v35 = vsel %vm3030_vm6, %v3001_v11, %v2263_v30  ;;  %v2938_v26 = vsel %vm2900_vm4, %v2873_v36, %v8849_v62  ;;  %v8851_v11 = vld [vmem:[#allocation82_spill] sm:$0xff] }
 0x3b6   :  { %3818 = vst [vmem:[%s8457_s3] sm:$0xff] %v3754_v25  ;;  %v3882_v9 = vadd.f32 %v3755_v40, %v3754_v25  ;;  %v3952_v17 = vmul.f32 %v3754_v25, %v3754_v25  ;;  %2046 = vrot.lane.b32.xlu1 %v455_v15, %s4378_s26  ;;  %2044 = vrot.lane.b32.xlu0 %v454_v6, %s4378_s26  ;;  %v54_v15 = vld [vmem:[%s8454_s0 + $0x428] sm:$0xff] }
 0x3b7   :  { %4301 = vmatprep.mubr.msk.f32.mxu1 %vm3176_vm8, %v3130_v55 }
 0x3b8   :  { %v4016_v3 = vadd.f32 %v3953_v37, %v3952_v17  ;;  %v2009_v2 = vpop.permute.xlu1 %2008  ;;  %v2519_v24 = vpop.permute.xlu0 %2518  ;;  %v8850_v37 = vld [vmem:[#allocation29_spill] sm:$0xff] }
 0x3b9   :  { %v3131_v49 = vsel %vm3095_vm7, %v3066_v35, %v2519_v24  ;;  %v3002_v33 = vsel %vm2965_vm5, %v2937_v10, %v2009_v2  ;;  %v520_v35 = vld [vmem:[%s8454_s0 + $0x645] sm:$0xff] }
 0x3ba   :  { %2302 = vrot.lane.b32.xlu1 %v519_v47, %s4379_s12  ;;  %2300 = vrot.lane.b32.xlu0 %v518_v57, %s4379_s12  ;;  %v8852_v2 = vld [vmem:[#allocation135_spill] sm:$0xff] }
 0x3bb   :  { %v4255_v20 = vpop.f32.mrf.mxu0  ;;  %4302 = vmatmul.mubr.msk.f32.gmra.mxu1 %vm3176_vm8, %v3131_v49 }
 0x3bc   :  { %v3451_v5 = vadd.f32 %v4255_v20, %v7524_v7  ;;  %v2265_v21 = vpop.permute.xlu1 %2264  ;;  %v2011_v63 = vpop.permute.xlu0 %2010  ;;  %v8854_v20 = vld [vmem:[#allocation28_spill] sm:$0xff] }
 0x3bd   :  { %v3445_v27 = vpop.f32.mrf.mxu0  ;;  %v3067_v50 = vsel %vm3030_vm6, %v3002_v33, %v2265_v21  ;;  %v3003_v6 = vsel %vm2965_vm5, %v2938_v26, %v2011_v63  ;;  %v8856_v21 = vld [vmem:[#allocation81_spill] sm:$0xff] }
 0x3be   :  { %v3757_v48 = vmax.f32 %v3451_v5, 0.0  ;;  %v3446_v39 = vadd.f32 %v7524_v7, %v3445_v27  ;;  %1792 = vrot.lane.b32.xlu1 %v392_v38, %s4377_s6  ;;  %2556 = vrot.lane.b32.xlu0 %v582_v1, %s4380_s16  ;;  %v2680_v38 = vsel %vm2640_vm0, %v55_v41, %v8854_v20  ;;  %v8855_v1 = vld [vmem:[#allocation242_spill] sm:$0xff]  ;;  %v8867_v20 = vld [vmem:[#allocation136_spill] sm:$0xff] }
 0x3bf   :  { %v2745_v63 = vsel %vm2705_vm1, %v2680_v38, %v8856_v21  ;;  %v584_v27 = vld [vmem:[%s8454_s0 + $0x646] sm:$0xff]  ;;  %v8868_v21 = vld [vmem:[#allocation189_spill] sm:$0xff] }
 0x3c0   :  { %3821 = vst [vmem:[%s8457_s3 + $0x18] sm:$0xff] %v3757_v48  ;;  %v3756_v0 = vmax.f32 %v3446_v39, 0.0  ;;  %v2521_v44 = vpop.permute.xlu1 %2520  ;;  %v2267_v23 = vpop.permute.xlu0 %2266  ;;  %v3955_v46 = vmul.f32 %v3757_v48, %v3757_v48  ;;  %v2810_v51 = vsel %vm2770_vm2, %v2745_v63, %v8857_v59  ;;  %v8863_v41 = vld [vmem:[#allocation190_spill] sm:$0xff] }
 0x3c1   :  { %v3132_v40 = vsel %vm3095_vm7, %v3067_v50, %v2521_v44  ;;  %v3068_v43 = vsel %vm3030_vm6, %v3003_v6, %v2267_v23  ;;  %v2875_v13 = vsel %vm2835_vm3, %v2810_v51, %v8858_v4  ;;  %v56_v50 = vld [vmem:[%s8454_s0 + $0x460] sm:$0xff]  ;;  %v395_v44 = vld [vmem:[%s8454_s0 + $0x674] sm:$0xff] }
 0x3c2   :  { %3820 = vst [vmem:[%s8457_s3 + $0x10] sm:$0xff] %v3756_v0  ;;  %v3883_v18 = vadd.f32 %v3882_v9, %v3756_v0  ;;  %v3954_v31 = vmul.f32 %v3756_v0, %v3756_v0  ;;  %1794 = vrot.lane.b32.xlu1 %v393_v14, %s4377_s6  ;;  %2558 = vrot.lane.b32.xlu0 %v583_v52, %s4380_s16  ;;  %v8859_v14 = vld [vmem:[#allocation241_spill] sm:$0xff]  ;;  %v585_v23 = vld [vmem:[%s8454_s0 + $0x64e] sm:$0xff] }
 0x3c3   :  { %4304 = vmatprep.mubr.msk.f32.mxu1 %vm3176_vm8, %v3132_v40  ;;  %v2679_v9 = vsel %vm2640_vm0, %v54_v15, %v8850_v37  ;;  %v2940_v52 = vsel %vm2900_vm4, %v2875_v13, %v8859_v14  ;;  %v8860_v15 = vld [vmem:[#allocation31_spill] sm:$0xff] }
 0x3c4   :  { %v4017_v25 = vadd.f32 %v4016_v3, %v3954_v31  ;;  %v2013_v30 = vpop.permute.xlu1 %2012  ;;  %v2523_v58 = vpop.permute.xlu0 %2522  ;;  %v3884_v53 = vadd.f32 %v3883_v18, %v3757_v48  ;;  %v2744_v47 = vsel %vm2705_vm1, %v2679_v9, %v8851_v11  ;;  %v521_v3 = vld [vmem:[%s8454_s0 + $0x64d] sm:$0xff]  ;;  %v2681_v6 = vsel %vm2640_vm0, %v56_v50, %v8860_v15  ;;  %v8870_v50 = vld [vmem:[#allocation33_spill] sm:$0xff] }
 0x3c5   :  { %v3133_v55 = vsel %vm3095_vm7, %v3068_v43, %v2523_v58  ;;  %v2809_v24 = vsel %vm2770_vm2, %v2744_v47, %v8852_v2  ;;  %v458_v58 = vld [vmem:[%s8454_s0 + $0x67c] sm:$0xff] }
 0x3c6   :  { %2050 = vrot.lane.b32.xlu1 %v457_v56, %s4378_s26  ;;  %2048 = vrot.lane.b32.xlu0 %v456_v28, %s4378_s26  ;;  %v4018_v17 = vadd.f32 %v4017_v25, %v3955_v46  ;;  %v2874_v29 = vsel %vm2835_vm3, %v2809_v24, %v8853_v16  ;;  %v57_v28 = vld [vmem:[%s8454_s0 + $0x468] sm:$0xff]  ;;  %v8861_v46 = vld [vmem:[#allocation84_spill] sm:$0xff] }
 0x3c7   :  { %v4258_v57 = vpop.f32.mrf.mxu0  ;;  %4305 = vmatmul.mubr.msk.f32.gmra.mxu1 %vm3176_vm8, %v3133_v55  ;;  %v2939_v60 = vsel %vm2900_vm4, %v2874_v29, %v8855_v1  ;;  %v2746_v25 = vsel %vm2705_vm1, %v2681_v6, %v8861_v46  ;;  %v523_v29 = vld [vmem:[%s8454_s0 + $0x685] sm:$0xff] }
 0x3c8   :  { %v3461_v49 = vadd.f32 %v4258_v57, %v7524_v7  ;;  %v2269_v45 = vpop.permute.xlu1 %2268  ;;  %v2015_v32 = vpop.permute.xlu0 %2014  ;;  %v3004_v22 = vsel %vm2965_vm5, %v2939_v60, %v2013_v30  ;;  %v459_v30 = vld [vmem:[%s8454_s0 + $0x684] sm:$0xff] }
 0x3c9   :  { %v3455_v8 = vpop.f32.mrf.mxu0  ;;  %v3069_v42 = vsel %vm3030_vm6, %v3004_v22, %v2269_v45  ;;  %v3005_v0 = vsel %vm2965_vm5, %v2940_v52, %v2015_v32  ;;  %v8864_v57 = vld [vmem:[#allocation30_spill] sm:$0xff]  ;;  %v8866_v45 = vld [vmem:[#allocation83_spill] sm:$0xff] }
 0x3ca   :  { %v3759_v34 = vmax.f32 %v3461_v49, 0.0  ;;  %v3456_v5 = vadd.f32 %v7524_v7, %v3455_v8  ;;  %2306 = vrot.lane.b32.xlu1 %v521_v3, %s4379_s12  ;;  %2304 = vrot.lane.b32.xlu0 %v520_v35, %s4379_s12  ;;  %v2682_v3 = vsel %vm2640_vm0, %v57_v28, %v8864_v57  ;;  %v8865_v35 = vld [vmem:[#allocation244_spill] sm:$0xff]  ;;  %v522_v8 = vld [vmem:[%s8454_s0 + $0x67d] sm:$0xff] }
 0x3cb   :  { %v2747_v32 = vsel %vm2705_vm1, %v2682_v3, %v8866_v45  ;;  %v8873_v28 = vld [vmem:[#allocation192_spill] sm:$0xff]  ;;  %v8877_v57 = vld [vmem:[#allocation138_spill] sm:$0xff]  ;;  %v8878_v45 = vld [vmem:[#allocation191_spill] sm:$0xff] }
 0x3cc   :  { %3823 = vst [vmem:[%s8457_s3 + $0x28] sm:$0xff] %v3759_v34  ;;  %v3758_v10 = vmax.f32 %v3456_v5, 0.0  ;;  %v2525_v48 = vpop.permute.xlu1 %2524  ;;  %v2271_v39 = vpop.permute.xlu0 %2270  ;;  %v3957_v12 = vmul.f32 %v3759_v34, %v3759_v34  ;;  %v2812_v38 = vsel %vm2770_vm2, %v2747_v32, %v8867_v20 }
 0x3cd   :  { %v3134_v33 = vsel %vm3095_vm7, %v3069_v42, %v2525_v48  ;;  %v3070_v40 = vsel %vm3030_vm6, %v3005_v0, %v2271_v39  ;;  %v2877_v63 = vsel %vm2835_vm3, %v2812_v38, %v8868_v21  ;;  %v58_v42 = vld [vmem:[%s8454_s0 + $0x498] sm:$0xff]  ;;  %v396_v48 = vld [vmem:[%s8454_s0 + $0x6a4] sm:$0xff] }
 0x3ce   :  { %3822 = vst [vmem:[%s8457_s3 + $0x20] sm:$0xff] %v3758_v10  ;;  %v3885_v61 = vadd.f32 %v3884_v53, %v3758_v10  ;;  %v3956_v19 = vmul.f32 %v3758_v10, %v3758_v10  ;;  %1796 = vrot.lane.b32.xlu1 %v394_v54, %s4377_s6  ;;  %2560 = vrot.lane.b32.xlu0 %v584_v27, %s4380_s16  ;;  %v8862_v53 = vld [vmem:[#allocation137_spill] sm:$0xff]  ;;  %v8869_v54 = vld [vmem:[#allocation243_spill] sm:$0xff] }
 0x3cf   :  { %4307 = vmatprep.mubr.msk.f32.mxu1 %vm3176_vm8, %v3134_v33  ;;  %v2811_v55 = vsel %vm2770_vm2, %v2746_v25, %v8862_v53  ;;  %v2942_v27 = vsel %vm2900_vm4, %v2877_v63, %v8869_v54  ;;  %v586_v39 = vld [vmem:[%s8454_s0 + $0x67e] sm:$0xff]  ;;  %v2683_v0 = vsel %vm2640_vm0, %v58_v42, %v8870_v50  ;;  %v8880_v42 = vld [vmem:[#allocation35_spill] sm:$0xff] }
 0x3d0   :  { %v4019_v36 = vadd.f32 %v4018_v17, %v3956_v19  ;;  %v2017_v62 = vpop.permute.xlu1 %2016  ;;  %v2527_v26 = vpop.permute.xlu0 %2526  ;;  %v3886_v18 = vadd.f32 %v3885_v61, %v3759_v34  ;;  %v2876_v11 = vsel %vm2835_vm3, %v2811_v55, %v8863_v41 }
 0x3d1   :  { %v3135_v31 = vsel %vm3095_vm7, %v3070_v40, %v2527_v26  ;;  %v2941_v2 = vsel %vm2900_vm4, %v2876_v11, %v8865_v35  ;;  %v587_v26 = vld [vmem:[%s8454_s0 + $0x686] sm:$0xff]  ;;  %v461_v11 = vld [vmem:[%s8454_s0 + $0x6bc] sm:$0xff] }
 0x3d2   :  { %1798 = vrot.lane.b32.xlu1 %v395_v44, %s4377_s6  ;;  %2562 = vrot.lane.b32.xlu0 %v585_v23, %s4380_s16  ;;  %v4020_v56 = vadd.f32 %v4019_v36, %v3957_v12  ;;  %v3006_v16 = vsel %vm2965_vm5, %v2941_v2, %v2017_v62  ;;  %v59_v23 = vld [vmem:[%s8454_s0 + $0x4a0] sm:$0xff]  ;;  %v397_v62 = vld [vmem:[%s8454_s0 + $0x6ac] sm:$0xff] }
 0x3d3   :  { %v4261_v43 = vpop.f32.mrf.mxu0  ;;  %4308 = vmatmul.mubr.msk.f32.gmra.mxu1 %vm3176_vm8, %v3135_v31  ;;  %v8871_v12 = vld [vmem:[#allocation86_spill] sm:$0xff] }
 0x3d4   :  { %v3471_v37 = vadd.f32 %v4261_v43, %v7524_v7  ;;  %v2273_v9 = vpop.permute.xlu1 %2272  ;;  %v2019_v17 = vpop.permute.xlu0 %2018  ;;  %v2748_v36 = vsel %vm2705_vm1, %v2683_v0, %v8871_v12  ;;  %v8874_v43 = vld [vmem:[#allocation32_spill] sm:$0xff] }
 0x3d5   :  { %v3465_v47 = vpop.f32.mrf.mxu0  ;;  %v3071_v1 = vsel %vm3030_vm6, %v3006_v16, %v2273_v9  ;;  %v3007_v10 = vsel %vm2965_vm5, %v2942_v27, %v2019_v17  ;;  %v8876_v9 = vld [vmem:[#allocation85_spill] sm:$0xff] }
 0x3d6   :  { %v3761_v24 = vmax.f32 %v3471_v37, 0.0  ;;  %v3466_v49 = vadd.f32 %v7524_v7, %v3465_v47  ;;  %2054 = vrot.lane.b32.xlu1 %v459_v30, %s4378_s26  ;;  %2052 = vrot.lane.b32.xlu0 %v458_v58, %s4378_s26  ;;  %v2684_v30 = vsel %vm2640_vm0, %v59_v23, %v8874_v43  ;;  %v8875_v58 = vld [vmem:[#allocation246_spill] sm:$0xff]  ;;  %v460_v47 = vld [vmem:[%s8454_s0 + $0x6b4] sm:$0xff] }
 0x3d7   :  { %v2749_v17 = vsel %vm2705_vm1, %v2684_v30, %v8876_v9  ;;  %v8883_v23 = vld [vmem:[#allocation194_spill] sm:$0xff]  ;;  %v8887_v43 = vld [vmem:[#allocation140_spill] sm:$0xff]  ;;  %v8888_v9 = vld [vmem:[#allocation193_spill] sm:$0xff] }
 0x3d8   :  { %3825 = vst [vmem:[%s8457_s3 + $0x38] sm:$0xff] %v3761_v24  ;;  %v3760_v60 = vmax.f32 %v3466_v49, 0.0  ;;  %v2529_v34 = vpop.permute.xlu1 %2528  ;;  %v2275_v5 = vpop.permute.xlu0 %2274  ;;  %v3959_v4 = vmul.f32 %v3761_v24, %v3761_v24  ;;  %v2814_v3 = vsel %vm2770_vm2, %v2749_v17, %v8877_v57 }
 0x3d9   :  { %v3136_v22 = vsel %vm3095_vm7, %v3071_v1, %v2529_v34  ;;  %v3072_v33 = vsel %vm3030_vm6, %v3007_v10, %v2275_v5  ;;  %v2879_v32 = vsel %vm2835_vm3, %v2814_v3, %v8878_v45  ;;  %v60_v1 = vld [vmem:[%s8454_s0 + $0x4d0] sm:$0xff]  ;;  %v525_v34 = vld [vmem:[%s8454_s0 + $0x6bd] sm:$0xff] }
 0x3da   :  { %3824 = vst [vmem:[%s8457_s3 + $0x30] sm:$0xff] %v3760_v60  ;;  %v3887_v59 = vadd.f32 %v3886_v18, %v3760_v60  ;;  %v3958_v51 = vmul.f32 %v3760_v60, %v3760_v60  ;;  %2310 = vrot.lane.b32.xlu1 %v523_v29, %s4379_s12  ;;  %2308 = vrot.lane.b32.xlu0 %v522_v8, %s4379_s12  ;;  %v8872_v18 = vld [vmem:[#allocation139_spill] sm:$0xff]  ;;  %v8879_v29 = vld [vmem:[#allocation245_spill] sm:$0xff] }
 0x3db   :  { %4310 = vmatprep.mubr.msk.f32.mxu1 %vm3176_vm8, %v3136_v22  ;;  %v2813_v31 = vsel %vm2770_vm2, %v2748_v36, %v8872_v18  ;;  %v2944_v8 = vsel %vm2900_vm4, %v2879_v32, %v8879_v29  ;;  %v524_v5 = vld [vmem:[%s8454_s0 + $0x6b5] sm:$0xff]  ;;  %v2685_v10 = vsel %vm2640_vm0, %v60_v1, %v8880_v42 }
 0x3dc   :  { %v4021_v13 = vadd.f32 %v4020_v56, %v3958_v51  ;;  %v2021_v14 = vpop.permute.xlu1 %2020  ;;  %v2531_v52 = vpop.permute.xlu0 %2530  ;;  %v3888_v61 = vadd.f32 %v3887_v59, %v3761_v24  ;;  %v2878_v46 = vsel %vm2835_vm3, %v2813_v31, %v8873_v28  ;;  %v8890_v1 = vld [vmem:[#allocation37_spill] sm:$0xff] }
 0x3dd   :  { %v3137_v19 = vsel %vm3095_vm7, %v3072_v33, %v2531_v52  ;;  %v2943_v53 = vsel %vm2900_vm4, %v2878_v46, %v8875_v58  ;;  %v588_v52 = vld [vmem:[%s8454_s0 + $0x6b6] sm:$0xff]  ;;  %v399_v46 = vld [vmem:[%s8454_s0 + $0x6e4] sm:$0xff] }
 0x3de   :  { %1800 = vrot.lane.b32.xlu1 %v396_v48, %s4377_s6  ;;  %2564 = vrot.lane.b32.xlu0 %v586_v39, %s4380_s16  ;;  %v4022_v44 = vadd.f32 %v4021_v13, %v3959_v4  ;;  %v3008_v41 = vsel %vm2965_vm5, %v2943_v53, %v2021_v14  ;;  %v61_v39 = vld [vmem:[%s8454_s0 + $0x4d8] sm:$0xff]  ;;  %v8881_v4 = vld [vmem:[#allocation88_spill] sm:$0xff] }
 0x3df   :  { %v4264_v40 = vpop.f32.mrf.mxu0  ;;  %4311 = vmatmul.mubr.msk.f32.gmra.mxu1 %vm3176_vm8, %v3137_v19  ;;  %v2750_v13 = vsel %vm2705_vm1, %v2685_v10, %v8881_v4  ;;  %v398_v14 = vld [vmem:[%s8454_s0 + $0x6dc] sm:$0xff] }
 0x3e0   :  { %v3481_v15 = vadd.f32 %v4264_v40, %v7524_v7  ;;  %v2277_v6 = vpop.permute.xlu1 %2276  ;;  %v2023_v56 = vpop.permute.xlu0 %2022  ;;  %v8884_v40 = vld [vmem:[#allocation34_spill] sm:$0xff] }
 0x3e1   :  { %v3475_v25 = vpop.f32.mrf.mxu0  ;;  %v3073_v35 = vsel %vm3030_vm6, %v3008_v41, %v2277_v6  ;;  %v3009_v60 = vsel %vm2965_vm5, %v2944_v8, %v2023_v56  ;;  %v8886_v6 = vld [vmem:[#allocation87_spill] sm:$0xff] }
 0x3e2   :  { %v3763_v55 = vmax.f32 %v3481_v15, 0.0  ;;  %v3476_v37 = vadd.f32 %v7524_v7, %v3475_v25  ;;  %1802 = vrot.lane.b32.xlu1 %v397_v62, %s4377_s6  ;;  %2566 = vrot.lane.b32.xlu0 %v587_v26, %s4380_s16  ;;  %v2686_v62 = vsel %vm2640_vm0, %v61_v39, %v8884_v40  ;;  %v8885_v26 = vld [vmem:[#allocation248_spill] sm:$0xff]  ;;  %v589_v25 = vld [vmem:[%s8454_s0 + $0x6be] sm:$0xff] }
 0x3e3   :  { %v2751_v56 = vsel %vm2705_vm1, %v2686_v62, %v8886_v6  ;;  %v8893_v39 = vld [vmem:[#allocation196_spill] sm:$0xff]  ;;  %v8897_v40 = vld [vmem:[#allocation142_spill] sm:$0xff]  ;;  %v8898_v6 = vld [vmem:[#allocation195_spill] sm:$0xff] }
 0x3e4   :  { %3827 = vst [vmem:[%s8457_s3 + $0x48] sm:$0xff] %v3763_v55  ;;  %v3762_v2 = vmax.f32 %v3476_v37, 0.0  ;;  %v2533_v24 = vpop.permute.xlu1 %2532  ;;  %v2279_v49 = vpop.permute.xlu0 %2278  ;;  %v3961_v21 = vmul.f32 %v3763_v55, %v3763_v55  ;;  %v2816_v30 = vsel %vm2770_vm2, %v2751_v56, %v8887_v43 }
 0x3e5   :  { %v3138_v16 = vsel %vm3095_vm7, %v3073_v35, %v2533_v24  ;;  %v3074_v22 = vsel %vm3030_vm6, %v3009_v60, %v2279_v49  ;;  %v2881_v17 = vsel %vm2835_vm3, %v2816_v30, %v8888_v9  ;;  %v62_v35 = vld [vmem:[%s8454_s0 + $0x508] sm:$0xff]  ;;  %v463_v24 = vld [vmem:[%s8454_s0 + $0x6f4] sm:$0xff] }
 0x3e6   :  { %3826 = vst [vmem:[%s8457_s3 + $0x40] sm:$0xff] %v3762_v2  ;;  %v3889_v20 = vadd.f32 %v3888_v61, %v3762_v2  ;;  %v3960_v38 = vmul.f32 %v3762_v2, %v3762_v2  ;;  %2058 = vrot.lane.b32.xlu1 %v461_v11, %s4378_s26  ;;  %2056 = vrot.lane.b32.xlu0 %v460_v47, %s4378_s26  ;;  %v8882_v61 = vld [vmem:[#allocation141_spill] sm:$0xff]  ;;  %v8889_v11 = vld [vmem:[#allocation247_spill] sm:$0xff] }
 0x3e7   :  { %4313 = vmatprep.mubr.msk.f32.mxu1 %vm3176_vm8, %v3138_v16  ;;  %v2815_v19 = vsel %vm2770_vm2, %v2750_v13, %v8882_v61  ;;  %v2946_v47 = vsel %vm2900_vm4, %v2881_v17, %v8889_v11  ;;  %v462_v49 = vld [vmem:[%s8454_s0 + $0x6ec] sm:$0xff]  ;;  %v2687_v60 = vsel %vm2640_vm0, %v62_v35, %v8890_v1 }
 0x3e8   :  { %v4023_v63 = vadd.f32 %v4022_v44, %v3960_v38  ;;  %v2025_v54 = vpop.permute.xlu1 %2024  ;;  %v2535_v27 = vpop.permute.xlu0 %2534  ;;  %v3890_v59 = vadd.f32 %v3889_v20, %v3763_v55  ;;  %v2880_v12 = vsel %vm2835_vm3, %v2815_v19, %v8883_v23 }
 0x3e9   :  { %v3139_v51 = vsel %vm3095_vm7, %v3074_v22, %v2535_v27  ;;  %v2945_v18 = vsel %vm2900_vm4, %v2880_v12, %v8885_v26  ;;  %v526_v27 = vld [vmem:[%s8454_s0 + $0x6ed] sm:$0xff]  ;;  %v591_v12 = vld [vmem:[%s8454_s0 + $0x6f6] sm:$0xff] }
 0x3ea   :  { %2314 = vrot.lane.b32.xlu1 %v525_v34, %s4379_s12  ;;  %2312 = vrot.lane.b32.xlu0 %v524_v5, %s4379_s12  ;;  %v4024_v48 = vadd.f32 %v4023_v63, %v3961_v21  ;;  %v3010_v28 = vsel %vm2965_vm5, %v2945_v18, %v2025_v54  ;;  %v63_v5 = vld [vmem:[%s8454_s0 + $0x510] sm:$0xff]  ;;  %v8891_v21 = vld [vmem:[#allocation90_spill] sm:$0xff] }
 0x3eb   :  { %v4267_v33 = vpop.f32.mrf.mxu0  ;;  %4314 = vmatmul.mubr.msk.f32.gmra.mxu1 %vm3176_vm8, %v3139_v51  ;;  %v2752_v63 = vsel %vm2705_vm1, %v2687_v60, %v8891_v21  ;;  %v527_v54 = vld [vmem:[%s8454_s0 + $0x6f5] sm:$0xff] }
 0x3ec   :  { %v3491_v50 = vadd.f32 %v4267_v33, %v7524_v7  ;;  %v2281_v0 = vpop.permute.xlu1 %2280  ;;  %v2027_v44 = vpop.permute.xlu0 %2026  ;;  %v8894_v33 = vld [vmem:[#allocation36_spill] sm:$0xff] }
 0x3ed   :  { %v3485_v36 = vpop.f32.mrf.mxu0  ;;  %v3075_v58 = vsel %vm3030_vm6, %v3010_v28, %v2281_v0  ;;  %v3011_v2 = vsel %vm2965_vm5, %v2946_v47, %v2027_v44  ;;  %v8896_v0 = vld [vmem:[#allocation89_spill] sm:$0xff]  ;;  %v8905_v21 = vld [vmem:[#allocation252_spill] sm:$0xff] }
 0x3ee   :  { %v3765_v31 = vmax.f32 %v3491_v50, 0.0  ;;  %v3486_v15 = vadd.f32 %v7524_v7, %v3485_v36  ;;  %1804 = vrot.lane.b32.xlu1 %v398_v14, %s4377_s6  ;;  %2568 = vrot.lane.b32.xlu0 %v588_v52, %s4380_s16  ;;  %v2688_v14 = vsel %vm2640_vm0, %v63_v5, %v8894_v33  ;;  %v8895_v52 = vld [vmem:[#allocation250_spill] sm:$0xff]  ;;  %v590_v36 = vld [vmem:[%s8454_s0 + $0x6ee] sm:$0xff]  ;;  %v8908_v33 = vld [vmem:[#allocation197_spill] sm:$0xff] }
 0x3ef   :  { %v2753_v44 = vsel %vm2705_vm1, %v2688_v14, %v8896_v0 }
 0x3f0   :  { %3829 = vst [vmem:[%s8457_s3 + $0x58] sm:$0xff] %v3765_v31  ;;  %v3764_v53 = vmax.f32 %v3486_v15, 0.0  ;;  %v2537_v55 = vpop.permute.xlu1 %2536  ;;  %v2283_v37 = vpop.permute.xlu0 %2282  ;;  %v3963_v45 = vmul.f32 %v3765_v31, %v3765_v31  ;;  %v2818_v62 = vsel %vm2770_vm2, %v2753_v44, %v8897_v40  ;;  %v66_v44 = vld [vmem:[%s8454_s0 + $0x578] sm:$0xff] }
 0x3f1   :  { %v3140_v41 = vsel %vm3095_vm7, %v3075_v58, %v2537_v55  ;;  %v3076_v16 = vsel %vm3030_vm6, %v3011_v2, %v2283_v37  ;;  %v2883_v56 = vsel %vm2835_vm3, %v2818_v62, %v8898_v6  ;;  %v64_v58 = vld [vmem:[%s8454_s0 + $0x540] sm:$0xff]  ;;  %v65_v2 = vld [vmem:[%s8454_s0 + $0x548] sm:$0xff] }
 0x3f2   :  { %3828 = vst [vmem:[%s8457_s3 + $0x50] sm:$0xff] %v3764_v53  ;;  %v3891_v57 = vadd.f32 %v3890_v59, %v3764_v53  ;;  %v3962_v3 = vmul.f32 %v3764_v53, %v3764_v53  ;;  %1806 = vrot.lane.b32.xlu1 %v399_v46, %s4377_s6  ;;  %2570 = vrot.lane.b32.xlu0 %v589_v25, %s4380_s16  ;;  %v8892_v59 = vld [vmem:[#allocation143_spill] sm:$0xff]  ;;  %v8899_v46 = vld [vmem:[#allocation249_spill] sm:$0xff] }
 0x3f3   :  { %4316 = vmatprep.mubr.msk.f32.mxu1 %vm3176_vm8, %v3140_v41  ;;  %v2817_v51 = vsel %vm2770_vm2, %v2752_v63, %v8892_v59  ;;  %v2948_v25 = vsel %vm2900_vm4, %v2883_v56, %v8899_v46  ;;  %v8911_v46 = vld [vmem:[#allocation94_spill] sm:$0xff] }
 0x3f4   :  { %v4025_v32 = vadd.f32 %v4024_v48, %v3962_v3  ;;  %v2029_v29 = vpop.permute.xlu1 %2028  ;;  %v2539_v8 = vpop.permute.xlu0 %2538  ;;  %v3892_v20 = vadd.f32 %v3891_v57, %v3765_v31  ;;  %v2882_v4 = vsel %vm2835_vm3, %v2817_v51, %v8893_v39  ;;  %v8900_v57 = vld [vmem:[#allocation39_spill] sm:$0xff] }
 0x3f5   :  { %v3141_v38 = vsel %vm3095_vm7, %v3076_v16, %v2539_v8  ;;  %v2947_v61 = vsel %vm2900_vm4, %v2882_v4, %v8895_v52  ;;  %v2689_v3 = vsel %vm2640_vm0, %v64_v58, %v8900_v57  ;;  %v8915_v57 = vld [vmem:[#allocation254_spill] sm:$0xff] }
 0x3f6   :  { %2062 = vrot.lane.b32.xlu1 %v463_v24, %s4378_s26  ;;  %2060 = vrot.lane.b32.xlu0 %v462_v49, %s4378_s26  ;;  %v4026_v34 = vadd.f32 %v4025_v32, %v3963_v45  ;;  %v3012_v23 = vsel %vm2965_vm5, %v2947_v61, %v2029_v29  ;;  %v8901_v24 = vld [vmem:[#allocation92_spill] sm:$0xff]  ;;  %v8902_v32 = vld [vmem:[#allocation145_spill] sm:$0xff]  ;;  %v8909_v61 = vld [vmem:[#allocation251_spill] sm:$0xff] }
 0x3f7   :  { %v4270_v22 = vpop.f32.mrf.mxu0  ;;  %4317 = vmatmul.mubr.msk.f32.gmra.mxu1 %vm3176_vm8, %v3141_v38  ;;  %v2754_v49 = vsel %vm2705_vm1, %v2689_v3, %v8901_v24  ;;  %v8903_v38 = vld [vmem:[#allocation198_spill] sm:$0xff]  ;;  %v8916_v24 = vld [vmem:[#allocation93_spill] sm:$0xff] }
 0x3f8   :  { %v3501_v42 = vadd.f32 %v4270_v22, %v7524_v7  ;;  %v2285_v10 = vpop.permute.xlu1 %2284  ;;  %v2031_v48 = vpop.permute.xlu0 %2030  ;;  %v2819_v16 = vsel %vm2770_vm2, %v2754_v49, %v8902_v32  ;;  %v8917_v32 = vld [vmem:[#allocation146_spill] sm:$0xff] }
 0x3f9   :  { %v3495_v13 = vpop.f32.mrf.mxu0  ;;  %v3077_v26 = vsel %vm3030_vm6, %v3012_v23, %v2285_v10  ;;  %v3013_v53 = vsel %vm2965_vm5, %v2948_v25, %v2031_v48  ;;  %v2884_v1 = vsel %vm2835_vm3, %v2819_v16, %v8903_v38 }
 0x3fa   :  { %v3767_v19 = vmax.f32 %v3501_v42, 0.0  ;;  %v3496_v50 = vadd.f32 %v7524_v7, %v3495_v13  ;;  %2318 = vrot.lane.b32.xlu1 %v527_v54, %s4379_s12  ;;  %2316 = vrot.lane.b32.xlu0 %v526_v27, %s4379_s12  ;;  %v2949_v63 = vsel %vm2900_vm4, %v2884_v1, %v8905_v21  ;;  %v8906_v27 = vld [vmem:[#allocation91_spill] sm:$0xff]  ;;  %v8907_v42 = vld [vmem:[#allocation144_spill] sm:$0xff] }
 0x3fb   :  { %v8918_v1 = vld [vmem:[#allocation199_spill] sm:$0xff] }
 0x3fc   :  { %3831 = vst [vmem:[%s8457_s3 + $0x68] sm:$0xff] %v3767_v19  ;;  %v3766_v18 = vmax.f32 %v3496_v50, 0.0  ;;  %v2541_v31 = vpop.permute.xlu1 %2540  ;;  %v2287_v15 = vpop.permute.xlu0 %2286  ;;  %v3965_v55 = vmul.f32 %v3767_v19, %v3767_v19 }
 0x3fd   :  { %v3142_v28 = vsel %vm3095_vm7, %v3077_v26, %v2541_v31  ;;  %v3078_v9 = vsel %vm3030_vm6, %v3013_v53, %v2287_v15  ;;  %v8910_v15 = vld [vmem:[#allocation41_spill] sm:$0xff] }
 0x3fe   :  { %3830 = vst [vmem:[%s8457_s3 + $0x60] sm:$0xff] %v3766_v18  ;;  %v3893_v43 = vadd.f32 %v3892_v20, %v3766_v18  ;;  %v3964_v30 = vmul.f32 %v3766_v18, %v3766_v18  ;;  %2574 = vrot.lane.b32.xlu1 %v591_v12, %s4380_s16  ;;  %2572 = vrot.lane.b32.xlu0 %v590_v36, %s4380_s16 }
 0x3ff   :  { %4319 = vmatprep.mubr.msk.f32.mxu1 %vm3176_vm8, %v3142_v28  ;;  %v2691_v6 = vsel %vm2640_vm0, %v66_v44, %v8910_v15  ;;  %v67_v28 = vld [vmem:[%s8454_s0 + $0x580] sm:$0xff]  ;;  %v8925_v15 = vld [vmem:[#allocation256_spill] sm:$0xff] }
 0x400   :  { %v4027_v37 = vadd.f32 %v4026_v34, %v3964_v30  ;;  %v2033_v17 = vpop.permute.xlu1 %2032  ;;  %v2543_v41 = vpop.permute.xlu0 %2542  ;;  %v3894_v11 = vadd.f32 %v3893_v43, %v3767_v19  ;;  %v8904_v34 = vld [vmem:[#allocation38_spill] sm:$0xff]  ;;  %v2756_v25 = vsel %vm2705_vm1, %v2691_v6, %v8911_v46  ;;  %v8912_v30 = vld [vmem:[#allocation147_spill] sm:$0xff] }
 0x401   :  { %v3143_v47 = vsel %vm3095_vm7, %v3078_v9, %v2543_v41  ;;  %v2690_v5 = vsel %vm2640_vm0, %v65_v2, %v8904_v34  ;;  %v3014_v51 = vsel %vm2965_vm5, %v2949_v63, %v2033_v17  ;;  %v2821_v58 = vsel %vm2770_vm2, %v2756_v25, %v8912_v30  ;;  %v8913_v9 = vld [vmem:[#allocation200_spill] sm:$0xff]  ;;  %v8926_v46 = vld [vmem:[#allocation95_spill] sm:$0xff] }
 0x402   :  { %4320 = vmatmul.mubr.msk.f32.gmra.mxu1 %vm3176_vm8, %v3143_v47  ;;  %v4028_v35 = vadd.f32 %v4027_v37, %v3965_v55  ;;  %v2755_v59 = vsel %vm2705_vm1, %v2690_v5, %v8906_v27  ;;  %v2886_v17 = vsel %vm2835_vm3, %v2821_v58, %v8913_v9  ;;  %v8919_v5 = vld [vmem:[#allocation253_spill] sm:$0xff]  ;;  %v8927_v30 = vld [vmem:[#allocation148_spill] sm:$0xff] }
 0x403   :  { %v4273_v45 = vpop.f32.mrf.mxu0  ;;  %v2820_v10 = vsel %vm2770_vm2, %v2755_v59, %v8907_v42  ;;  %v2951_v3 = vsel %vm2900_vm4, %v2886_v17, %v8915_v57  ;;  %v8928_v17 = vld [vmem:[#allocation201_spill] sm:$0xff] }
 0x404   :  { %v3511_v29 = vadd.f32 %v4273_v45, %v7524_v7  ;;  %v2289_v8 = vpop.permute.xlu1 %2288  ;;  %v2035_v20 = vpop.permute.xlu0 %2034  ;;  %v2885_v14 = vsel %vm2835_vm3, %v2820_v10, %v8908_v33 }
 0x405   :  { %v3505_v60 = vpop.f32.mrf.mxu0  ;;  %v3079_v48 = vsel %vm3030_vm6, %v3014_v51, %v2289_v8  ;;  %v2950_v19 = vsel %vm2900_vm4, %v2885_v14, %v8909_v61  ;;  %v8921_v61 = vld [vmem:[#allocation96_spill] sm:$0xff] }
 0x406   :  { %v3769_v22 = vmax.f32 %v3511_v29, 0.0  ;;  %v3506_v54 = vadd.f32 %v7524_v7, %v3505_v60  ;;  %v3015_v23 = vsel %vm2965_vm5, %v2950_v19, %v2035_v20 }
 0x408   :  { %3833 = vst [vmem:[%s8457_s3 + $0x78] sm:$0xff] %v3769_v22  ;;  %v3768_v39 = vmax.f32 %v3506_v54, 0.0  ;;  %v2545_v4 = vpop.permute.xlu1 %2544  ;;  %v2291_v13 = vpop.permute.xlu0 %2290  ;;  %v3967_v12 = vmul.f32 %v3769_v22, %v3769_v22  ;;  %v68_v54 = vld [vmem:[%s8454_s0 + $0x5b0] sm:$0xff] }
 0x409   :  { %v3144_v52 = vsel %vm3095_vm7, %v3079_v48, %v2545_v4  ;;  %v3080_v40 = vsel %vm3030_vm6, %v3015_v23, %v2291_v13  ;;  %v8920_v13 = vld [vmem:[#allocation43_spill] sm:$0xff] }
 0x40a   :  { %3832 = vst [vmem:[%s8457_s3 + $0x70] sm:$0xff] %v3768_v39  ;;  %v3895_v50 = vadd.f32 %v3894_v11, %v3768_v39  ;;  %v3966_v0 = vmul.f32 %v3768_v39, %v3768_v39  ;;  %4322 = vmatprep.mubr.msk.f32.mxu1 %vm3176_vm8, %v3144_v52  ;;  %v8914_v11 = vld [vmem:[#allocation40_spill] sm:$0xff]  ;;  %v2693_v33 = vsel %vm2640_vm0, %v68_v54, %v8920_v13  ;;  %v69_v52 = vld [vmem:[%s8454_s0 + $0x5b8] sm:$0xff] }
 0x40b   :  { %v2692_v47 = vsel %vm2640_vm0, %v67_v28, %v8914_v11  ;;  %v2758_v19 = vsel %vm2705_vm1, %v2693_v33, %v8921_v61  ;;  %v8933_v33 = vld [vmem:[#allocation44_spill] sm:$0xff] }
 0x40c   :  { %v4029_v36 = vadd.f32 %v4028_v35, %v3966_v0  ;;  %v2037_v62 = vpop.permute.xlu1 %2036  ;;  %v2547_v26 = vpop.permute.xlu0 %2546  ;;  %v3896_v18 = vadd.f32 %v3895_v50, %v3769_v22  ;;  %v2757_v49 = vsel %vm2705_vm1, %v2692_v47, %v8916_v24  ;;  %v8922_v0 = vld [vmem:[#allocation149_spill] sm:$0xff]  ;;  %v8929_v47 = vld [vmem:[#allocation255_spill] sm:$0xff] }
 0x40d   :  { %v3145_v31 = vsel %vm3095_vm7, %v3080_v40, %v2547_v26  ;;  %v3016_v45 = vsel %vm2965_vm5, %v2951_v3, %v2037_v62  ;;  %v2822_v16 = vsel %vm2770_vm2, %v2757_v49, %v8917_v32  ;;  %v2823_v44 = vsel %vm2770_vm2, %v2758_v19, %v8922_v0  ;;  %v8923_v40 = vld [vmem:[#allocation202_spill] sm:$0xff] }
 0x40e   :  { %4323 = vmatmul.mubr.msk.f32.gmra.mxu1 %vm3176_vm8, %v3145_v31  ;;  %v4030_v56 = vadd.f32 %v4029_v36, %v3967_v12  ;;  %v2887_v60 = vsel %vm2835_vm3, %v2822_v16, %v8918_v1  ;;  %v2888_v62 = vsel %vm2835_vm3, %v2823_v44, %v8923_v40 }
 0x40f   :  { %v4276_v43 = vpop.f32.mrf.mxu0  ;;  %v2952_v21 = vsel %vm2900_vm4, %v2887_v60, %v8919_v5  ;;  %v2953_v6 = vsel %vm2900_vm4, %v2888_v62, %v8925_v15 }
 0x410   :  { %v3521_v53 = vadd.f32 %v4276_v43, %v7524_v7  ;;  %v2293_v55 = vpop.permute.xlu1 %2292  ;;  %v2039_v37 = vpop.permute.xlu0 %2038 }
 0x411   :  { %v3515_v41 = vpop.f32.mrf.mxu0  ;;  %v3081_v29 = vsel %vm3030_vm6, %v3016_v45, %v2293_v55  ;;  %v3017_v27 = vsel %vm2965_vm5, %v2952_v21, %v2039_v37 }
 0x412   :  { %v3771_v35 = vmax.f32 %v3521_v53, 0.0  ;;  %v3516_v2 = vadd.f32 %v7524_v7, %v3515_v41 }
 0x414   :  { %3835 = vst [vmem:[%s8457_s3 + $0x88] sm:$0xff] %v3771_v35  ;;  %v3770_v8 = vmax.f32 %v3516_v2, 0.0  ;;  %v2549_v20 = vpop.permute.xlu1 %2548  ;;  %v2295_v38 = vpop.permute.xlu0 %2294  ;;  %v3969_v59 = vmul.f32 %v3771_v35, %v3771_v35 }
 0x415   :  { %v3146_v34 = vsel %vm3095_vm7, %v3081_v29, %v2549_v20  ;;  %v3082_v42 = vsel %vm3030_vm6, %v3017_v27, %v2295_v38  ;;  %v70_v38 = vld [vmem:[%s8454_s0 + $0x5e8] sm:$0xff] }
 0x416   :  { %3834 = vst [vmem:[%s8457_s3 + $0x80] sm:$0xff] %v3770_v8  ;;  %v3897_v63 = vadd.f32 %v3896_v18, %v3770_v8  ;;  %v3968_v22 = vmul.f32 %v3770_v8, %v3770_v8  ;;  %4325 = vmatprep.mubr.msk.f32.mxu1 %vm3176_vm8, %v3146_v34  ;;  %v8924_v18 = vld [vmem:[#allocation42_spill] sm:$0xff] }
 0x417   :  { %v2694_v31 = vsel %vm2640_vm0, %v69_v52, %v8924_v18  ;;  %v8934_v52 = vld [vmem:[#allocation204_spill] sm:$0xff] }
 0x418   :  { %v4031_v51 = vadd.f32 %v4030_v56, %v3968_v22  ;;  %v2041_v10 = vpop.permute.xlu1 %2040  ;;  %v2551_v48 = vpop.permute.xlu0 %2550  ;;  %v3898_v39 = vadd.f32 %v3897_v63, %v3771_v35  ;;  %v2759_v25 = vsel %vm2705_vm1, %v2694_v31, %v8926_v46  ;;  %v71_v63 = vld [vmem:[%s8454_s0 + $0x5f0] sm:$0xff]  ;;  %v8930_v22 = vld [vmem:[#allocation45_spill] sm:$0xff] }
 0x419   :  { %v3147_v4 = vsel %vm3095_vm7, %v3082_v42, %v2551_v48  ;;  %v3018_v43 = vsel %vm2965_vm5, %v2953_v6, %v2041_v10  ;;  %v2824_v58 = vsel %vm2770_vm2, %v2759_v25, %v8927_v30  ;;  %v2695_v54 = vsel %vm2640_vm0, %v70_v38, %v8930_v22  ;;  %v8932_v10 = vld [vmem:[#allocation151_spill] sm:$0xff]  ;;  %v8941_v38 = vld [vmem:[#allocation153_spill] sm:$0xff]  ;;  %v8942_v22 = vld [vmem:[#allocation206_spill] sm:$0xff] }
 0x41a   :  { %4326 = vmatmul.mubr.msk.f32.gmra.mxu1 %vm3176_vm8, %v3147_v4  ;;  %v4032_v14 = vadd.f32 %v4031_v51, %v3969_v59  ;;  %v2889_v41 = vsel %vm2835_vm3, %v2824_v58, %v8928_v17  ;;  %v8931_v51 = vld [vmem:[#allocation98_spill] sm:$0xff] }
 0x41b   :  { %v4279_v50 = vpop.f32.mrf.mxu0  ;;  %v2954_v57 = vsel %vm2900_vm4, %v2889_v41, %v8929_v47  ;;  %v2760_v42 = vsel %vm2705_vm1, %v2695_v54, %v8931_v51 }
 0x41c   :  { %v3531_v23 = vadd.f32 %v4279_v50, %v7524_v7  ;;  %v2297_v12 = vpop.permute.xlu1 %2296  ;;  %v2043_v36 = vpop.permute.xlu0 %2042  ;;  %v2825_v48 = vsel %vm2770_vm2, %v2760_v42, %v8932_v10  ;;  %v8936_v50 = vld [vmem:[#allocation257_spill] sm:$0xff]  ;;  %v8944_v10 = vld [vmem:[#allocation99_spill] sm:$0xff] }
 0x41d   :  { %v3525_v26 = vpop.f32.mrf.mxu0  ;;  %v3083_v53 = vsel %vm3030_vm6, %v3018_v43, %v2297_v12  ;;  %v3019_v2 = vsel %vm2965_vm5, %v2954_v57, %v2043_v36  ;;  %v2890_v61 = vsel %vm2835_vm3, %v2825_v48, %v8934_v52  ;;  %v8937_v12 = vld [vmem:[#allocation150_spill] sm:$0xff] }
 0x41e   :  { %v3773_v56 = vmax.f32 %v3531_v23, 0.0  ;;  %v3526_v28 = vadd.f32 %v7524_v7, %v3525_v26  ;;  %v2955_v0 = vsel %vm2900_vm4, %v2890_v61, %v8936_v50 }
 0x420   :  { %3837 = vst [vmem:[%s8457_s3 + $0x98] sm:$0xff] %v3773_v56  ;;  %v3772_v55 = vmax.f32 %v3526_v28, 0.0  ;;  %v2553_v37 = vpop.permute.xlu1 %2552  ;;  %v2299_v9 = vpop.permute.xlu0 %2298  ;;  %v3971_v24 = vmul.f32 %v3773_v56, %v3773_v56 }
 0x421   :  { %v3148_v11 = vsel %vm3095_vm7, %v3083_v53, %v2553_v37  ;;  %v3084_v45 = vsel %vm3030_vm6, %v3019_v2, %v2299_v9 }
 0x422   :  { %3836 = vst [vmem:[%s8457_s3 + $0x90] sm:$0xff] %v3772_v55  ;;  %v3899_v3 = vadd.f32 %v3898_v39, %v3772_v55  ;;  %v3970_v35 = vmul.f32 %v3772_v55, %v3772_v55  ;;  %4328 = vmatprep.mubr.msk.f32.mxu1 %vm3176_vm8, %v3148_v11  ;;  %v8148_v55 = vld [vmem:[%s8456_s2] ss:$0 sm:$0xff] }
 0x424   :  { %v4033_v49 = vadd.f32 %v4032_v14, %v3970_v35  ;;  %v1791_v32 = vpop.permute.xlu1 %1790  ;;  %v2555_v16 = vpop.permute.xlu0 %2554  ;;  %v3900_v29 = vadd.f32 %v3899_v3, %v3773_v56  ;;  %v2696_v14 = vsel %vm2640_vm0, %v71_v63, %v8933_v33  ;;  %v8938_v56 = vld [vmem:[#allocation203_spill] sm:$0xff]  ;;  %v72_v3 = vld [vmem:[%s8454_s0 + $0x620] sm:$0xff] }
 0x425   :  { %v3149_v8 = vsel %vm3095_vm7, %v3084_v45, %v2555_v16 }
 0x426   :  { %4329 = vmatmul.mubr.msk.f32.gmra.mxu1 %vm3176_vm8, %v3149_v8  ;;  %v4034_v20 = vadd.f32 %v4033_v49, %v3971_v24  ;;  %v8939_v49 = vld [vmem:[#allocation47_spill] sm:$0xff]  ;;  %v8940_v8 = vld [vmem:[#allocation100_spill] sm:$0xff] }
 0x427   :  { %v4282_v1 = vpop.f32.mrf.mxu0  ;;  %v2697_v45 = vsel %vm2640_vm0, %v72_v3, %v8939_v49  ;;  %v8950_v49 = vld [vmem:[#allocation208_spill] sm:$0xff] }
 0x428   :  { %v3541_v60 = vadd.f32 %v4282_v1, %v7524_v7  ;;  %v2047_v34 = vpop.permute.xlu1 %2046  ;;  %v2045_v5 = vpop.permute.xlu0 %2044 }
 0x429   :  { %v3535_v21 = vpop.f32.mrf.mxu0  ;;  %v3020_v40 = vsel %vm2965_vm5, %v2955_v0, %v2045_v5 }
 0x42a   :  { %v3775_v27 = vmax.f32 %v3541_v60, 0.0  ;;  %v3536_v59 = vadd.f32 %v7524_v7, %v3535_v21  ;;  %v8935_v7 = vld [vmem:[#allocation97_spill] sm:$0xff] }
 0x42b   :  { %v2761_v19 = vsel %vm2705_vm1, %v2696_v14, %v8935_v7 }
 0x42c   :  { %3839 = vst [vmem:[%s8457_s3 + $0xa8] sm:$0xff] %v3775_v27  ;;  %v3774_v39 = vmax.f32 %v3536_v59, 0.0  ;;  %v2303_v4 = vpop.permute.xlu1 %2302  ;;  %v2301_v13 = vpop.permute.xlu0 %2300  ;;  %v2826_v36 = vsel %vm2770_vm2, %v2761_v19, %v8937_v12  ;;  %v3973_v62 = vmul.f32 %v3775_v27, %v3775_v27  ;;  %v8946_v19 = vld [vmem:[#allocation205_spill] sm:$0xff] }
 0x42d   :  { %v3085_v18 = vsel %vm3030_vm6, %v3020_v40, %v2301_v13  ;;  %v2891_v28 = vsel %vm2835_vm3, %v2826_v36, %v8938_v56  ;;  %v8945_v13 = vld [vmem:[#allocation152_spill] sm:$0xff] }
 0x42e   :  { %3838 = vst [vmem:[%s8457_s3 + $0xa0] sm:$0xff] %v3774_v39  ;;  %v3901_v44 = vadd.f32 %v3900_v29, %v3774_v39  ;;  %v3972_v23 = vmul.f32 %v3774_v39, %v3774_v39  ;;  %v2956_v25 = vsel %vm2900_vm4, %v2891_v28, %v1791_v32  ;;  %v73_v29 = vld [vmem:[%s8454_s0 + $0x628] sm:$0xff]  ;;  %v74_v28 = vld [vmem:[%s8454_s0 + $0x658] sm:$0xff] }
 0x42f   :  { %v3021_v30 = vsel %vm2965_vm5, %v2956_v25, %v2047_v34 }
 0x430   :  { %v4035_v26 = vadd.f32 %v4034_v20, %v3972_v23  ;;  %v1793_v31 = vpop.permute.xlu1 %1792  ;;  %v2557_v15 = vpop.permute.xlu0 %2556  ;;  %v3902_v6 = vadd.f32 %v3901_v44, %v3775_v27  ;;  %v3086_v53 = vsel %vm3030_vm6, %v3021_v30, %v2303_v4  ;;  %v2762_v20 = vsel %vm2705_vm1, %v2697_v45, %v8940_v8  ;;  %v8943_v27 = vld [vmem:[#allocation46_spill] sm:$0xff] }
 0x431   :  { %v3150_v46 = vsel %vm3095_vm7, %v3085_v18, %v2557_v15  ;;  %v2827_v1 = vsel %vm2770_vm2, %v2762_v20, %v8941_v38  ;;  %v2698_v59 = vsel %vm2640_vm0, %v73_v29, %v8943_v27 }
 0x432   :  { %4331 = vmatprep.mubr.msk.f32.mxu1 %vm3176_vm8, %v3150_v46  ;;  %v4036_v43 = vadd.f32 %v4035_v26, %v3973_v62  ;;  %v2892_v54 = vsel %vm2835_vm3, %v2827_v1, %v8942_v22  ;;  %v2763_v48 = vsel %vm2705_vm1, %v2698_v59, %v8944_v10  ;;  %v8952_v1 = vld [vmem:[#allocation101_spill] sm:$0xff]  ;;  %v8954_v59 = vld [vmem:[#allocation207_spill] sm:$0xff] }
 0x433   :  { %v4285_v58 = vpop.f32.mrf.mxu0  ;;  %v2957_v51 = vsel %vm2900_vm4, %v2892_v54, %v1793_v31  ;;  %v2828_v33 = vsel %vm2770_vm2, %v2763_v48, %v8945_v13 }
 0x434   :  { %v3551_v37 = vadd.f32 %v8148_v55, %v4285_v58  ;;  %v1795_v9 = vpop.permute.xlu1 %1794  ;;  %v2559_v17 = vpop.permute.xlu0 %2558  ;;  %v2893_v50 = vsel %vm2835_vm3, %v2828_v33, %v8946_v19 }
 0x435   :  { %v3151_v41 = vsel %vm3095_vm7, %v3086_v53, %v2559_v17  ;;  %v3545_v11 = vpop.f32.mrf.mxu0  ;;  %v2958_v23 = vsel %vm2900_vm4, %v2893_v50, %v1795_v9  ;;  %v8947_v53 = vld [vmem:[#allocation49_spill] sm:$0xff]  ;;  %v75_v17 = vld [vmem:[%s8454_s0 + $0x660] sm:$0xff] }
 0x436   :  { %v3777_v47 = vmax.f32 %v3551_v37, 0.0  ;;  %v3546_v57 = vadd.f32 %v8148_v55, %v3545_v11  ;;  %4332 = vmatmul.mubr.msk.f32.gmra.mxu1 %vm3176_vm8, %v3151_v41  ;;  %v2699_v37 = vsel %vm2640_vm0, %v74_v28, %v8947_v53  ;;  %v8948_v41 = vld [vmem:[#allocation102_spill] sm:$0xff]  ;;  %v8957_v28 = vld [vmem:[#allocation157_spill] sm:$0xff] }
 0x437   :  { %v2764_v11 = vsel %vm2705_vm1, %v2699_v37, %v8948_v41  ;;  %v8959_v37 = vld [vmem:[#allocation210_spill] sm:$0xff] }
 0x438   :  { %3841 = vst [vmem:[%s8457_s3 + $0xb8] sm:$0xff] %v3777_v47  ;;  %v3776_v35 = vmax.f32 %v3546_v57, 0.0  ;;  %v2051_v2 = vpop.permute.xlu1 %2050  ;;  %v2049_v24 = vpop.permute.xlu0 %2048  ;;  %v3975_v60 = vmul.f32 %v3777_v47, %v3777_v47  ;;  %v8949_v57 = vld [vmem:[#allocation155_spill] sm:$0xff] }
 0x439   :  { %v3022_v39 = vsel %vm2965_vm5, %v2957_v51, %v2049_v24  ;;  %v3023_v40 = vsel %vm2965_vm5, %v2958_v23, %v2051_v2  ;;  %v2829_v3 = vsel %vm2770_vm2, %v2764_v11, %v8949_v57 }
 0x43a   :  { %3840 = vst [vmem:[%s8457_s3 + $0xb0] sm:$0xff] %v3776_v35  ;;  %v3903_v32 = vadd.f32 %v3902_v6, %v3776_v35  ;;  %v3974_v16 = vmul.f32 %v3776_v35, %v3776_v35  ;;  %v2894_v45 = vsel %vm2835_vm3, %v2829_v3, %v8950_v49  ;;  %v8961_v3 = vld [vmem:[#allocation156_spill] sm:$0xff] }
 0x43c   :  { %v4037_v34 = vadd.f32 %v4036_v43, %v3974_v16  ;;  %v2307_v5 = vpop.permute.xlu1 %2306  ;;  %v2305_v21 = vpop.permute.xlu0 %2304  ;;  %v3904_v63 = vadd.f32 %v3903_v32, %v3777_v47  ;;  %v8951_v16 = vld [vmem:[#allocation48_spill] sm:$0xff] }
 0x43d   :  { %v3087_v14 = vsel %vm3030_vm6, %v3022_v39, %v2305_v21  ;;  %v3088_v62 = vsel %vm3030_vm6, %v3023_v40, %v2307_v5  ;;  %v2700_v29 = vsel %vm2640_vm0, %v75_v17, %v8951_v16  ;;  %v8953_v5 = vld [vmem:[#allocation154_spill] sm:$0xff]  ;;  %v8960_v17 = vld [vmem:[#allocation103_spill] sm:$0xff] }
 0x43e   :  { %v4038_v42 = vadd.f32 %v4037_v34, %v3975_v60  ;;  %v2765_v60 = vsel %vm2705_vm1, %v2700_v29, %v8952_v1 }
 0x43f   :  { %v4288_v4 = vpop.f32.mrf.mxu0  ;;  %v2830_v21 = vsel %vm2770_vm2, %v2765_v60, %v8953_v5 }
 0x440   :  { %v3561_v52 = vadd.f32 %v8148_v55, %v4288_v4  ;;  %v1797_v61 = vpop.permute.xlu1 %1796  ;;  %v2561_v7 = vpop.permute.xlu0 %2560  ;;  %v2895_v51 = vsel %vm2835_vm3, %v2830_v21, %v8954_v59 }
 0x441   :  { %v3152_v0 = vsel %vm3095_vm7, %v3087_v14, %v2561_v7  ;;  %v3555_v44 = vpop.f32.mrf.mxu0  ;;  %v2959_v8 = vsel %vm2900_vm4, %v2894_v45, %v1797_v61 }
 0x442   :  { %v3779_v12 = vmax.f32 %v3561_v52, 0.0  ;;  %v3556_v36 = vadd.f32 %v8148_v55, %v3555_v44  ;;  %4334 = vmatprep.mubr.msk.f32.mxu1 %vm3176_vm8, %v3152_v0  ;;  %v76_v0 = vld [vmem:[%s8454_s0 + $0x690] sm:$0xff] }
 0x444   :  { %3843 = vst [vmem:[%s8457_s3 + $0xc8] sm:$0xff] %v3779_v12  ;;  %v3778_v26 = vmax.f32 %v3556_v36, 0.0  ;;  %v1799_v18 = vpop.permute.xlu1 %1798  ;;  %v2563_v31 = vpop.permute.xlu0 %2562  ;;  %v3977_v46 = vmul.f32 %v3779_v12, %v3779_v12 }
 0x445   :  { %v3153_v15 = vsel %vm3095_vm7, %v3088_v62, %v2563_v31  ;;  %v2960_v10 = vsel %vm2900_vm4, %v2895_v51, %v1799_v18  ;;  %v77_v62 = vld [vmem:[%s8454_s0 + $0x698] sm:$0xff]  ;;  %v79_v51 = vld [vmem:[%s8454_s0 + $0x6d0] sm:$0xff] }
 0x446   :  { %3842 = vst [vmem:[%s8457_s3 + $0xc0] sm:$0xff] %v3778_v26  ;;  %v3905_v6 = vadd.f32 %v3904_v63, %v3778_v26  ;;  %v3976_v56 = vmul.f32 %v3778_v26, %v3778_v26  ;;  %4335 = vmatmul.mubr.msk.f32.gmra.mxu1 %vm3176_vm8, %v3153_v15  ;;  %v8955_v26 = vld [vmem:[#allocation51_spill] sm:$0xff] }
 0x447   :  { %v2701_v18 = vsel %vm2640_vm0, %v76_v0, %v8955_v26 }
 0x448   :  { %v4039_v25 = vadd.f32 %v4038_v42, %v3976_v56  ;;  %v2055_v43 = vpop.permute.xlu1 %2054  ;;  %v2053_v30 = vpop.permute.xlu0 %2052  ;;  %v3906_v58 = vadd.f32 %v3905_v6, %v3779_v12  ;;  %v8956_v6 = vld [vmem:[#allocation104_spill] sm:$0xff] }
 0x449   :  { %v3024_v34 = vsel %vm2965_vm5, %v2959_v8, %v2053_v30  ;;  %v3025_v4 = vsel %vm2965_vm5, %v2960_v10, %v2055_v43  ;;  %v2766_v56 = vsel %vm2705_vm1, %v2701_v18, %v8956_v6  ;;  %v8962_v8 = vld [vmem:[#allocation209_spill] sm:$0xff] }
 0x44a   :  { %v4040_v9 = vadd.f32 %v4039_v25, %v3977_v46  ;;  %v2831_v46 = vsel %vm2770_vm2, %v2766_v56, %v8957_v28  ;;  %v8969_v56 = vld [vmem:[#allocation211_spill] sm:$0xff] }
 0x44b   :  { %v4291_v47 = vpop.f32.mrf.mxu0 }
 0x44c   :  { %v3571_v35 = vadd.f32 %v8148_v55, %v4291_v47  ;;  %v2311_v2 = vpop.permute.xlu1 %2310  ;;  %v2309_v24 = vpop.permute.xlu0 %2308 }
 0x44d   :  { %v3565_v32 = vpop.f32.mrf.mxu0  ;;  %v3089_v63 = vsel %vm3030_vm6, %v3024_v34, %v2309_v24  ;;  %v3090_v33 = vsel %vm3030_vm6, %v3025_v4, %v2311_v2 }
 0x44e   :  { %v3781_v20 = vmax.f32 %v3571_v35, 0.0  ;;  %v3566_v38 = vadd.f32 %v8148_v55, %v3565_v32 }
 0x450   :  { %3845 = vst [vmem:[%s8457_s3 + $0xd8] sm:$0xff] %v3781_v20  ;;  %v3780_v22 = vmax.f32 %v3566_v38, 0.0  ;;  %v1801_v54 = vpop.permute.xlu1 %1800  ;;  %v2565_v27 = vpop.permute.xlu0 %2564  ;;  %v3979_v13 = vmul.f32 %v3781_v20, %v3781_v20 }
 0x451   :  { %v3154_v42 = vsel %vm3095_vm7, %v3089_v63, %v2565_v27 }
 0x452   :  { %3844 = vst [vmem:[%s8457_s3 + $0xd0] sm:$0xff] %v3780_v22  ;;  %v3907_v48 = vadd.f32 %v3906_v58, %v3780_v22  ;;  %v3978_v39 = vmul.f32 %v3780_v22, %v3780_v22  ;;  %4337 = vmatprep.mubr.msk.f32.mxu1 %vm3176_vm8, %v3154_v42  ;;  %v8958_v58 = vld [vmem:[#allocation50_spill] sm:$0xff] }
 0x453   :  { %v2702_v53 = vsel %vm2640_vm0, %v77_v62, %v8958_v58 }
 0x454   :  { %v4041_v14 = vadd.f32 %v4040_v9, %v3978_v39  ;;  %v1803_v52 = vpop.permute.xlu1 %1802  ;;  %v2567_v61 = vpop.permute.xlu0 %2566  ;;  %v3908_v7 = vadd.f32 %v3907_v48, %v3781_v20  ;;  %v2896_v9 = vsel %vm2835_vm3, %v2831_v46, %v8959_v37  ;;  %v2767_v41 = vsel %vm2705_vm1, %v2702_v53, %v8960_v17  ;;  %v78_v48 = vld [vmem:[%s8454_s0 + $0x6c8] sm:$0xff]  ;;  %v8970_v46 = vld [vmem:[#allocation212_spill] sm:$0xff] }
 0x455   :  { %v3155_v19 = vsel %vm3095_vm7, %v3090_v33, %v2567_v61  ;;  %v2961_v11 = vsel %vm2900_vm4, %v2896_v9, %v1801_v54  ;;  %v2832_v35 = vsel %vm2770_vm2, %v2767_v41, %v8961_v3  ;;  %v8963_v33 = vld [vmem:[#allocation52_spill] sm:$0xff] }
 0x456   :  { %4338 = vmatmul.mubr.msk.f32.gmra.mxu1 %vm3176_vm8, %v3155_v19  ;;  %v4042_v50 = vadd.f32 %v4041_v14, %v3979_v13  ;;  %v2897_v20 = vsel %vm2835_vm3, %v2832_v35, %v8962_v8  ;;  %v2704_v14 = vsel %vm2640_vm0, %v79_v51, %v8963_v33 }
 0x457   :  { %v4294_v44 = vpop.f32.mrf.mxu0  ;;  %v2962_v1 = vsel %vm2900_vm4, %v2897_v20, %v1803_v52  ;;  %v8964_v52 = vld [vmem:[#allocation53_spill] sm:$0xff] }
 0x458   :  { %v3581_v23 = vadd.f32 %v8148_v55, %v4294_v44  ;;  %v2059_v12 = vpop.permute.xlu1 %2058  ;;  %v2057_v36 = vpop.permute.xlu0 %2056  ;;  %v2703_v61 = vsel %vm2640_vm0, %v78_v48, %v8964_v52  ;;  %v8966_v44 = vld [vmem:[#allocation106_spill] sm:$0xff] }
 0x459   :  { %v3575_v40 = vpop.f32.mrf.mxu0  ;;  %v3026_v2 = vsel %vm2965_vm5, %v2961_v11, %v2057_v36  ;;  %v3027_v34 = vsel %vm2965_vm5, %v2962_v1, %v2059_v12  ;;  %v8967_v12 = vld [vmem:[#allocation158_spill] sm:$0xff] }
 0x45a   :  { %v3783_v31 = vmax.f32 %v3581_v23, 0.0  ;;  %v3576_v15 = vadd.f32 %v8148_v55, %v3575_v40  ;;  %v2768_v23 = vsel %vm2705_vm1, %v2703_v61, %v8966_v44  ;;  %v8968_v40 = vld [vmem:[#allocation159_spill] sm:$0xff] }
 0x45b   :  { %v2833_v62 = vsel %vm2770_vm2, %v2768_v23, %v8968_v40 }
 0x45c   :  { %3847 = vst [vmem:[%s8457_s3 + $0xe8] sm:$0xff] %v3783_v31  ;;  %v3782_v25 = vmax.f32 %v3576_v15, 0.0  ;;  %v2315_v43 = vpop.permute.xlu1 %2314  ;;  %v2313_v30 = vpop.permute.xlu0 %2312  ;;  %v3981_v24 = vmul.f32 %v3783_v31, %v3783_v31 }
 0x45d   :  { %v3091_v45 = vsel %vm3030_vm6, %v3026_v2, %v2313_v30  ;;  %v3092_v21 = vsel %vm3030_vm6, %v3027_v34, %v2315_v43 }
 0x45e   :  { %3846 = vst [vmem:[%s8457_s3 + $0xe0] sm:$0xff] %v3782_v25  ;;  %v3909_v47 = vadd.f32 %v3908_v7, %v3782_v25  ;;  %v3980_v57 = vmul.f32 %v3782_v25, %v3782_v25  ;;  %v8965_v7 = vld [vmem:[#allocation105_spill] sm:$0xff]  ;;  %v2898_v25 = vsel %vm2835_vm3, %v2833_v62, %v8970_v46 }
 0x45f   :  { %v2769_v19 = vsel %vm2705_vm1, %v2704_v14, %v8965_v7 }
 0x460   :  { %v4043_v49 = vadd.f32 %v4042_v50, %v3980_v57  ;;  %v1805_v32 = vpop.permute.xlu1 %1804  ;;  %v2569_v16 = vpop.permute.xlu0 %2568  ;;  %v3910_v29 = vadd.f32 %v3909_v47, %v3783_v31  ;;  %v2834_v36 = vsel %vm2770_vm2, %v2769_v19, %v8967_v12 }
 0x461   :  { %v3156_v38 = vsel %vm3095_vm7, %v3091_v45, %v2569_v16  ;;  %v2899_v28 = vsel %vm2835_vm3, %v2834_v36, %v8969_v56  ;;  %v2963_v43 = vsel %vm2900_vm4, %v2898_v25, %v1805_v32 }
 0x462   :  { %4340 = vmatprep.mubr.msk.f32.mxu1 %vm3176_vm8, %v3156_v38  ;;  %v4044_v60 = vadd.f32 %v4043_v49, %v3981_v24 }
 0x463   :  { %v4297_v5 = vpop.f32.mrf.mxu0 }
 0x464   :  { %v3591_v63 = vadd.f32 %v8148_v55, %v4297_v5  ;;  %v1807_v22 = vpop.permute.xlu1 %1806  ;;  %v2571_v54 = vpop.permute.xlu0 %2570 }
 0x465   :  { %v3157_v27 = vsel %vm3095_vm7, %v3092_v21, %v2571_v54  ;;  %v3585_v59 = vpop.f32.mrf.mxu0  ;;  %v2964_v30 = vsel %vm2900_vm4, %v2899_v28, %v1807_v22 }
 0x466   :  { %v3785_v42 = vmax.f32 %v3591_v63, 0.0  ;;  %v3586_v10 = vadd.f32 %v8148_v55, %v3585_v59  ;;  %4341 = vmatmul.mubr.msk.f32.gmra.mxu1 %vm3176_vm8, %v3157_v27 }
 0x468   :  { %3849 = vst [vmem:[%s8457_s3 + $0xf8] sm:$0xff] %v3785_v42  ;;  %v3784_v39 = vmax.f32 %v3586_v10, 0.0  ;;  %v2063_v4 = vpop.permute.xlu1 %2062  ;;  %v2061_v13 = vpop.permute.xlu0 %2060  ;;  %v3983_v26 = vmul.f32 %v3785_v42, %v3785_v42 }
 0x469   :  { %v3029_v53 = vsel %vm2965_vm5, %v2964_v30, %v2063_v4  ;;  %v3028_v37 = vsel %vm2965_vm5, %v2963_v43, %v2061_v13 }
 0x46a   :  { %3848 = vst [vmem:[%s8457_s3 + $0xf0] sm:$0xff] %v3784_v39  ;;  %v3911_v50 = vadd.f32 %v3910_v29, %v3784_v39  ;;  %v3982_v0 = vmul.f32 %v3784_v39, %v3784_v39 }
 0x46c   :  { %v4045_v18 = vadd.f32 %v4044_v60, %v3982_v0  ;;  %v2319_v31 = vpop.permute.xlu1 %2318  ;;  %v2317_v15 = vpop.permute.xlu0 %2316  ;;  %v3912_v6 = vadd.f32 %v3911_v50, %v3785_v42 }
 0x46d   :  { %v3094_v17 = vsel %vm3030_vm6, %v3029_v53, %v2319_v31  ;;  %v3093_v41 = vsel %vm3030_vm6, %v3028_v37, %v2317_v15 }
 0x46e   :  { %v4046_v58 = vadd.f32 %v4045_v18, %v3983_v26 }
 0x46f   :  { %v4300_v9 = vpop.f32.mrf.mxu1 }
 0x470   :  { %v3601_v11 = vadd.f32 %v8148_v55, %v4300_v9  ;;  %v2575_v47 = vpop.permute.xlu1 %2574  ;;  %v2573_v57 = vpop.permute.xlu0 %2572 }
 0x471   :  { %v3159_v3 = vsel %vm3095_vm7, %v3094_v17, %v2575_v47  ;;  %v3158_v35 = vsel %vm3095_vm7, %v3093_v41, %v2573_v57  ;;  %v3595_v2 = vpop.f32.mrf.mxu1 }
 0x472   :  { %v3787_v24 = vmax.f32 %v3601_v11, 0.0  ;;  %v3596_v49 = vadd.f32 %v8148_v55, %v3595_v2  ;;  %4343 = vmatprep.mubr.msk.f32.mxu1 %vm3176_vm8, %v3158_v35 }
 0x473   :  { %4344 = vmatmul.mubr.msk.f32.gmra.mxu1 %vm3176_vm8, %v3159_v3 }
 0x474   :  { %3851 = vst [vmem:[%s8457_s3 + $0x108] sm:$0xff] %v3787_v24  ;;  %v3786_v45 = vmax.f32 %v3596_v49, 0.0  ;;  %v3985_v29 = vmul.f32 %v3787_v24, %v3787_v24 }
 0x476   :  { %3850 = vst [vmem:[%s8457_s3 + $0x100] sm:$0xff] %v3786_v45  ;;  %v3913_v32 = vadd.f32 %v3912_v6, %v3786_v45  ;;  %v3984_v16 = vmul.f32 %v3786_v45, %v3786_v45 }
 0x478   :  { %v4047_v8 = vadd.f32 %v4046_v58, %v3984_v16  ;;  %v3914_v20 = vadd.f32 %v3913_v32, %v3787_v24 }
 0x47a   :  { %v4048_v38 = vadd.f32 %v4047_v8, %v3985_v29 }
 0x47b   :  { %v4303_v1 = vpop.f32.mrf.mxu1 }
 0x47c   :  { %v3611_v60 = vadd.f32 %v8148_v55, %v4303_v1 }
 0x47d   :  { %v3605_v34 = vpop.f32.mrf.mxu1 }
 0x47e   :  { %v3789_v5 = vmax.f32 %v3611_v60, 0.0  ;;  %v3606_v21 = vadd.f32 %v8148_v55, %v3605_v34 }
 0x480   :  { %3853 = vst [vmem:[%s8457_s3 + $0x118] sm:$0xff] %v3789_v5  ;;  %v3788_v63 = vmax.f32 %v3606_v21, 0.0  ;;  %v3987_v27 = vmul.f32 %v3789_v5, %v3789_v5 }
 0x482   :  { %3852 = vst [vmem:[%s8457_s3 + $0x110] sm:$0xff] %v3788_v63  ;;  %v3915_v22 = vadd.f32 %v3914_v20, %v3788_v63  ;;  %v3986_v54 = vmul.f32 %v3788_v63, %v3788_v63 }
 0x484   :  { %v4049_v59 = vadd.f32 %v4048_v38, %v3986_v54  ;;  %v3916_v51 = vadd.f32 %v3915_v22, %v3789_v5 }
 0x486   :  { %v4050_v42 = vadd.f32 %v4049_v59, %v3987_v27 }
 0x487   :  { %v4306_v10 = vpop.f32.mrf.mxu1 }
 0x488   :  { %v3621_v48 = vadd.f32 %v8148_v55, %v4306_v10 }
 0x489   :  { %v3615_v39 = vpop.f32.mrf.mxu1 }
 0x48a   :  { %v3791_v4 = vmax.f32 %v3621_v48, 0.0  ;;  %v3616_v13 = vadd.f32 %v8148_v55, %v3615_v39 }
 0x48c   :  { %3855 = vst [vmem:[%s8457_s3 + $0x128] sm:$0xff] %v3791_v4  ;;  %v3790_v33 = vmax.f32 %v3616_v13, 0.0  ;;  %v3989_v61 = vmul.f32 %v3791_v4, %v3791_v4 }
 0x48e   :  { %3854 = vst [vmem:[%s8457_s3 + $0x120] sm:$0xff] %v3790_v33  ;;  %v3917_v14 = vadd.f32 %v3916_v51, %v3790_v33  ;;  %v3988_v52 = vmul.f32 %v3790_v33, %v3790_v33 }
 0x490   :  { %v4051_v7 = vadd.f32 %v4050_v42, %v3988_v52  ;;  %v3918_v19 = vadd.f32 %v3917_v14, %v3791_v4 }
 0x492   :  { %v4052_v50 = vadd.f32 %v4051_v7, %v3989_v61 }
 0x493   :  { %v4309_v0 = vpop.f32.mrf.mxu1 }
 0x494   :  { %v3631_v44 = vadd.f32 %v8148_v55, %v4309_v0 }
 0x495   :  { %v3625_v23 = vpop.f32.mrf.mxu1 }
 0x496   :  { %v3793_v12 = vmax.f32 %v3631_v44, 0.0  ;;  %v3626_v36 = vadd.f32 %v8148_v55, %v3625_v23 }
 0x498   :  { %3857 = vst [vmem:[%s8457_s3 + $0x138] sm:$0xff] %v3793_v12  ;;  %v3792_v40 = vmax.f32 %v3626_v36, 0.0  ;;  %v3991_v18 = vmul.f32 %v3793_v12, %v3793_v12 }
 0x49a   :  { %3856 = vst [vmem:[%s8457_s3 + $0x130] sm:$0xff] %v3792_v40  ;;  %v3919_v62 = vadd.f32 %v3918_v19, %v3792_v40  ;;  %v3990_v26 = vmul.f32 %v3792_v40, %v3792_v40 }
 0x49c   :  { %v4053_v31 = vadd.f32 %v4052_v50, %v3990_v26  ;;  %v3920_v15 = vadd.f32 %v3919_v62, %v3793_v12 }
 0x49e   :  { %v4054_v6 = vadd.f32 %v4053_v31, %v3991_v18 }
 0x49f   :  { %v4312_v56 = vpop.f32.mrf.mxu1 }
 0x4a0   :  { %v3641_v28 = vadd.f32 %v8148_v55, %v4312_v56 }
 0x4a1   :  { %v3635_v46 = vpop.f32.mrf.mxu1 }
 0x4a2   :  { %v3795_v25 = vmax.f32 %v3641_v28, 0.0  ;;  %v3636_v43 = vadd.f32 %v8148_v55, %v3635_v46 }
 0x4a4   :  { %3859 = vst [vmem:[%s8457_s3 + $0x148] sm:$0xff] %v3795_v25  ;;  %v3794_v30 = vmax.f32 %v3636_v43, 0.0  ;;  %v3993_v37 = vmul.f32 %v3795_v25, %v3795_v25 }
 0x4a6   :  { %3858 = vst [vmem:[%s8457_s3 + $0x140] sm:$0xff] %v3794_v30  ;;  %v3921_v58 = vadd.f32 %v3920_v15, %v3794_v30  ;;  %v3992_v53 = vmul.f32 %v3794_v30, %v3794_v30 }
 0x4a8   :  { %v4055_v9 = vadd.f32 %v4054_v6, %v3992_v53  ;;  %v3922_v17 = vadd.f32 %v3921_v58, %v3795_v25 }
 0x4aa   :  { %v4056_v41 = vadd.f32 %v4055_v9, %v3993_v37 }
 0x4ab   :  { %v4315_v11 = vpop.f32.mrf.mxu1 }
 0x4ac   :  { %v3651_v47 = vadd.f32 %v8148_v55, %v4315_v11 }
 0x4ad   :  { %v3645_v57 = vpop.f32.mrf.mxu1 }
 0x4ae   :  { %v3797_v3 = vmax.f32 %v3651_v47, 0.0  ;;  %v3646_v35 = vadd.f32 %v8148_v55, %v3645_v57 }
 0x4b0   :  { %3861 = vst [vmem:[%s8457_s3 + $0x158] sm:$0xff] %v3797_v3  ;;  %v3796_v2 = vmax.f32 %v3646_v35, 0.0  ;;  %v3995_v45 = vmul.f32 %v3797_v3, %v3797_v3 }
 0x4b2   :  { %3860 = vst [vmem:[%s8457_s3 + $0x150] sm:$0xff] %v3796_v2  ;;  %v3923_v24 = vadd.f32 %v3922_v17, %v3796_v2  ;;  %v3994_v49 = vmul.f32 %v3796_v2, %v3796_v2 }
 0x4b4   :  { %v4057_v32 = vadd.f32 %v4056_v41, %v3994_v49  ;;  %v3924_v16 = vadd.f32 %v3923_v24, %v3797_v3 }
 0x4b6   :  { %v4058_v29 = vadd.f32 %v4057_v32, %v3995_v45 }
 0x4b7   :  { %v4318_v8 = vpop.f32.mrf.mxu1 }
 0x4b8   :  { %v3661_v20 = vadd.f32 %v8148_v55, %v4318_v8 }
 0x4b9   :  { %v3655_v38 = vpop.f32.mrf.mxu1 }
 0x4ba   :  { %v3799_v1 = vmax.f32 %v3661_v20, 0.0  ;;  %v3656_v60 = vadd.f32 %v8148_v55, %v3655_v38 }
 0x4bc   :  { %3863 = vst [vmem:[%s8457_s3 + $0x168] sm:$0xff] %v3799_v1  ;;  %v3798_v34 = vmax.f32 %v3656_v60, 0.0  ;;  %v3997_v63 = vmul.f32 %v3799_v1, %v3799_v1 }
 0x4be   :  { %3862 = vst [vmem:[%s8457_s3 + $0x160] sm:$0xff] %v3798_v34  ;;  %v3925_v5 = vadd.f32 %v3924_v16, %v3798_v34  ;;  %v3996_v21 = vmul.f32 %v3798_v34, %v3798_v34 }
 0x4c0   :  { %v4059_v22 = vadd.f32 %v4058_v29, %v3996_v21  ;;  %v3926_v54 = vadd.f32 %v3925_v5, %v3799_v1 }
 0x4c2   :  { %v4321_v27 = vpop.f32.mrf.mxu1  ;;  %v4060_v59 = vadd.f32 %v4059_v22, %v3997_v63 }
 0x4c3   :  { %v3671_v51 = vadd.f32 %v8148_v55, %v4321_v27 }
 0x4c4   :  { %v3665_v42 = vpop.f32.mrf.mxu1 }
 0x4c5   :  { %v3801_v10 = vmax.f32 %v3671_v51, 0.0  ;;  %v3666_v48 = vadd.f32 %v8148_v55, %v3665_v42 }
 0x4c7   :  { %3865 = vst [vmem:[%s8457_s3 + $0x178] sm:$0xff] %v3801_v10  ;;  %v3800_v39 = vmax.f32 %v3666_v48, 0.0  ;;  %v3999_v33 = vmul.f32 %v3801_v10, %v3801_v10 }
 0x4c9   :  { %3864 = vst [vmem:[%s8457_s3 + $0x170] sm:$0xff] %v3800_v39  ;;  %v3927_v4 = vadd.f32 %v3926_v54, %v3800_v39  ;;  %v3998_v13 = vmul.f32 %v3800_v39, %v3800_v39 }
 0x4cb   :  { %v4061_v14 = vadd.f32 %v4060_v59, %v3998_v13  ;;  %v3928_v52 = vadd.f32 %v3927_v4, %v3801_v10 }
 0x4cd   :  { %v4062_v61 = vadd.f32 %v4061_v14, %v3999_v33 }
 0x4ce   :  { %v4324_v7 = vpop.f32.mrf.mxu1 }
 0x4cf   :  { %v3681_v19 = vadd.f32 %v8148_v55, %v4324_v7 }
 0x4d0   :  { %v3675_v50 = vpop.f32.mrf.mxu1 }
 0x4d1   :  { %v3803_v0 = vmax.f32 %v3681_v19, 0.0  ;;  %v3676_v44 = vadd.f32 %v8148_v55, %v3675_v50 }
 0x4d3   :  { %3867 = vst [vmem:[%s8457_s3 + $0x188] sm:$0xff] %v3803_v0  ;;  %v3802_v23 = vmax.f32 %v3676_v44, 0.0  ;;  %v4001_v40 = vmul.f32 %v3803_v0, %v3803_v0 }
 0x4d5   :  { %3866 = vst [vmem:[%s8457_s3 + $0x180] sm:$0xff] %v3802_v23  ;;  %v3929_v12 = vadd.f32 %v3928_v52, %v3802_v23  ;;  %v4000_v36 = vmul.f32 %v3802_v23, %v3802_v23 }
 0x4d7   :  { %v4063_v62 = vadd.f32 %v4062_v61, %v4000_v36  ;;  %v3930_v26 = vadd.f32 %v3929_v12, %v3803_v0 }
 0x4d9   :  { %v4064_v18 = vadd.f32 %v4063_v62, %v4001_v40 }
 0x4da   :  { %v4327_v31 = vpop.f32.mrf.mxu1 }
 0x4db   :  { %v3691_v15 = vadd.f32 %v8148_v55, %v4327_v31 }
 0x4dc   :  { %v3685_v6 = vpop.f32.mrf.mxu1 }
 0x4dd   :  { %v3805_v56 = vmax.f32 %v3691_v15, 0.0  ;;  %v3686_v28 = vadd.f32 %v8148_v55, %v3685_v6 }
 0x4df   :  { %3869 = vst [vmem:[%s8457_s3 + $0x198] sm:$0xff] %v3805_v56  ;;  %v3804_v46 = vmax.f32 %v3686_v28, 0.0  ;;  %v4003_v30 = vmul.f32 %v3805_v56, %v3805_v56 }
 0x4e1   :  { %3868 = vst [vmem:[%s8457_s3 + $0x190] sm:$0xff] %v3804_v46  ;;  %v3931_v25 = vadd.f32 %v3930_v26, %v3804_v46  ;;  %v4002_v43 = vmul.f32 %v3804_v46, %v3804_v46 }
 0x4e3   :  { %v4065_v58 = vadd.f32 %v4064_v18, %v4002_v43  ;;  %v3932_v53 = vadd.f32 %v3931_v25, %v3805_v56 }
 0x4e5   :  { %v4066_v37 = vadd.f32 %v4065_v58, %v4003_v30 }
 0x4e6   :  { %v4330_v9 = vpop.f32.mrf.mxu1 }
 0x4e7   :  { %v3701_v17 = vadd.f32 %v8148_v55, %v4330_v9 }
 0x4e8   :  { %v3695_v41 = vpop.f32.mrf.mxu1 }
 0x4e9   :  { %v3807_v11 = vmax.f32 %v3701_v17, 0.0  ;;  %v3696_v47 = vadd.f32 %v8148_v55, %v3695_v41 }
 0x4eb   :  { %3871 = vst [vmem:[%s8457_s3 + $0x1a8] sm:$0xff] %v3807_v11  ;;  %v3806_v57 = vmax.f32 %v3696_v47, 0.0  ;;  %v4005_v59 = vmul.f32 %v3807_v11, %v3807_v11 }
 0x4ed   :  { %3870 = vst [vmem:[%s8457_s3 + $0x1a0] sm:$0xff] %v3806_v57  ;;  %v4004_v63 = vmul.f32 %v3806_v57, %v3806_v57  ;;  %v3933_v54 = vadd.f32 %v3932_v53, %v3806_v57 }
 0x4ef   :  { %v4067_v27 = vadd.f32 %v4066_v37, %v4004_v63  ;;  %v3934_v51 = vadd.f32 %v3933_v54, %v3807_v11 }
 0x4f1   :  { %v4068_v48 = vadd.f32 %v4067_v27, %v4005_v59 }
 0x4f6   :  { %v4333_v3 = vpop.f32.mrf.mxu1 }
 0x4f7   :  { %v3711_v35 = vadd.f32 %v8148_v55, %v4333_v3 }
 0x4f8   :  { %v3705_v2 = vpop.f32.mrf.mxu1 }
 0x4f9   :  { %v3809_v24 = vmax.f32 %v3711_v35, 0.0  ;;  %v3706_v49 = vadd.f32 %v8148_v55, %v3705_v2 }
 0x4fb   :  { %3873 = vst [vmem:[%s8457_s3 + $0x1b8] sm:$0xff] %v3809_v24  ;;  %v3808_v45 = vmax.f32 %v3706_v49, 0.0  ;;  %v4007_v4 = vmul.f32 %v3809_v24, %v3809_v24 }
 0x4fd   :  { %3872 = vst [vmem:[%s8457_s3 + $0x1b0] sm:$0xff] %v3808_v45  ;;  %v4006_v42 = vmul.f32 %v3808_v45, %v3808_v45  ;;  %v3935_v10 = vadd.f32 %v3934_v51, %v3808_v45 }
 0x4ff   :  { %v4069_v39 = vadd.f32 %v4068_v48, %v4006_v42  ;;  %v3936_v13 = vadd.f32 %v3935_v10, %v3809_v24 }
 0x501   :  { %v4070_v7 = vadd.f32 %v4069_v39, %v4007_v4 }
 0x506   :  { %v4336_v32 = vpop.f32.mrf.mxu1 }
 0x507   :  { %v3721_v16 = vadd.f32 %v8148_v55, %v4336_v32 }
 0x508   :  { %v3715_v29 = vpop.f32.mrf.mxu1 }
 0x509   :  { %v3811_v8 = vmax.f32 %v3721_v16, 0.0  ;;  %v3716_v20 = vadd.f32 %v8148_v55, %v3715_v29 }
 0x50b   :  { %3875 = vst [vmem:[%s8457_s3 + $0x1c8] sm:$0xff] %v3811_v8  ;;  %v3810_v38 = vmax.f32 %v3716_v20, 0.0  ;;  %v4009_v12 = vmul.f32 %v3811_v8, %v3811_v8 }
 0x50d   :  { %3874 = vst [vmem:[%s8457_s3 + $0x1c0] sm:$0xff] %v3810_v38  ;;  %v4008_v33 = vmul.f32 %v3810_v38, %v3810_v38  ;;  %v3937_v61 = vadd.f32 %v3936_v13, %v3810_v38 }
 0x50f   :  { %v4071_v44 = vadd.f32 %v4070_v7, %v4008_v33  ;;  %v3938_v36 = vadd.f32 %v3937_v61, %v3811_v8 }
 0x511   :  { %v4072_v26 = vadd.f32 %v4071_v44, %v4009_v12 }
 0x516   :  { %v4339_v1 = vpop.f32.mrf.mxu1 }
 0x517   :  { %v3731_v60 = vadd.f32 %v8148_v55, %v4339_v1 }
 0x518   :  { %v3725_v34 = vpop.f32.mrf.mxu1 }
 0x519   :  { %v3813_v5 = vmax.f32 %v3731_v60, 0.0  ;;  %v3726_v21 = vadd.f32 %v8148_v55, %v3725_v34 }
 0x51b   :  { %3877 = vst [vmem:[%s8457_s3 + $0x1d8] sm:$0xff] %v3813_v5  ;;  %v3812_v22 = vmax.f32 %v3726_v21, 0.0  ;;  %v4011_v31 = vmul.f32 %v3813_v5, %v3813_v5 }
 0x51d   :  { %3876 = vst [vmem:[%s8457_s3 + $0x1d0] sm:$0xff] %v3812_v22  ;;  %v4010_v40 = vmul.f32 %v3812_v22, %v3812_v22  ;;  %v3939_v62 = vadd.f32 %v3938_v36, %v3812_v22 }
 0x51f   :  { %v4073_v18 = vadd.f32 %v4072_v26, %v4010_v40  ;;  %v3940_v15 = vadd.f32 %v3939_v62, %v3813_v5 }
 0x521   :  { %v4074_v46 = vadd.f32 %v4073_v18, %v4011_v31 }
 0x526   :  { %v4342_v14 = vpop.f32.mrf.mxu1 }
 0x527   :  { %v3741_v52 = vadd.f32 %v8148_v55, %v4342_v14 }
 0x528   :  { %v3735_v19 = vpop.f32.mrf.mxu1 }
 0x529   :  { %v3815_v50 = vmax.f32 %v3741_v52, 0.0  ;;  %v3736_v0 = vadd.f32 %v8148_v55, %v3735_v19 }
 0x52b   :  { %3879 = vst [vmem:[%s8457_s3 + $0x1e8] sm:$0xff] %v3815_v50  ;;  %v3814_v23 = vmax.f32 %v3736_v0, 0.0  ;;  %v4013_v37 = vmul.f32 %v3815_v50, %v3815_v50 }
 0x52d   :  { %3878 = vst [vmem:[%s8457_s3 + $0x1e0] sm:$0xff] %v3814_v23  ;;  %v4012_v6 = vmul.f32 %v3814_v23, %v3814_v23  ;;  %v3941_v28 = vadd.f32 %v3940_v15, %v3814_v23 }
 0x52f   :  { %v4075_v30 = vadd.f32 %v4074_v46, %v4012_v6  ;;  %v3942_v17 = vadd.f32 %v3941_v28, %v3815_v50 }
 0x531   :  { %v4076_v47 = vadd.f32 %v4075_v30, %v4013_v37 }
 0x533   :  { %v4345_v56 = vpop.f32.mrf.mxu1 }
 0x534   :  { %v3751_v25 = vadd.f32 %v8148_v55, %v4345_v56 }
 0x535   :  { %v3745_v43 = vpop.f32.mrf.mxu1 }
 0x536   :  { %v3817_v58 = vmax.f32 %v3751_v25, 0.0  ;;  %v3746_v53 = vadd.f32 %v8148_v55, %v3745_v43 }
 0x538   :  { %3881 = vst [vmem:[%s8457_s3 + $0x1f8] sm:$0xff] %v3817_v58  ;;  %v3816_v9 = vmax.f32 %v3746_v53, 0.0  ;;  %v4015_v57 = vmul.f32 %v3817_v58, %v3817_v58 }
 0x53a   :  { %3880 = vst [vmem:[%s8457_s3 + $0x1f0] sm:$0xff] %v3816_v9  ;;  %v3943_v41 = vadd.f32 %v3942_v17, %v3816_v9  ;;  %v4014_v11 = vmul.f32 %v3816_v9, %v3816_v9 }
 0x53c   :  { %v3944_v3 = vadd.f32 %v3943_v41, %v3817_v58  ;;  %v4077_v35 = vadd.f32 %v4076_v47, %v4014_v11 }
 0x53e   :  { %v3945_v2 = vrot.slane %v3944_v3, 4  ;;  %v4078_v24 = vadd.f32 %v4077_v35, %v4015_v57 }
 0x540   :  { %v3946_v55 = vadd.f32 %v3945_v2, %v3944_v3  ;;  %v4079_v49 = vrot.slane %v4078_v24, 4 }
 0x542   :  { %v3947_v45 = vrot.slane %v3946_v55, 2  ;;  %v4080_v32 = vadd.f32 %v4079_v49, %v4078_v24 }
 0x544   :  { %v3948_v16 = vadd.f32 %v3947_v45, %v3946_v55  ;;  %v4081_v29 = vrot.slane %v4080_v32, 2 }
 0x546   :  { %v3949_v8 = vrot.slane %v3948_v16, 1  ;;  %v4082_v20 = vadd.f32 %v4081_v29, %v4080_v32 }
 0x548   :  { %v3950_v38 = vadd.f32 %v3949_v8, %v3948_v16  ;;  %v4083_v1 = vrot.slane %v4082_v20, 1 }
 0x54a   :  { %3951 = vst [vmem:[%s8458_s4] sm:$0x1] %v3950_v38  ;;  %v4084_v60 = vadd.f32 %v4083_v1, %v4082_v20 }
 0x54c   :  { %4085 = vst [vmem:[%s8458_s4 + $0x1] sm:$0x1] %v4084_v60 }

</bundles_post_ra>
